<compile_context>
chip_gen: v7x
topology: tpu7x:2x2x1
jax: 0.10.0
libtpu: 0.0.40
codegen_flags: <defaults>
</compile_context>

<pallas_src>
import functools

import jax
import jax.numpy as jnp
from jax.experimental import pallas as pl
from jax.experimental.pallas import tpu as pltpu

TM_CAP = 256          # MXU-friendly row-tile cap (v6e/v7x edge; fine on v5e).
TK_MAX_SINGLE = 512   # K values up to this are taken in one block; larger K is
TK_TILE = 256         # tiled in TK_TILE chunks with an f32 VMEM accumulator.


def _round_up(x, m):
    return ((x + m - 1) // m) * m


# ----------------------------------------------------------------------------
# Pallas kernels
# ----------------------------------------------------------------------------
def _mm_kernel_single(x_ref, w_ref, s_ref, b_ref, o_ref, *, relu):
    """Single-K-block GEMM with fused BN-affine / ReLU epilogue (no scratch)."""
    y = jnp.dot(x_ref[...], w_ref[...], preferred_element_type=jnp.float32)
    y = y * s_ref[...] + b_ref[...]
    if relu:
        y = jnp.maximum(y, 0.0)
    o_ref[...] = y.astype(o_ref.dtype)


def _mm_kernel_acc(x_ref, w_ref, s_ref, b_ref, o_ref, acc_ref, *, relu):
    """K-tiled GEMM with an f32 VMEM accumulator and fused epilogue."""
    @pl.when(pl.program_id(1) == 0)
    def _():
        acc_ref[...] = jnp.zeros_like(acc_ref)

    acc_ref[...] += jnp.dot(x_ref[...], w_ref[...],
                            preferred_element_type=jnp.float32)

    @pl.when(pl.program_id(1) == pl.num_programs(1) - 1)
    def _():
        y = acc_ref[...] * s_ref[...] + b_ref[...]
        if relu:
            y = jnp.maximum(y, 0.0)
        o_ref[...] = y.astype(o_ref.dtype)


def _block_kernel(x_ref, wp_ref, w1_ref, s_ref, b_ref, w2_ref, o_ref,
                  *, nb, H, W, C, dc):
    """Fused FasterNetBlock for `nb` images:
         y1  = conv3x3(x[..., :dc])           (one in-VMEM im2col GEMM)
         h   = relu(bn(concat(y1, x2) @ W1))  (concat + lane-slice eliminated)
         out = x + h @ W2                     (residual; h never hits HBM)."""
    cdt = w1_ref.dtype                        # bf16 MXU input dtype
    rows = nb * H * W

    x = x_ref[...]                            # (nb, H, W, C)
    x1 = x[..., :dc]                          # lane-offset-0 slice, (nb,H,W,dc)

    # Zero halo built in VMEM (no extra padded HBM input).
    zc = jnp.zeros((nb, H, 1, dc), cdt)
    zr = jnp.zeros((nb, 1, W + 2, dc), cdt)
    xpad = jnp.concatenate([zc, x1, zc], axis=2)          # (nb, H,   W+2, dc)
    xpad = jnp.concatenate([zr, xpad, zr], axis=1)        # (nb, H+2, W+2, dc)

    # One im2col + one GEMM for the 3x3 partial conv (row order (kh, kw, cin)
    # must match how the pconv weight rows were flattened in make_params).
    taps = [xpad[:, dy:dy + H, dx:dx + W, :]
            for dy in range(3) for dx in range(3)]
    cols = jnp.concatenate(taps, axis=-1).reshape(rows, 9 * dc)
    y1 = jnp.dot(cols, wp_ref[...], preferred_element_type=jnp.float32)

    xf = x.reshape(rows, C)
    w1 = w1_ref[...]                                      # (C, Ce)

    # 1x1 expand:  concat([y1, x2]) @ W1 == xf @ W1 + (y1 - x1) @ W1[:dc]
    h = jnp.dot(xf, w1, preferred_element_type=jnp.float32)
    delta = y1 - x1.reshape(rows, dc).astype(jnp.float32)
    h = h + jnp.dot(delta.astype(cdt), w1[:dc, :],
                    preferred_element_type=jnp.float32)
    h = jnp.maximum(h * s_ref[...] + b_ref[...], 0.0)     # BN affine + ReLU

    # 1x1 project + residual (DropPath = identity at drop_rate=0).
    out = xf.astype(jnp.float32) + jnp.dot(h.astype(cdt), w2_ref[...],
                                           preferred_element_type=jnp.float32)
    o_ref[...] = out.reshape(nb, H, W, C).astype(o_ref.dtype)


def _head_kernel(x_ref, w1_ref, w2_ref, b_ref, o_ref, acc_ref, *, inv_hw):
    """Fused head: tiled global average pool -> 1x1 conv + ReLU -> Linear."""
    @pl.when(pl.program_id(0) == 0)
    def _():
        acc_ref[...] = jnp.zeros_like(acc_ref)

    acc_ref[...] += jnp.sum(x_ref[...].astype(jnp.float32), axis=1)

    @pl.when(pl.program_id(0) == pl.num_programs(0) - 1)
    def _():
        cdt = w1_ref.dtype
        pooled = (acc_ref[...] * inv_hw).astype(cdt)                 # (N, C)
        h = jnp.dot(pooled, w1_ref[...], preferred_element_type=jnp.float32)
        h = jnp.maximum(h, 0.0).astype(cdt)                          # (N, 1280)
        logits = (jnp.dot(h, w2_ref[...], preferred_element_type=jnp.float32)
                  + b_ref[...])
        o_ref[...] = logits.astype(o_ref.dtype)


# ----------------------------------------------------------------------------
# Pallas wrappers
# ----------------------------------------------------------------------------
def fused_matmul(x, w, scale=None, shift=None, *, relu=False,
                 out_dtype=jnp.bfloat16, tm_cap=TM_CAP):
    """y = relu?((x @ w) * scale + shift), tiled over rows and (if large) K."""
    M, K = x.shape
    K2, N = w.shape
    assert K == K2
    scale = jnp.ones((N,), jnp.float32) if scale is None else scale
    shift = jnp.zeros((N,), jnp.float32) if shift is None else shift
    scale = scale.reshape(1, N).astype(jnp.float32)
    shift = shift.reshape(1, N).astype(jnp.float32)

    # Row tile: largest tile <= cap. Prefer a divisor of M (multiple of 8) so
    # no wrapper-side HBM pad/copy of x is needed.  No megacore-motivated
    # halving: on single-TC v5e/v6e it only shrinks the GEMM.
    if M <= tm_cap:
        tm, Mp = M, M
    else:
        tm = 0
        for cand in range(tm_cap, 7, -8):
            if M % cand == 0:
                tm = cand
                break
        if tm:
            Mp = M
        else:
            # TODO(synk): handle the ragged M tail with a second call instead
            # of padding the whole activation in HBM.
            tm = tm_cap
            Mp = _round_up(M, tm)
            x = jnp.pad(x, ((0, Mp - M), (0, 0)))

    if K <= TK_MAX_SINGLE:
        # Fast path: single K block, no accumulator scratch, no extra VMEM
        # round trip.  (All GEMMs in this model take this path.)
        y = pl.pallas_call(
            functools.partial(_mm_kernel_single, relu=relu),
            grid=(Mp // tm,),
            in_specs=[
                pl.BlockSpec((tm, K), lambda i: (i, 0)),
                pl.BlockSpec((K, N), lambda i: (0, 0)),
                pl.BlockSpec((1, N), lambda i: (0, 0)),
                pl.BlockSpec((1, N), lambda i: (0, 0)),
            ],
            out_specs=pl.BlockSpec((tm, N), lambda i: (i, 0)),
            out_shape=jax.ShapeDtypeStruct((Mp, N), out_dtype),
            compiler_params=pltpu.CompilerParams(
                dimension_semantics=("parallel",)),
        )(x, w, scale, shift)
    else:
        tk = TK_TILE
        Kp = _round_up(K, tk)
        if Kp != K:
            x = jnp.pad(x, ((0, 0), (0, Kp - K)))
            w = jnp.pad(w, ((0, Kp - K), (0, 0)))
        y = pl.pallas_call(
            functools.partial(_mm_kernel_acc, relu=relu),
            grid=(Mp // tm, Kp // tk),
            in_specs=[
                pl.BlockSpec((tm, tk), lambda i, k: (i, k)),
                pl.BlockSpec((tk, N), lambda i, k: (k, 0)),
                pl.BlockSpec((1, N), lambda i, k: (0, 0)),
                pl.BlockSpec((1, N), lambda i, k: (0, 0)),
            ],
            out_specs=pl.BlockSpec((tm, N), lambda i, k: (i, 0)),
            out_shape=jax.ShapeDtypeStruct((Mp, N), out_dtype),
            scratch_shapes=[pltpu.VMEM((tm, N), jnp.float32)],
            compiler_params=pltpu.CompilerParams(
                dimension_semantics=("parallel", "arbitrary")),
        )(x, w, scale, shift)
    return y[:M] if Mp != M else y


def _block_vmem_bytes(nb, H, W, C, dc, Ce):
    """Rough per-grid-step VMEM footprint of the fused block kernel."""
    rows = nb * H * W
    bf = 2
    io = 2 * 2 * rows * C * bf                       # x & out, double-buffered
    pad = nb * (H + 2) * (W + 2) * dc * bf           # in-kernel padded copy
    im2col = rows * 9 * dc * bf
    f32tmp = 4 * rows * (dc + 2 * Ce + 2 * C)        # y1, h, delta, out (f32)
    wts = bf * (9 * dc * dc + 2 * C * Ce) + 8 * Ce
    return io + pad + im2col + f32tmp + wts


def _pick_nb(N, H, W, C, dc, Ce, target_rows=256, budget=8 << 20):
    """Images per grid step: fill ~256 GEMM rows, stay well under the smallest
    default scoped-VMEM budget (16 MiB on v5e, 32 MiB on v6e/v7x)."""
    nb = 1
    for cand in range(2, N + 1):
        if N % cand:
            continue
        if cand * H * W > target_rows:
            break
        if _block_vmem_bytes(cand, H, W, C, dc, Ce) > budget:
            break
        nb = cand
    return nb


def fasternet_block(p, x):
    """One fully fused FasterNetBlock (pconv + expand/BN/ReLU + project + res)."""
    N, H, W, C = x.shape
    dc = C // 4
    Ce = p['conv1_w'].shape[1]
    s, b = bn_scale_shift(p['bn1'])
    nb = _pick_nb(N, H, W, C, dc, Ce)
    # TODO(synk): for very large H*W (footprint over budget even at nb=1),
    # tile the spatial rows with halo BlockSpecs instead of one image per step.

    return pl.pallas_call(
        functools.partial(_block_kernel, nb=nb, H=H, W=W, C=C, dc=dc),
        grid=(N // nb,),
        in_specs=[
            pl.BlockSpec((nb, H, W, C), lambda i: (i, 0, 0, 0)),
            pl.BlockSpec((9 * dc, dc), lambda i: (0, 0)),
            pl.BlockSpec((C, Ce), lambda i: (0, 0)),
            pl.BlockSpec((1, Ce), lambda i: (0, 0)),
            pl.BlockSpec((1, Ce), lambda i: (0, 0)),
            pl.BlockSpec((Ce, C), lambda i: (0, 0)),
        ],
        out_specs=pl.BlockSpec((nb, H, W, C), lambda i: (i, 0, 0, 0)),
        out_shape=jax.ShapeDtypeStruct((N, H, W, C), x.dtype),
        compiler_params=pltpu.CompilerParams(
            dimension_semantics=("parallel",)),
    )(x, p['pconv_w'], p['conv1_w'],
      s.reshape(1, Ce), b.reshape(1, Ce), p['conv2_w'])


def head_forward(params, x_nhwc, out_dtype=jnp.float32):
    """Fused head: avg-pool -> 1x1 conv(1280) -> ReLU -> Linear, one kernel."""
    N, H, W, C = x_nhwc.shape
    HW = H * W
    x3 = x_nhwc.reshape(N, HW, C)
    ts = HW if HW <= 512 else 512
    HWp = _round_up(HW, ts)
    if HWp != HW:
        x3 = jnp.pad(x3, ((0, 0), (0, HWp - HW), (0, 0)))  # zeros don't bias sum

    w1 = params['head_w']                                  # (C, 1280)
    w2 = params['fc_w']                                    # (1280, classes)
    nh = w1.shape[1]
    nc = w2.shape[1]
    fb = params['fc_b'].reshape(1, nc).astype(jnp.float32)

    return pl.pallas_call(
        functools.partial(_head_kernel, inv_hw=1.0 / HW),
        grid=(HWp // ts,),
        in_specs=[
            pl.BlockSpec((N, ts, C), lambda s: (0, s, 0)),
            pl.BlockSpec((C, nh), lambda s: (0, 0)),
            pl.BlockSpec((nh, nc), lambda s: (0, 0)),
            pl.BlockSpec((1, nc), lambda s: (0, 0)),
        ],
        out_specs=pl.BlockSpec((N, nc), lambda s: (0, 0)),
        out_shape=jax.ShapeDtypeStruct((N, nc), out_dtype),
        scratch_shapes=[pltpu.VMEM((N, C), jnp.float32)],
        compiler_params=pltpu.CompilerParams(
            dimension_semantics=("arbitrary",)),
    )(x3, w1, w2, fb)


# ----------------------------------------------------------------------------
# Plain-JAX glue (layout / patch extraction / param setup)
# ----------------------------------------------------------------------------
def patchify(x, k):
    """Non-overlapping kxk patches (stride == kernel): (N,H,W,C)->(M, k*k*C)."""
    N, H, W, C = x.shape
    Ho, Wo = H // k, W // k
    x = x.reshape(N, Ho, k, Wo, k, C).transpose(0, 1, 3, 2, 4, 5)
    return x.reshape(N * Ho * Wo, k * k * C), (N, Ho, Wo)


def bn_scale_shift(bn, eps=1e-5):
    scale = bn['gamma'] / jnp.sqrt(bn['var'] + eps)
    shift = bn['beta'] - bn['mean'] * scale
    return scale.astype(jnp.float32), shift.astype(jnp.float32)


def make_params(key, in_channel=3, embed_dim=16, depths=(1, 1),
                num_classes=8, expand=2):
    keys = iter(jax.random.split(key, 64))

    def conv_w(shape, fan_in):
        # kaiming-normal, stored GEMM-ready ((kh,kw,cin) row order, cout cols),
        # carried in bf16 for MXU; accumulation is always f32 in-kernel.
        # NOTE: when porting real PyTorch checkpoints, (cout,cin,kh,kw) weights
        # must be transposed to this (kh,kw,cin)->cout layout.
        std = (2.0 / fan_in) ** 0.5
        w = jax.random.normal(next(keys), shape, jnp.float32) * std
        return w.astype(jnp.bfloat16)

    def bn(c):
        return dict(gamma=jnp.ones((c,), jnp.float32),
                    beta=jnp.zeros((c,), jnp.float32),
                    mean=jnp.zeros((c,), jnp.float32),
                    var=jnp.ones((c,), jnp.float32))

    params = {'stem_w': conv_w((4 * 4 * in_channel, embed_dim), 4 * 4 * in_channel),
              'stem_bn': bn(embed_dim)}
    dim = embed_dim
    stages = []
    for idx, depth in enumerate(depths):
        blocks = []
        for _ in range(depth):
            dc = dim // 4
            blocks.append(dict(
                pconv_w=conv_w((9 * dc, dc), 9 * dc),
                conv1_w=conv_w((dim, dim * expand), dim),
                bn1=bn(dim * expand),
                conv2_w=conv_w((dim * expand, dim), dim * expand),
            ))
        down = None
        if idx < len(depths) - 1:
            down = dict(w=conv_w((4 * dim, dim * 2), 4 * dim), bn=bn(dim * 2))
            dim = dim * 2
        stages.append(dict(blocks=blocks, down=down))
    params['stages'] = stages
    params['head_w'] = conv_w((dim, 1280), dim)
    params['fc_w'] = (jax.random.normal(next(keys), (1280, num_classes),
                                        jnp.float32)
                      * (1.0 / 1280 ** 0.5)).astype(jnp.bfloat16)
    params['fc_b'] = jnp.zeros((num_classes,), jnp.float32)
    return params


# ----------------------------------------------------------------------------
# Model forward
# ----------------------------------------------------------------------------
def fasternet_forward(params, x_nchw):
    # NCHW (PyTorch) -> NHWC, bf16 activations between kernels.
    x = jnp.transpose(x_nchw, (0, 2, 3, 1)).astype(jnp.bfloat16)

    # Stem: 4x4/s4 conv + BN + ReLU  (patchify -> fused GEMM).
    cols, (N, Ho, Wo) = patchify(x, 4)
    s, b = bn_scale_shift(params['stem_bn'])
    x = fused_matmul(cols, params['stem_w'], s, b, relu=True)
    x = x.reshape(N, Ho, Wo, -1)

    # Feature stages.
    for stage in params['stages']:
        for blk in stage['blocks']:
            x = fasternet_block(blk, x)
        if stage['down'] is not None:
            d = stage['down']
            cols, (N, Ho, Wo) = patchify(x, 2)
            s, b = bn_scale_shift(d['bn'])
            x = fused_matmul(cols, d['w'], s, b, relu=True)
            x = x.reshape(N, Ho, Wo, -1)

    # Head: fused global avg pool -> 1x1 conv (1280) -> ReLU -> Linear.
    return head_forward(params, x)


if __name__ == "__main__":
    key = jax.random.PRNGKey(0)
    pkey, xkey = jax.random.split(key)
    params = make_params(pkey, in_channel=3, embed_dim=16, depths=(1, 1),
                         num_classes=8)
    x = jax.random.normal(xkey, (2, 3, 32, 32), jnp.float32)   # NCHW input
    fwd = jax.jit(fasternet_forward)
    out = jax.block_until_ready(fwd(params, x))
    assert out.shape == (2, 8)
    print("KERNEL_OK")
</pallas_src>

<mosaic_0001>
module attributes {stable_mosaic.version = 11 : i64} {
  func.func @_mm_kernel_single(%arg0: i32, %arg1: memref<128x48xbf16, #tpu.memory_space<vmem>>, %arg2: memref<48x16xbf16, #tpu.memory_space<vmem>>, %arg3: memref<1x16xf32, #tpu.memory_space<vmem>>, %arg4: memref<1x16xf32, #tpu.memory_space<vmem>>, %arg5: memref<128x16xbf16, #tpu.memory_space<vmem>>) attributes {dimension_semantics = [#tpu.dimension_semantics<parallel>], iteration_bounds = array<i64: 1>, scalar_prefetch = 0 : i64, scratch_operands = 0 : i64, tpu.core_type = #tpu.core_type<tc>, window_params = [{transform_indices = @transform_0, window_bounds = array<i64: 128, 48>}, {pipeline_mode = #tpu.pipeline_mode<synchronous>, transform_indices = @transform_1, window_bounds = array<i64: 48, 16>}, {pipeline_mode = #tpu.pipeline_mode<synchronous>, transform_indices = @transform_2, window_bounds = array<i64: 1, 16>}, {pipeline_mode = #tpu.pipeline_mode<synchronous>, transform_indices = @transform_3, window_bounds = array<i64: 1, 16>}, {transform_indices = @transform_4, window_bounds = array<i64: 128, 16>}]} {
    %c0 = arith.constant 0 : index
    %c0_0 = arith.constant 0 : index
    %0 = vector.load %arg1[%c0, %c0_0] : memref<128x48xbf16, #tpu.memory_space<vmem>>, vector<128x48xbf16>
    %c0_1 = arith.constant 0 : index
    %c0_2 = arith.constant 0 : index
    %1 = vector.load %arg2[%c0_1, %c0_2] : memref<48x16xbf16, #tpu.memory_space<vmem>>, vector<48x16xbf16>
    %cst = arith.constant dense<0.000000e+00> : vector<128x16xf32>
    %2 = tpu.matmul %0, %1, %cst {dimension_numbers = #tpu.dot_dimension_numbers<[1], [0], [0], [1], [0, 0, 1, 1], [], []>} : vector<128x48xbf16>, vector<48x16xbf16>, vector<128x16xf32> -> vector<128x16xf32>
    %c0_3 = arith.constant 0 : index
    %c0_4 = arith.constant 0 : index
    %3 = vector.load %arg3[%c0_3, %c0_4] : memref<1x16xf32, #tpu.memory_space<vmem>>, vector<1x16xf32>
    %4 = vector.broadcast %3 : vector<1x16xf32> to vector<128x16xf32>
    %5 = arith.mulf %2, %4 : vector<128x16xf32>
    %c0_5 = arith.constant 0 : index
    %c0_6 = arith.constant 0 : index
    %6 = vector.load %arg4[%c0_5, %c0_6] : memref<1x16xf32, #tpu.memory_space<vmem>>, vector<1x16xf32>
    %7 = vector.broadcast %6 : vector<1x16xf32> to vector<128x16xf32>
    %8 = arith.addf %5, %7 : vector<128x16xf32>
    %cst_7 = arith.constant 0.000000e+00 : f32
    %9 = vector.broadcast %cst_7 : f32 to vector<128x16xf32>
    %10 = arith.maximumf %8, %9 : vector<128x16xf32>
    %11 = arith.truncf %10 : vector<128x16xf32> to vector<128x16xbf16>
    %c0_8 = arith.constant 0 : index
    %c0_9 = arith.constant 0 : index
    %12 = vector.load %arg5[%c0_8, %c0_9] : memref<128x16xbf16, #tpu.memory_space<vmem>>, vector<128x16xbf16>
    tpu.vector_store %arg5[%c0_8, %c0_9], %11 {strides = array<i32>} : memref<128x16xbf16, #tpu.memory_space<vmem>>, vector<128x16xbf16>,
    return
  }
  func.func @transform_0(%arg0: i32) -> (i32, i32) {
    %c0_i32 = arith.constant 0 : i32
    %c0_i32_0 = arith.constant 0 : i32
    return %arg0, %c0_i32 : i32, i32
  }
  func.func @transform_1(%arg0: i32) -> (i32, i32) {
    %c0_i32 = arith.constant 0 : i32
    %c0_i32_0 = arith.constant 0 : i32
    %c0_i32_1 = arith.constant 0 : i32
    return %c0_i32, %c0_i32_0 : i32, i32
  }
  func.func @transform_2(%arg0: i32) -> (i32, i32) {
    %c0_i32 = arith.constant 0 : i32
    %c0_i32_0 = arith.constant 0 : i32
    %c0_i32_1 = arith.constant 0 : i32
    return %c0_i32, %c0_i32_0 : i32, i32
  }
  func.func @transform_3(%arg0: i32) -> (i32, i32) {
    %c0_i32 = arith.constant 0 : i32
    %c0_i32_0 = arith.constant 0 : i32
    %c0_i32_1 = arith.constant 0 : i32
    return %c0_i32, %c0_i32_0 : i32, i32
  }
  func.func @transform_4(%arg0: i32) -> (i32, i32) {
    %c0_i32 = arith.constant 0 : i32
    %c0_i32_0 = arith.constant 0 : i32
    return %arg0, %c0_i32 : i32, i32
  }
}

module attributes {stable_mosaic.version = 11 : i64} {
  func.func @_block_kernel(%arg0: i32, %arg1: memref<2x8x8x16xbf16, #tpu.memory_space<vmem>>, %arg2: memref<36x4xbf16, #tpu.memory_space<vmem>>, %arg3: memref<16x32xbf16, #tpu.memory_space<vmem>>, %arg4: memref<1x32xf32, #tpu.memory_space<vmem>>, %arg5: memref<1x32xf32, #tpu.memory_space<vmem>>, %arg6: memref<32x16xbf16, #tpu.memory_space<vmem>>, %arg7: memref<2x8x8x16xbf16, #tpu.memory_space<vmem>>) attributes {dimension_semantics = [#tpu.dimension_semantics<parallel>], iteration_bounds = array<i64: 1>, scalar_prefetch = 0 : i64, scratch_operands = 0 : i64, tpu.core_type = #tpu.core_type<tc>, window_params = [{transform_indices = @transform_0, window_bounds = array<i64: 2, 8, 8, 16>}, {pipeline_mode = #tpu.pipeline_mode<synchronous>, transform_indices = @transform_1, window_bounds = array<i64: 36, 4>}, {pipeline_mode = #tpu.pipeline_mode<synchronous>, transform_indices = @transform_2, window_bounds = array<i64: 16, 32>}, {pipeline_mode = #tpu.pipeline_mode<synchronous>, transform_indices = @transform_3, window_bounds = array<i64: 1, 32>}, {pipeline_mode = #tpu.pipeline_mode<synchronous>, transform_indices = @transform_4, window_bounds = array<i64: 1, 32>}, {pipeline_mode = #tpu.pipeline_mode<synchronous>, transform_indices = @transform_5, window_bounds = array<i64: 32, 16>}, {transform_indices = @transform_6, window_bounds = array<i64: 2, 8, 8, 16>}]} {
    %c0 = arith.constant 0 : index
    %c0_0 = arith.constant 0 : index
    %c0_1 = arith.constant 0 : index
    %c0_2 = arith.constant 0 : index
    %0 = vector.load %arg1[%c0, %c0_0, %c0_1, %c0_2] : memref<2x8x8x16xbf16, #tpu.memory_space<vmem>>, vector<2x8x8x16xbf16>
    %1 = vector.extract_strided_slice %0 {offsets = [0, 0, 0, 0], sizes = [2, 8, 8, 4], strides = [1, 1, 1, 1]} : vector<2x8x8x16xbf16> to vector<2x8x8x4xbf16>
    %cst = arith.constant 0.000000e+00 : bf16
    %2 = vector.broadcast %cst : bf16 to vector<2x8x1x4xbf16>
    %cst_3 = arith.constant 0.000000e+00 : bf16
    %3 = vector.broadcast %cst_3 : bf16 to vector<2x1x10x4xbf16>
    %4 = tpu.concatenate %2, %1, %2 in 2 : vector<2x8x1x4xbf16>, vector<2x8x8x4xbf16>, vector<2x8x1x4xbf16> -> vector<2x8x10x4xbf16>
    %5 = tpu.concatenate %3, %4, %3 in 1 : vector<2x1x10x4xbf16>, vector<2x8x10x4xbf16>, vector<2x1x10x4xbf16> -> vector<2x10x10x4xbf16>
    %6 = vector.extract_strided_slice %5 {offsets = [0, 0, 0, 0], sizes = [2, 8, 8, 4], strides = [1, 1, 1, 1]} : vector<2x10x10x4xbf16> to vector<2x8x8x4xbf16>
    %7 = vector.extract_strided_slice %5 {offsets = [0, 0, 1, 0], sizes = [2, 8, 8, 4], strides = [1, 1, 1, 1]} : vector<2x10x10x4xbf16> to vector<2x8x8x4xbf16>
    %8 = vector.extract_strided_slice %5 {offsets = [0, 0, 2, 0], sizes = [2, 8, 8, 4], strides = [1, 1, 1, 1]} : vector<2x10x10x4xbf16> to vector<2x8x8x4xbf16>
    %9 = vector.extract_strided_slice %5 {offsets = [0, 1, 0, 0], sizes = [2, 8, 8, 4], strides = [1, 1, 1, 1]} : vector<2x10x10x4xbf16> to vector<2x8x8x4xbf16>
    %10 = vector.extract_strided_slice %5 {offsets = [0, 1, 1, 0], sizes = [2, 8, 8, 4], strides = [1, 1, 1, 1]} : vector<2x10x10x4xbf16> to vector<2x8x8x4xbf16>
    %11 = vector.extract_strided_slice %5 {offsets = [0, 1, 2, 0], sizes = [2, 8, 8, 4], strides = [1, 1, 1, 1]} : vector<2x10x10x4xbf16> to vector<2x8x8x4xbf16>
    %12 = vector.extract_strided_slice %5 {offsets = [0, 2, 0, 0], sizes = [2, 8, 8, 4], strides = [1, 1, 1, 1]} : vector<2x10x10x4xbf16> to vector<2x8x8x4xbf16>
    %13 = vector.extract_strided_slice %5 {offsets = [0, 2, 1, 0], sizes = [2, 8, 8, 4], strides = [1, 1, 1, 1]} : vector<2x10x10x4xbf16> to vector<2x8x8x4xbf16>
    %14 = vector.extract_strided_slice %5 {offsets = [0, 2, 2, 0], sizes = [2, 8, 8, 4], strides = [1, 1, 1, 1]} : vector<2x10x10x4xbf16> to vector<2x8x8x4xbf16>
    %15 = tpu.concatenate %6, %7, %8, %9, %10, %11, %12, %13, %14 in 3 : vector<2x8x8x4xbf16>, vector<2x8x8x4xbf16>, vector<2x8x8x4xbf16>, vector<2x8x8x4xbf16>, vector<2x8x8x4xbf16>, vector<2x8x8x4xbf16>, vector<2x8x8x4xbf16>, vector<2x8x8x4xbf16>, vector<2x8x8x4xbf16> -> vector<2x8x8x36xbf16>
    %16 = vector.shape_cast %15 : vector<2x8x8x36xbf16> to vector<128x36xbf16>
    %c0_4 = arith.constant 0 : index
    %c0_5 = arith.constant 0 : index
    %17 = vector.load %arg2[%c0_4, %c0_5] : memref<36x4xbf16, #tpu.memory_space<vmem>>, vector<36x4xbf16>
    %cst_6 = arith.constant dense<0.000000e+00> : vector<128x4xf32>
    %18 = tpu.matmul %16, %17, %cst_6 {dimension_numbers = #tpu.dot_dimension_numbers<[1], [0], [0], [1], [0, 0, 1, 1], [], []>} : vector<128x36xbf16>, vector<36x4xbf16>, vector<128x4xf32> -> vector<128x4xf32>
    %19 = vector.shape_cast %0 : vector<2x8x8x16xbf16> to vector<128x16xbf16>
    %c0_7 = arith.constant 0 : index
    %c0_8 = arith.constant 0 : index
    %20 = vector.load %arg3[%c0_7, %c0_8] : memref<16x32xbf16, #tpu.memory_space<vmem>>, vector<16x32xbf16>
    %cst_9 = arith.constant dense<0.000000e+00> : vector<128x32xf32>
    %21 = tpu.matmul %19, %20, %cst_9 {dimension_numbers = #tpu.dot_dimension_numbers<[1], [0], [0], [1], [0, 0, 1, 1], [], []>} : vector<128x16xbf16>, vector<16x32xbf16>, vector<128x32xf32> -> vector<128x32xf32>
    %22 = vector.shape_cast %1 : vector<2x8x8x4xbf16> to vector<128x4xbf16>
    %23 = arith.extf %22 : vector<128x4xbf16> to vector<128x4xf32>
    %24 = arith.subf %18, %23 : vector<128x4xf32>
    %25 = arith.truncf %24 : vector<128x4xf32> to vector<128x4xbf16>
    %26 = vector.extract_strided_slice %20 {offsets = [0, 0], sizes = [4, 32], strides = [1, 1]} : vector<16x32xbf16> to vector<4x32xbf16>
    %cst_10 = arith.constant dense<0.000000e+00> : vector<128x32xf32>
    %27 = tpu.matmul %25, %26, %cst_10 {dimension_numbers = #tpu.dot_dimension_numbers<[1], [0], [0], [1], [0, 0, 1, 1], [], []>} : vector<128x4xbf16>, vector<4x32xbf16>, vector<128x32xf32> -> vector<128x32xf32>
    %28 = arith.addf %21, %27 : vector<128x32xf32>
    %c0_11 = arith.constant 0 : index
    %c0_12 = arith.constant 0 : index
    %29 = vector.load %arg4[%c0_11, %c0_12] : memref<1x32xf32, #tpu.memory_space<vmem>>, vector<1x32xf32>
    %30 = vector.broadcast %29 : vector<1x32xf32> to vector<128x32xf32>
    %31 = arith.mulf %28, %30 : vector<128x32xf32>
    %c0_13 = arith.constant 0 : index
    %c0_14 = arith.constant 0 : index
    %32 = vector.load %arg5[%c0_13, %c0_14] : memref<1x32xf32, #tpu.memory_space<vmem>>, vector<1x32xf32>
    %33 = vector.broadcast %32 : vector<1x32xf32> to vector<128x32xf32>
    %34 = arith.addf %31, %33 : vector<128x32xf32>
    %cst_15 = arith.constant 0.000000e+00 : f32
    %35 = vector.broadcast %cst_15 : f32 to vector<128x32xf32>
    %36 = arith.maximumf %34, %35 : vector<128x32xf32>
    %37 = arith.extf %19 : vector<128x16xbf16> to vector<128x16xf32>
    %38 = arith.truncf %36 : vector<128x32xf32> to vector<128x32xbf16>
    %c0_16 = arith.constant 0 : index
    %c0_17 = arith.constant 0 : index
    %39 = vector.load %arg6[%c0_16, %c0_17] : memref<32x16xbf16, #tpu.memory_space<vmem>>, vector<32x16xbf16>
    %cst_18 = arith.constant dense<0.000000e+00> : vector<128x16xf32>
    %40 = tpu.matmul %38, %39, %cst_18 {dimension_numbers = #tpu.dot_dimension_numbers<[1], [0], [0], [1], [0, 0, 1, 1], [], []>} : vector<128x32xbf16>, vector<32x16xbf16>, vector<128x16xf32> -> vector<128x16xf32>
    %41 = arith.addf %37, %40 : vector<128x16xf32>
    %42 = vector.shape_cast %41 : vector<128x16xf32> to vector<2x8x8x16xf32>
    %43 = arith.truncf %42 : vector<2x8x8x16xf32> to vector<2x8x8x16xbf16>
    %c0_19 = arith.constant 0 : index
    %c0_20 = arith.constant 0 : index
    %c0_21 = arith.constant 0 : index
    %c0_22 = arith.constant 0 : index
    %44 = vector.load %arg7[%c0_19, %c0_20, %c0_21, %c0_22] : memref<2x8x8x16xbf16, #tpu.memory_space<vmem>>, vector<2x8x8x16xbf16>
    tpu.vector_store %arg7[%c0_19, %c0_20, %c0_21, %c0_22], %43 {strides = array<i32>} : memref<2x8x8x16xbf16, #tpu.memory_space<vmem>>, vector<2x8x8x16xbf16>,
    return
  }
  func.func @transform_0(%arg0: i32) -> (i32, i32, i32, i32) {
    %c0_i32 = arith.constant 0 : i32
    %c0_i32_0 = arith.constant 0 : i32
    %c0_i32_1 = arith.constant 0 : i32
    %c0_i32_2 = arith.constant 0 : i32
    return %arg0, %c0_i32, %c0_i32_0, %c0_i32_1 : i32, i32, i32, i32
  }
  func.func @transform_1(%arg0: i32) -> (i32, i32) {
    %c0_i32 = arith.constant 0 : i32
    %c0_i32_0 = arith.constant 0 : i32
    %c0_i32_1 = arith.constant 0 : i32
    return %c0_i32, %c0_i32_0 : i32, i32
  }
  func.func @transform_2(%arg0: i32) -> (i32, i32) {
    %c0_i32 = arith.constant 0 : i32
    %c0_i32_0 = arith.constant 0 : i32
    %c0_i32_1 = arith.constant 0 : i32
    return %c0_i32, %c0_i32_0 : i32, i32
  }
  func.func @transform_3(%arg0: i32) -> (i32, i32) {
    %c0_i32 = arith.constant 0 : i32
    %c0_i32_0 = arith.constant 0 : i32
    %c0_i32_1 = arith.constant 0 : i32
    return %c0_i32, %c0_i32_0 : i32, i32
  }
  func.func @transform_4(%arg0: i32) -> (i32, i32) {
    %c0_i32 = arith.constant 0 : i32
    %c0_i32_0 = arith.constant 0 : i32
    %c0_i32_1 = arith.constant 0 : i32
    return %c0_i32, %c0_i32_0 : i32, i32
  }
  func.func @transform_5(%arg0: i32) -> (i32, i32) {
    %c0_i32 = arith.constant 0 : i32
    %c0_i32_0 = arith.constant 0 : i32
    %c0_i32_1 = arith.constant 0 : i32
    return %c0_i32, %c0_i32_0 : i32, i32
  }
  func.func @transform_6(%arg0: i32) -> (i32, i32, i32, i32) {
    %c0_i32 = arith.constant 0 : i32
    %c0_i32_0 = arith.constant 0 : i32
    %c0_i32_1 = arith.constant 0 : i32
    %c0_i32_2 = arith.constant 0 : i32
    return %arg0, %c0_i32, %c0_i32_0, %c0_i32_1 : i32, i32, i32, i32
  }
}

module attributes {stable_mosaic.version = 11 : i64} {
  func.func @_mm_kernel_single(%arg0: i32, %arg1: memref<32x64xbf16, #tpu.memory_space<vmem>>, %arg2: memref<64x32xbf16, #tpu.memory_space<vmem>>, %arg3: memref<1x32xf32, #tpu.memory_space<vmem>>, %arg4: memref<1x32xf32, #tpu.memory_space<vmem>>, %arg5: memref<32x32xbf16, #tpu.memory_space<vmem>>) attributes {dimension_semantics = [#tpu.dimension_semantics<parallel>], iteration_bounds = array<i64: 1>, scalar_prefetch = 0 : i64, scratch_operands = 0 : i64, tpu.core_type = #tpu.core_type<tc>, window_params = [{transform_indices = @transform_0, window_bounds = array<i64: 32, 64>}, {pipeline_mode = #tpu.pipeline_mode<synchronous>, transform_indices = @transform_1, window_bounds = array<i64: 64, 32>}, {pipeline_mode = #tpu.pipeline_mode<synchronous>, transform_indices = @transform_2, window_bounds = array<i64: 1, 32>}, {pipeline_mode = #tpu.pipeline_mode<synchronous>, transform_indices = @transform_3, window_bounds = array<i64: 1, 32>}, {transform_indices = @transform_4, window_bounds = array<i64: 32, 32>}]} {
    %c0 = arith.constant 0 : index
    %c0_0 = arith.constant 0 : index
    %0 = vector.load %arg1[%c0, %c0_0] : memref<32x64xbf16, #tpu.memory_space<vmem>>, vector<32x64xbf16>
    %c0_1 = arith.constant 0 : index
    %c0_2 = arith.constant 0 : index
    %1 = vector.load %arg2[%c0_1, %c0_2] : memref<64x32xbf16, #tpu.memory_space<vmem>>, vector<64x32xbf16>
    %cst = arith.constant dense<0.000000e+00> : vector<32x32xf32>
    %2 = tpu.matmul %0, %1, %cst {dimension_numbers = #tpu.dot_dimension_numbers<[1], [0], [0], [1], [0, 0, 1, 1], [], []>} : vector<32x64xbf16>, vector<64x32xbf16>, vector<32x32xf32> -> vector<32x32xf32>
    %c0_3 = arith.constant 0 : index
    %c0_4 = arith.constant 0 : index
    %3 = vector.load %arg3[%c0_3, %c0_4] : memref<1x32xf32, #tpu.memory_space<vmem>>, vector<1x32xf32>
    %4 = vector.broadcast %3 : vector<1x32xf32> to vector<32x32xf32>
    %5 = arith.mulf %2, %4 : vector<32x32xf32>
    %c0_5 = arith.constant 0 : index
    %c0_6 = arith.constant 0 : index
    %6 = vector.load %arg4[%c0_5, %c0_6] : memref<1x32xf32, #tpu.memory_space<vmem>>, vector<1x32xf32>
    %7 = vector.broadcast %6 : vector<1x32xf32> to vector<32x32xf32>
    %8 = arith.addf %5, %7 : vector<32x32xf32>
    %cst_7 = arith.constant 0.000000e+00 : f32
    %9 = vector.broadcast %cst_7 : f32 to vector<32x32xf32>
    %10 = arith.maximumf %8, %9 : vector<32x32xf32>
    %11 = arith.truncf %10 : vector<32x32xf32> to vector<32x32xbf16>
    %c0_8 = arith.constant 0 : index
    %c0_9 = arith.constant 0 : index
    %12 = vector.load %arg5[%c0_8, %c0_9] : memref<32x32xbf16, #tpu.memory_space<vmem>>, vector<32x32xbf16>
    tpu.vector_store %arg5[%c0_8, %c0_9], %11 {strides = array<i32>} : memref<32x32xbf16, #tpu.memory_space<vmem>>, vector<32x32xbf16>,
    return
  }
  func.func @transform_0(%arg0: i32) -> (i32, i32) {
    %c0_i32 = arith.constant 0 : i32
    %c0_i32_0 = arith.constant 0 : i32
    return %arg0, %c0_i32 : i32, i32
  }
  func.func @transform_1(%arg0: i32) -> (i32, i32) {
    %c0_i32 = arith.constant 0 : i32
    %c0_i32_0 = arith.constant 0 : i32
    %c0_i32_1 = arith.constant 0 : i32
    return %c0_i32, %c0_i32_0 : i32, i32
  }
  func.func @transform_2(%arg0: i32) -> (i32, i32) {
    %c0_i32 = arith.constant 0 : i32
    %c0_i32_0 = arith.constant 0 : i32
    %c0_i32_1 = arith.constant 0 : i32
    return %c0_i32, %c0_i32_0 : i32, i32
  }
  func.func @transform_3(%arg0: i32) -> (i32, i32) {
    %c0_i32 = arith.constant 0 : i32
    %c0_i32_0 = arith.constant 0 : i32
    %c0_i32_1 = arith.constant 0 : i32
    return %c0_i32, %c0_i32_0 : i32, i32
  }
  func.func @transform_4(%arg0: i32) -> (i32, i32) {
    %c0_i32 = arith.constant 0 : i32
    %c0_i32_0 = arith.constant 0 : i32
    return %arg0, %c0_i32 : i32, i32
  }
}

module attributes {stable_mosaic.version = 11 : i64} {
  func.func @_block_kernel(%arg0: i32, %arg1: memref<2x4x4x32xbf16, #tpu.memory_space<vmem>>, %arg2: memref<72x8xbf16, #tpu.memory_space<vmem>>, %arg3: memref<32x64xbf16, #tpu.memory_space<vmem>>, %arg4: memref<1x64xf32, #tpu.memory_space<vmem>>, %arg5: memref<1x64xf32, #tpu.memory_space<vmem>>, %arg6: memref<64x32xbf16, #tpu.memory_space<vmem>>, %arg7: memref<2x4x4x32xbf16, #tpu.memory_space<vmem>>) attributes {dimension_semantics = [#tpu.dimension_semantics<parallel>], iteration_bounds = array<i64: 1>, scalar_prefetch = 0 : i64, scratch_operands = 0 : i64, tpu.core_type = #tpu.core_type<tc>, window_params = [{transform_indices = @transform_0, window_bounds = array<i64: 2, 4, 4, 32>}, {pipeline_mode = #tpu.pipeline_mode<synchronous>, transform_indices = @transform_1, window_bounds = array<i64: 72, 8>}, {pipeline_mode = #tpu.pipeline_mode<synchronous>, transform_indices = @transform_2, window_bounds = array<i64: 32, 64>}, {pipeline_mode = #tpu.pipeline_mode<synchronous>, transform_indices = @transform_3, window_bounds = array<i64: 1, 64>}, {pipeline_mode = #tpu.pipeline_mode<synchronous>, transform_indices = @transform_4, window_bounds = array<i64: 1, 64>}, {pipeline_mode = #tpu.pipeline_mode<synchronous>, transform_indices = @transform_5, window_bounds = array<i64: 64, 32>}, {transform_indices = @transform_6, window_bounds = array<i64: 2, 4, 4, 32>}]} {
    %c0 = arith.constant 0 : index
    %c0_0 = arith.constant 0 : index
    %c0_1 = arith.constant 0 : index
    %c0_2 = arith.constant 0 : index
    %0 = vector.load %arg1[%c0, %c0_0, %c0_1, %c0_2] : memref<2x4x4x32xbf16, #tpu.memory_space<vmem>>, vector<2x4x4x32xbf16>
    %1 = vector.extract_strided_slice %0 {offsets = [0, 0, 0, 0], sizes = [2, 4, 4, 8], strides = [1, 1, 1, 1]} : vector<2x4x4x32xbf16> to vector<2x4x4x8xbf16>
    %cst = arith.constant 0.000000e+00 : bf16
    %2 = vector.broadcast %cst : bf16 to vector<2x4x1x8xbf16>
    %cst_3 = arith.constant 0.000000e+00 : bf16
    %3 = vector.broadcast %cst_3 : bf16 to vector<2x1x6x8xbf16>
    %4 = tpu.concatenate %2, %1, %2 in 2 : vector<2x4x1x8xbf16>, vector<2x4x4x8xbf16>, vector<2x4x1x8xbf16> -> vector<2x4x6x8xbf16>
    %5 = tpu.concatenate %3, %4, %3 in 1 : vector<2x1x6x8xbf16>, vector<2x4x6x8xbf16>, vector<2x1x6x8xbf16> -> vector<2x6x6x8xbf16>
    %6 = vector.extract_strided_slice %5 {offsets = [0, 0, 0, 0], sizes = [2, 4, 4, 8], strides = [1, 1, 1, 1]} : vector<2x6x6x8xbf16> to vector<2x4x4x8xbf16>
    %7 = vector.extract_strided_slice %5 {offsets = [0, 0, 1, 0], sizes = [2, 4, 4, 8], strides = [1, 1, 1, 1]} : vector<2x6x6x8xbf16> to vector<2x4x4x8xbf16>
    %8 = vector.extract_strided_slice %5 {offsets = [0, 0, 2, 0], sizes = [2, 4, 4, 8], strides = [1, 1, 1, 1]} : vector<2x6x6x8xbf16> to vector<2x4x4x8xbf16>
    %9 = vector.extract_strided_slice %5 {offsets = [0, 1, 0, 0], sizes = [2, 4, 4, 8], strides = [1, 1, 1, 1]} : vector<2x6x6x8xbf16> to vector<2x4x4x8xbf16>
    %10 = vector.extract_strided_slice %5 {offsets = [0, 1, 1, 0], sizes = [2, 4, 4, 8], strides = [1, 1, 1, 1]} : vector<2x6x6x8xbf16> to vector<2x4x4x8xbf16>
    %11 = vector.extract_strided_slice %5 {offsets = [0, 1, 2, 0], sizes = [2, 4, 4, 8], strides = [1, 1, 1, 1]} : vector<2x6x6x8xbf16> to vector<2x4x4x8xbf16>
    %12 = vector.extract_strided_slice %5 {offsets = [0, 2, 0, 0], sizes = [2, 4, 4, 8], strides = [1, 1, 1, 1]} : vector<2x6x6x8xbf16> to vector<2x4x4x8xbf16>
    %13 = vector.extract_strided_slice %5 {offsets = [0, 2, 1, 0], sizes = [2, 4, 4, 8], strides = [1, 1, 1, 1]} : vector<2x6x6x8xbf16> to vector<2x4x4x8xbf16>
    %14 = vector.extract_strided_slice %5 {offsets = [0, 2, 2, 0], sizes = [2, 4, 4, 8], strides = [1, 1, 1, 1]} : vector<2x6x6x8xbf16> to vector<2x4x4x8xbf16>
    %15 = tpu.concatenate %6, %7, %8, %9, %10, %11, %12, %13, %14 in 3 : vector<2x4x4x8xbf16>, vector<2x4x4x8xbf16>, vector<2x4x4x8xbf16>, vector<2x4x4x8xbf16>, vector<2x4x4x8xbf16>, vector<2x4x4x8xbf16>, vector<2x4x4x8xbf16>, vector<2x4x4x8xbf16>, vector<2x4x4x8xbf16> -> vector<2x4x4x72xbf16>
    %16 = vector.shape_cast %15 : vector<2x4x4x72xbf16> to vector<32x72xbf16>
    %c0_4 = arith.constant 0 : index
    %c0_5 = arith.constant 0 : index
    %17 = vector.load %arg2[%c0_4, %c0_5] : memref<72x8xbf16, #tpu.memory_space<vmem>>, vector<72x8xbf16>
    %cst_6 = arith.constant dense<0.000000e+00> : vector<32x8xf32>
    %18 = tpu.matmul %16, %17, %cst_6 {dimension_numbers = #tpu.dot_dimension_numbers<[1], [0], [0], [1], [0, 0, 1, 1], [], []>} : vector<32x72xbf16>, vector<72x8xbf16>, vector<32x8xf32> -> vector<32x8xf32>
    %19 = vector.shape_cast %0 : vector<2x4x4x32xbf16> to vector<32x32xbf16>
    %c0_7 = arith.constant 0 : index
    %c0_8 = arith.constant 0 : index
    %20 = vector.load %arg3[%c0_7, %c0_8] : memref<32x64xbf16, #tpu.memory_space<vmem>>, vector<32x64xbf16>
    %cst_9 = arith.constant dense<0.000000e+00> : vector<32x64xf32>
    %21 = tpu.matmul %19, %20, %cst_9 {dimension_numbers = #tpu.dot_dimension_numbers<[1], [0], [0], [1], [0, 0, 1, 1], [], []>} : vector<32x32xbf16>, vector<32x64xbf16>, vector<32x64xf32> -> vector<32x64xf32>
    %22 = vector.shape_cast %1 : vector<2x4x4x8xbf16> to vector<32x8xbf16>
    %23 = arith.extf %22 : vector<32x8xbf16> to vector<32x8xf32>
    %24 = arith.subf %18, %23 : vector<32x8xf32>
    %25 = arith.truncf %24 : vector<32x8xf32> to vector<32x8xbf16>
    %26 = vector.extract_strided_slice %20 {offsets = [0, 0], sizes = [8, 64], strides = [1, 1]} : vector<32x64xbf16> to vector<8x64xbf16>
    %cst_10 = arith.constant dense<0.000000e+00> : vector<32x64xf32>
    %27 = tpu.matmul %25, %26, %cst_10 {dimension_numbers = #tpu.dot_dimension_numbers<[1], [0], [0], [1], [0, 0, 1, 1], [], []>} : vector<32x8xbf16>, vector<8x64xbf16>, vector<32x64xf32> -> vector<32x64xf32>
    %28 = arith.addf %21, %27 : vector<32x64xf32>
    %c0_11 = arith.constant 0 : index
    %c0_12 = arith.constant 0 : index
    %29 = vector.load %arg4[%c0_11, %c0_12] : memref<1x64xf32, #tpu.memory_space<vmem>>, vector<1x64xf32>
    %30 = vector.broadcast %29 : vector<1x64xf32> to vector<32x64xf32>
    %31 = arith.mulf %28, %30 : vector<32x64xf32>
    %c0_13 = arith.constant 0 : index
    %c0_14 = arith.constant 0 : index
    %32 = vector.load %arg5[%c0_13, %c0_14] : memref<1x64xf32, #tpu.memory_space<vmem>>, vector<1x64xf32>
    %33 = vector.broadcast %32 : vector<1x64xf32> to vector<32x64xf32>
    %34 = arith.addf %31, %33 : vector<32x64xf32>
    %cst_15 = arith.constant 0.000000e+00 : f32
    %35 = vector.broadcast %cst_15 : f32 to vector<32x64xf32>
    %36 = arith.maximumf %34, %35 : vector<32x64xf32>
    %37 = arith.extf %19 : vector<32x32xbf16> to vector<32x32xf32>
    %38 = arith.truncf %36 : vector<32x64xf32> to vector<32x64xbf16>
    %c0_16 = arith.constant 0 : index
    %c0_17 = arith.constant 0 : index
    %39 = vector.load %arg6[%c0_16, %c0_17] : memref<64x32xbf16, #tpu.memory_space<vmem>>, vector<64x32xbf16>
    %cst_18 = arith.constant dense<0.000000e+00> : vector<32x32xf32>
    %40 = tpu.matmul %38, %39, %cst_18 {dimension_numbers = #tpu.dot_dimension_numbers<[1], [0], [0], [1], [0, 0, 1, 1], [], []>} : vector<32x64xbf16>, vector<64x32xbf16>, vector<32x32xf32> -> vector<32x32xf32>
    %41 = arith.addf %37, %40 : vector<32x32xf32>
    %42 = vector.shape_cast %41 : vector<32x32xf32> to vector<2x4x4x32xf32>
    %43 = arith.truncf %42 : vector<2x4x4x32xf32> to vector<2x4x4x32xbf16>
    %c0_19 = arith.constant 0 : index
    %c0_20 = arith.constant 0 : index
    %c0_21 = arith.constant 0 : index
    %c0_22 = arith.constant 0 : index
    %44 = vector.load %arg7[%c0_19, %c0_20, %c0_21, %c0_22] : memref<2x4x4x32xbf16, #tpu.memory_space<vmem>>, vector<2x4x4x32xbf16>
    tpu.vector_store %arg7[%c0_19, %c0_20, %c0_21, %c0_22], %43 {strides = array<i32>} : memref<2x4x4x32xbf16, #tpu.memory_space<vmem>>, vector<2x4x4x32xbf16>,
    return
  }
  func.func @transform_0(%arg0: i32) -> (i32, i32, i32, i32) {
    %c0_i32 = arith.constant 0 : i32
    %c0_i32_0 = arith.constant 0 : i32
    %c0_i32_1 = arith.constant 0 : i32
    %c0_i32_2 = arith.constant 0 : i32
    return %arg0, %c0_i32, %c0_i32_0, %c0_i32_1 : i32, i32, i32, i32
  }
  func.func @transform_1(%arg0: i32) -> (i32, i32) {
    %c0_i32 = arith.constant 0 : i32
    %c0_i32_0 = arith.constant 0 : i32
    %c0_i32_1 = arith.constant 0 : i32
    return %c0_i32, %c0_i32_0 : i32, i32
  }
  func.func @transform_2(%arg0: i32) -> (i32, i32) {
    %c0_i32 = arith.constant 0 : i32
    %c0_i32_0 = arith.constant 0 : i32
    %c0_i32_1 = arith.constant 0 : i32
    return %c0_i32, %c0_i32_0 : i32, i32
  }
  func.func @transform_3(%arg0: i32) -> (i32, i32) {
    %c0_i32 = arith.constant 0 : i32
    %c0_i32_0 = arith.constant 0 : i32
    %c0_i32_1 = arith.constant 0 : i32
    return %c0_i32, %c0_i32_0 : i32, i32
  }
  func.func @transform_4(%arg0: i32) -> (i32, i32) {
    %c0_i32 = arith.constant 0 : i32
    %c0_i32_0 = arith.constant 0 : i32
    %c0_i32_1 = arith.constant 0 : i32
    return %c0_i32, %c0_i32_0 : i32, i32
  }
  func.func @transform_5(%arg0: i32) -> (i32, i32) {
    %c0_i32 = arith.constant 0 : i32
    %c0_i32_0 = arith.constant 0 : i32
    %c0_i32_1 = arith.constant 0 : i32
    return %c0_i32, %c0_i32_0 : i32, i32
  }
  func.func @transform_6(%arg0: i32) -> (i32, i32, i32, i32) {
    %c0_i32 = arith.constant 0 : i32
    %c0_i32_0 = arith.constant 0 : i32
    %c0_i32_1 = arith.constant 0 : i32
    %c0_i32_2 = arith.constant 0 : i32
    return %arg0, %c0_i32, %c0_i32_0, %c0_i32_1 : i32, i32, i32, i32
  }
}

module attributes {stable_mosaic.version = 11 : i64} {
  func.func @_head_kernel(%arg0: i32, %arg1: memref<2x16x32xbf16, #tpu.memory_space<vmem>>, %arg2: memref<32x1280xbf16, #tpu.memory_space<vmem>>, %arg3: memref<1280x8xbf16, #tpu.memory_space<vmem>>, %arg4: memref<1x8xf32, #tpu.memory_space<vmem>>, %arg5: memref<2x8xf32, #tpu.memory_space<vmem>>, %arg6: memref<2x32xf32, #tpu.memory_space<vmem>>) attributes {dimension_semantics = [#tpu.dimension_semantics<arbitrary>], iteration_bounds = array<i64: 1>, scalar_prefetch = 0 : i64, scratch_operands = 1 : i64, tpu.core_type = #tpu.core_type<tc>, window_params = [{transform_indices = @transform_0, window_bounds = array<i64: 2, 16, 32>}, {pipeline_mode = #tpu.pipeline_mode<synchronous>, transform_indices = @transform_1, window_bounds = array<i64: 32, 1280>}, {pipeline_mode = #tpu.pipeline_mode<synchronous>, transform_indices = @transform_2, window_bounds = array<i64: 1280, 8>}, {pipeline_mode = #tpu.pipeline_mode<synchronous>, transform_indices = @transform_3, window_bounds = array<i64: 1, 8>}, {pipeline_mode = #tpu.pipeline_mode<synchronous>, transform_indices = @transform_4, window_bounds = array<i64: 2, 8>}]} {
    %c0_i32 = arith.constant 0 : i32
    %0 = arith.cmpi eq, %arg0, %c0_i32 : i32
    %1 = arith.extui %0 : i1 to i32
    %c0_i32_0 = arith.constant 0 : i32
    %2 = arith.cmpi ne, %1, %c0_i32_0 : i32
    scf.if %2 {
      %cst_9 = arith.constant 0.000000e+00 : f32
      %12 = vector.broadcast %cst_9 : f32 to vector<2x32xf32>
      %c0_10 = arith.constant 0 : index
      %c0_11 = arith.constant 0 : index
      %13 = vector.load %arg6[%c0_10, %c0_11] : memref<2x32xf32, #tpu.memory_space<vmem>>, vector<2x32xf32>
      tpu.vector_store %arg6[%c0_10, %c0_11], %12 {strides = array<i32>} : memref<2x32xf32, #tpu.memory_space<vmem>>, vector<2x32xf32>,
    } else {
    }
    %c0 = arith.constant 0 : index
    %c0_1 = arith.constant 0 : index
    %3 = vector.load %arg6[%c0, %c0_1] : memref<2x32xf32, #tpu.memory_space<vmem>>, vector<2x32xf32>
    %c0_2 = arith.constant 0 : index
    %c0_3 = arith.constant 0 : index
    %c0_4 = arith.constant 0 : index
    %4 = vector.load %arg1[%c0_2, %c0_3, %c0_4] : memref<2x16x32xbf16, #tpu.memory_space<vmem>>, vector<2x16x32xbf16>
    %5 = arith.extf %4 : vector<2x16x32xbf16> to vector<2x16x32xf32>
    %cst = arith.constant dense<0.000000e+00> : vector<2x32xf32>
    %6 = vector.multi_reduction <add>, %5, %cst [1] : vector<2x16x32xf32> to vector<2x32xf32>
    %7 = arith.addf %3, %6 : vector<2x32xf32>
    %c0_5 = arith.constant 0 : index
    %c0_6 = arith.constant 0 : index
    %8 = vector.load %arg6[%c0_5, %c0_6] : memref<2x32xf32, #tpu.memory_space<vmem>>, vector<2x32xf32>
    tpu.vector_store %arg6[%c0_5, %c0_6], %7 {strides = array<i32>} : memref<2x32xf32, #tpu.memory_space<vmem>>, vector<2x32xf32>,
    %c0_i32_7 = arith.constant 0 : i32
    %9 = arith.cmpi eq, %arg0, %c0_i32_7 : i32
    %10 = arith.extui %9 : i1 to i32
    %c0_i32_8 = arith.constant 0 : i32
    %11 = arith.cmpi ne, %10, %c0_i32_8 : i32
    scf.if %11 {
      %c0_9 = arith.constant 0 : index
      %c0_10 = arith.constant 0 : index
      %12 = vector.load %arg6[%c0_9, %c0_10] : memref<2x32xf32, #tpu.memory_space<vmem>>, vector<2x32xf32>
      %cst_11 = arith.constant 6.250000e-02 : f32
      %13 = vector.broadcast %cst_11 : f32 to vector<2x32xf32>
      %14 = arith.mulf %12, %13 : vector<2x32xf32>
      %15 = arith.truncf %14 : vector<2x32xf32> to vector<2x32xbf16>
      %c0_12 = arith.constant 0 : index
      %c0_13 = arith.constant 0 : index
      %16 = vector.load %arg2[%c0_12, %c0_13] : memref<32x1280xbf16, #tpu.memory_space<vmem>>, vector<32x1280xbf16>
      %cst_14 = arith.constant dense<0.000000e+00> : vector<2x1280xf32>
      %17 = tpu.matmul %15, %16, %cst_14 {dimension_numbers = #tpu.dot_dimension_numbers<[1], [0], [0], [1], [0, 0, 1, 1], [], []>} : vector<2x32xbf16>, vector<32x1280xbf16>, vector<2x1280xf32> -> vector<2x1280xf32>
      %cst_15 = arith.constant 0.000000e+00 : f32
      %18 = vector.broadcast %cst_15 : f32 to vector<2x1280xf32>
      %19 = arith.maximumf %17, %18 : vector<2x1280xf32>
      %20 = arith.truncf %19 : vector<2x1280xf32> to vector<2x1280xbf16>
      %c0_16 = arith.constant 0 : index
      %c0_17 = arith.constant 0 : index
      %21 = vector.load %arg3[%c0_16, %c0_17] : memref<1280x8xbf16, #tpu.memory_space<vmem>>, vector<1280x8xbf16>
      %cst_18 = arith.constant dense<0.000000e+00> : vector<2x8xf32>
      %22 = tpu.matmul %20, %21, %cst_18 {dimension_numbers = #tpu.dot_dimension_numbers<[1], [0], [0], [1], [0, 0, 1, 1], [], []>} : vector<2x1280xbf16>, vector<1280x8xbf16>, vector<2x8xf32> -> vector<2x8xf32>
      %c0_19 = arith.constant 0 : index
      %c0_20 = arith.constant 0 : index
      %23 = vector.load %arg4[%c0_19, %c0_20] : memref<1x8xf32, #tpu.memory_space<vmem>>, vector<1x8xf32>
      %24 = vector.broadcast %23 : vector<1x8xf32> to vector<2x8xf32>
      %25 = arith.addf %22, %24 : vector<2x8xf32>
      %c0_21 = arith.constant 0 : index
      %c0_22 = arith.constant 0 : index
      %26 = vector.load %arg5[%c0_21, %c0_22] : memref<2x8xf32, #tpu.memory_space<vmem>>, vector<2x8xf32>
      tpu.vector_store %arg5[%c0_21, %c0_22], %25 {strides = array<i32>} : memref<2x8xf32, #tpu.memory_space<vmem>>, vector<2x8xf32>,
    } else {
    }
    return
  }
  func.func @transform_0(%arg0: i32) -> (i32, i32, i32) {
    %c0_i32 = arith.constant 0 : i32
    %c0_i32_0 = arith.constant 0 : i32
    %c0_i32_1 = arith.constant 0 : i32
    return %c0_i32, %arg0, %c0_i32_0 : i32, i32, i32
  }
  func.func @transform_1(%arg0: i32) -> (i32, i32) {
    %c0_i32 = arith.constant 0 : i32
    %c0_i32_0 = arith.constant 0 : i32
    %c0_i32_1 = arith.constant 0 : i32
    return %c0_i32, %c0_i32_0 : i32, i32
  }
  func.func @transform_2(%arg0: i32) -> (i32, i32) {
    %c0_i32 = arith.constant 0 : i32
    %c0_i32_0 = arith.constant 0 : i32
    %c0_i32_1 = arith.constant 0 : i32
    return %c0_i32, %c0_i32_0 : i32, i32
  }
  func.func @transform_3(%arg0: i32) -> (i32, i32) {
    %c0_i32 = arith.constant 0 : i32
    %c0_i32_0 = arith.constant 0 : i32
    %c0_i32_1 = arith.constant 0 : i32
    return %c0_i32, %c0_i32_0 : i32, i32
  }
  func.func @transform_4(%arg0: i32) -> (i32, i32) {
    %c0_i32 = arith.constant 0 : i32
    %c0_i32_0 = arith.constant 0 : i32
    %c0_i32_1 = arith.constant 0 : i32
    return %c0_i32, %c0_i32_0 : i32, i32
  }
}

</mosaic_0001>

<bundles_post_ra>
// kernel: fasternet_forward.5
= control target key start
LH: loop header
LB: loop body
LE: loop exit
PB: predicated region body
PF: predicated region fallthrough
CT: control target
= control target key end

     0   :  { %vm98_vm0 = vcmask 392192   ;;  %vm346_vm1 = vcmask 125952   ;;  %s642_s1 = inlined_call_operand.vmem [shape: bf16[48,16], index: 1, kind: input, shape index: {}]   ;;  %s643_s0 = inlined_call_operand.vmem [shape: bf16[128,48], index: 0, kind: input, shape index: {}]   ;;  %s644_s2 = inlined_call_operand.vmem [shape: f32[1,16], index: 2, kind: input, shape index: {}]   ;;  %s645_s3 = inlined_call_operand.vmem [shape: f32[1,16], index: 3, kind: input, shape index: {}]   ;;  %s646_s4 = inlined_call_operand.vmem [shape: bf16[128,16], index: 4, kind: output, shape index: {}]  }
   0x1   :  { %v459_v0 = vld [vmem:[%s642_s1] sm:$0xff]   ;;  %v460_v1 = vld [vmem:[%s642_s1 + $0x8] sm:$0xff]   ;;  %v461_v2 = vld [vmem:[%s642_s1 + $0x10] sm:$0xff]  }
   0x2   :  { %431 = vmatprep.subr.bf16.mxu0 %v459_v0  ;;  %453 = vmatprep.subr.bf16.mxu1 %v459_v0  ;;  %v462_v3 = vld [vmem:[%s643_s0] sm:$0xff]   ;;  %v464_v5 = vld [vmem:[%s643_s0 + $0x8] sm:$0xff]   ;;  %v466_v7 = vld [vmem:[%s643_s0 + $0x10] sm:$0xff]  }
   0x3   :  { %432 = vmatpush3.bf16.msra.mxu0 %v459_v0  ;;  %456 = vmatpush3.bf16.msra.mxu1 %v459_v0  ;;  %v463_v4 = vld [vmem:[%s643_s0 + $0x20] sm:$0xff]   ;;  %v465_v6 = vld [vmem:[%s643_s0 + $0x28] sm:$0xff]   ;;  %v467_v8 = vld [vmem:[%s643_s0 + $0x30] sm:$0xff]  }
   0x4   :  { %433 = vmatprep.subr.bf16.mxu0 %v460_v1  ;;  %454 = vmatprep.subr.bf16.mxu1 %v460_v1  ;;  %v468_v9 = vld [vmem:[%s643_s0 + $0x18] sm:$0xff]   ;;  %v539_v11 = vld [vmem:[%s644_s2] ss:$0 sm:$0xff] }
   0x5   :  { %437 = vmatprep.mubr.msk.bf16.mxu0 %vm98_vm0, %v462_v3  ;;  %445 = vmatprep.mubr.msk.bf16.mxu1 %vm98_vm0, %v463_v4  ;;  %v469_v10 = vld [vmem:[%s643_s0 + $0x38] sm:$0xff]   ;;  %v544_v13 = vld [vmem:[%s645_s3] ss:$0 sm:$0xff] }
   0x7   :  { %434 = vmatpush3.bf16.msra.mxu0 %v460_v1  ;;  %457 = vmatpush3.bf16.msra.mxu1 %v460_v1 }
   0x8   :  { %435 = vmatprep.subr.bf16.mxu0 %v461_v2  ;;  %455 = vmatprep.subr.bf16.mxu1 %v461_v2 }
   0xb   :  { %436 = vmatpush3.bf16.msra.mxu0 %v461_v2  ;;  %458 = vmatpush3.bf16.msra.mxu1 %v461_v2 }
   0xe   :  { %438 = vmatmul.mubr.msk.bf16.vlgmr.msra.gmra.mrb[0].mxu0 %vm98_vm0, %v464_v5  ;;  %446 = vmatmul.mubr.msk.bf16.vlgmr.msra.gmra.mrb[0].mxu1 %vm98_vm0, %v465_v6 }
   0xf   :  { %441 = vmatprep.mubr.msk.bf16.mxu0 %vm98_vm0, %v466_v7  ;;  %449 = vmatprep.mubr.msk.bf16.mxu1 %vm98_vm0, %v467_v8 }
  0x16   :  { %442 = vmatmul.mubr.msk.bf16.gmra.mrb[4].mxu0 %vm98_vm0, %v468_v9  ;;  %450 = vmatmul.mubr.msk.bf16.gmra.mrb[4].mxu1 %vm98_vm0, %v469_v10 }
  0xe1   :  { %v439_v12 = vpop.f32.mrb[0].mxu0  ;;  %v447_v14 = vpop.f32.mrb[0].mxu1 }
  0xe2   :  { %v229_v15 = vmul.f32 %v439_v12, %v539_v11  ;;  %v237_v16 = vmul.f32 %v447_v14, %v539_v11  ;;  %v157_v17 = vpop.f32.mrb[1].mxu0  ;;  %v189_v18 = vpop.f32.mrb[1].mxu1 }
  0xe3   :  { %v227_v19 = vmul.f32 %v539_v11, %v157_v17  ;;  %v235_v20 = vmul.f32 %v539_v11, %v189_v18  ;;  %v440_v21 = vpop.f32.mrb[2].mxu0  ;;  %v448_v22 = vpop.f32.mrb[2].mxu1 }
  0xe4   :  { %v252_v23 = vadd.f32 %v544_v13, %v229_v15  ;;  %v260_v24 = vadd.f32 %v544_v13, %v237_v16  ;;  %v230_v25 = vmul.f32 %v440_v21, %v539_v11  ;;  %v238_v26 = vmul.f32 %v448_v22, %v539_v11  ;;  %v160_v27 = vpop.f32.mrb[3].mxu0  ;;  %v192_v28 = vpop.f32.mrb[3].mxu1 }
  0xe5   :  { %v250_v29 = vadd.f32 %v544_v13, %v227_v19  ;;  %v258_v30 = vadd.f32 %v544_v13, %v235_v20  ;;  %v228_v31 = vmul.f32 %v539_v11, %v160_v27  ;;  %v236_v32 = vmul.f32 %v539_v11, %v192_v28 }
  0xe6   :  { %v268_v33 = vmax.f32 %v252_v23, 0.0  ;;  %v276_v34 = vmax.f32 %v260_v24, 0.0  ;;  %v253_v35 = vadd.f32 %v544_v13, %v230_v25  ;;  %v261_v36 = vadd.f32 %v544_v13, %v238_v26 }
  0xe7   :  { %v266_v37 = vmax.f32 %v250_v29, 0.0  ;;  %v274_v38 = vmax.f32 %v258_v30, 0.0  ;;  %v251_v39 = vadd.f32 %v544_v13, %v228_v31  ;;  %v259_v40 = vadd.f32 %v544_v13, %v236_v32 }
  0xe8   :  { %v406_v41 = vpack.c.bf16 %v268_v33, %v268_v33  ;;  %v414_v42 = vpack.c.bf16 %v276_v34, %v276_v34  ;;  %v269_v43 = vmax.f32 %v253_v35, 0.0  ;;  %v277_v44 = vmax.f32 %v261_v36, 0.0 }
  0xe9   :  { %v404_v45 = vpack.c.bf16 %v266_v37, %v266_v37  ;;  %v412_v46 = vpack.c.bf16 %v274_v38, %v274_v38  ;;  %v267_v47 = vmax.f32 %v251_v39, 0.0  ;;  %v275_v48 = vmax.f32 %v259_v40, 0.0  ;;  %v443_v49 = vpop.f32.mrb[4].mxu0  ;;  %v451_v50 = vpop.f32.mrb[4].mxu1 }
  0xea   :  { %349 = vst.msk [vmem:[%s646_s4 + $0x8] sm:$0xf] %vm346_vm1, %v406_v41  ;;  %357 = vst.msk [vmem:[%s646_s4 + $0x28] sm:$0xf] %vm346_vm1, %v414_v42  ;;  %v407_v51 = vpack.c.bf16 %v269_v43, %v269_v43  ;;  %v415_v52 = vpack.c.bf16 %v277_v44, %v277_v44  ;;  %v233_v53 = vmul.f32 %v443_v49, %v539_v11  ;;  %v173_v55 = vpop.f32.mrb[5].mxu0  ;;  %v205_v56 = vpop.f32.mrb[5].mxu1 }
  0xeb   :  { %v241_v54 = vmul.f32 %v451_v50, %v539_v11  ;;  %347 = vst.msk [vmem:[%s646_s4] sm:$0xf] %vm346_vm1, %v404_v45  ;;  %355 = vst.msk [vmem:[%s646_s4 + $0x20] sm:$0xf] %vm346_vm1, %v412_v46  ;;  %v405_v57 = vpack.c.bf16 %v267_v47, %v267_v47  ;;  %v413_v58 = vpack.c.bf16 %v275_v48, %v275_v48  ;;  %v444_v61 = vpop.f32.mrb[6].mxu0  ;;  %v452_v62 = vpop.f32.mrb[6].mxu1 }
  0xec   :  { %v231_v59 = vmul.f32 %v539_v11, %v173_v55  ;;  %v239_v60 = vmul.f32 %v539_v11, %v205_v56  ;;  %350 = vst.msk [vmem:[%s646_s4 + $0xc] sm:$0xf] %vm346_vm1, %v407_v51  ;;  %358 = vst.msk [vmem:[%s646_s4 + $0x2c] sm:$0xf] %vm346_vm1, %v415_v52  ;;  %v256_v63 = vadd.f32 %v544_v13, %v233_v53  ;;  %v176_v3 = vpop.f32.mrb[7].mxu0  ;;  %v208_v4 = vpop.f32.mrb[7].mxu1 }
  0xed   :  { %v264_v0 = vadd.f32 %v544_v13, %v241_v54  ;;  %v234_v1 = vmul.f32 %v444_v61, %v539_v11  ;;  %v242_v2 = vmul.f32 %v452_v62, %v539_v11  ;;  %348 = vst.msk [vmem:[%s646_s4 + $0x4] sm:$0xf] %vm346_vm1, %v405_v57  ;;  %356 = vst.msk [vmem:[%s646_s4 + $0x24] sm:$0xf] %vm346_vm1, %v413_v58 }
  0xee   :  { %v254_v5 = vadd.f32 %v544_v13, %v231_v59  ;;  %v262_v6 = vadd.f32 %v544_v13, %v239_v60  ;;  %v232_v7 = vmul.f32 %v539_v11, %v176_v3  ;;  %v240_v8 = vmul.f32 %v539_v11, %v208_v4 }
  0xef   :  { %v272_v9 = vmax.f32 %v256_v63, 0.0  ;;  %v280_v10 = vmax.f32 %v264_v0, 0.0  ;;  %v257_v12 = vadd.f32 %v544_v13, %v234_v1  ;;  %v265_v14 = vadd.f32 %v544_v13, %v242_v2 }
  0xf0   :  { %v270_v15 = vmax.f32 %v254_v5, 0.0  ;;  %v278_v16 = vmax.f32 %v262_v6, 0.0  ;;  %v255_v17 = vadd.f32 %v544_v13, %v232_v7  ;;  %v263_v18 = vadd.f32 %v544_v13, %v240_v8 }
  0xf1   :  { %v410_v19 = vpack.c.bf16 %v272_v9, %v272_v9  ;;  %v418_v20 = vpack.c.bf16 %v280_v10, %v280_v10  ;;  %v273_v21 = vmax.f32 %v257_v12, 0.0  ;;  %v281_v22 = vmax.f32 %v265_v14, 0.0 }
  0xf2   :  { %v408_v23 = vpack.c.bf16 %v270_v15, %v270_v15  ;;  %v416_v24 = vpack.c.bf16 %v278_v16, %v278_v16  ;;  %v271_v25 = vmax.f32 %v255_v17, 0.0  ;;  %v279_v11 = vmax.f32 %v263_v18, 0.0 }
  0xf3   :  { %353 = vst.msk [vmem:[%s646_s4 + $0x18] sm:$0xf] %vm346_vm1, %v410_v19  ;;  %361 = vst.msk [vmem:[%s646_s4 + $0x38] sm:$0xf] %vm346_vm1, %v418_v20  ;;  %v411_v26 = vpack.c.bf16 %v273_v21, %v273_v21  ;;  %v419_v13 = vpack.c.bf16 %v281_v22, %v281_v22 }
  0xf4   :  { %351 = vst.msk [vmem:[%s646_s4 + $0x10] sm:$0xf] %vm346_vm1, %v408_v23  ;;  %359 = vst.msk [vmem:[%s646_s4 + $0x30] sm:$0xf] %vm346_vm1, %v416_v24  ;;  %v409_v27 = vpack.c.bf16 %v271_v25, %v271_v25  ;;  %v417_v28 = vpack.c.bf16 %v279_v11, %v279_v11 }
  0xf5   :  { %354 = vst.msk [vmem:[%s646_s4 + $0x1c] sm:$0xf] %vm346_vm1, %v411_v26  ;;  %362 = vst.msk [vmem:[%s646_s4 + $0x3c] sm:$0xf] %vm346_vm1, %v419_v13 }
  0xf6   :  { %352 = vst.msk [vmem:[%s646_s4 + $0x14] sm:$0xf] %vm346_vm1, %v409_v27  ;;  %360 = vst.msk [vmem:[%s646_s4 + $0x34] sm:$0xf] %vm346_vm1, %v417_v28 }

// kernel: fasternet_forward.7
= control target key start
LH: loop header
LB: loop body
LE: loop exit
PB: predicated region body
PF: predicated region fallthrough
CT: control target
= control target key end

     0   :  { %vm64_vm0 = vcmask 523264   ;;  %vm162_vm1 = vcmask 257024   ;;  %s274_s1 = inlined_call_operand.vmem [shape: bf16[64,32], index: 1, kind: input, shape index: {}]   ;;  %s275_s0 = inlined_call_operand.vmem [shape: bf16[32,64], index: 0, kind: input, shape index: {}]   ;;  %s276_s2 = inlined_call_operand.vmem [shape: f32[1,32], index: 2, kind: input, shape index: {}]   ;;  %s277_s3 = inlined_call_operand.vmem [shape: f32[1,32], index: 3, kind: input, shape index: {}]   ;;  %s278_s4 = inlined_call_operand.vmem [shape: bf16[32,32], index: 4, kind: output, shape index: {}]  }
   0x1   :  { %v207_v0 = vld [vmem:[%s274_s1] sm:$0xff]   ;;  %v208_v1 = vld [vmem:[%s274_s1 + $0x8] sm:$0xff]   ;;  %v209_v2 = vld [vmem:[%s274_s1 + $0x10] sm:$0xff]  }
   0x2   :  { %195 = vmatprep.subr.bf16.mxu0 %v207_v0  ;;  %v211_v3 = vld [vmem:[%s275_s0] sm:$0xff]   ;;  %v210_v4 = vld [vmem:[%s274_s1 + $0x18] sm:$0xff]   ;;  %v212_v5 = vld [vmem:[%s275_s0 + $0x8] sm:$0xff]  }
   0x3   :  { %196 = vmatpush3.bf16.msra.mxu0 %v207_v0  ;;  %203 = vmatprep.mubr.msk.bf16.mxu0 %vm64_vm0, %v211_v3  ;;  %v179_v6 = vld [vmem:[%s276_s2] ss:$0 sm:$0xff] }
   0x4   :  { %197 = vmatprep.subr.bf16.mxu0 %v208_v1  ;;  %v180_v8 = vld [vmem:[%s277_s3] ss:$0 sm:$0xff] }
   0x7   :  { %198 = vmatpush3.bf16.msra.mxu0 %v208_v1 }
   0x8   :  { %199 = vmatprep.subr.bf16.mxu0 %v209_v2 }
   0xb   :  { %200 = vmatpush3.bf16.msra.mxu0 %v209_v2 }
   0xc   :  { %201 = vmatprep.subr.bf16.mxu0 %v210_v4 }
   0xf   :  { %202 = vmatpush3.bf16.msra.mxu0 %v210_v4 }
  0x12   :  { %204 = vmatmul.mubr.msk.bf16.vlgmr.msra.gmra.mrb[0].mxu0 %vm64_vm0, %v212_v5 }
  0xe5   :  { %v205_v7 = vpop.f32.mrb[0].mxu0 }
  0xe6   :  { %v129_v9 = vmul.f32 %v205_v7, %v179_v6  ;;  %v105_v10 = vpop.f32.mrb[1].mxu0 }
  0xe7   :  { %v127_v11 = vmul.f32 %v179_v6, %v105_v10  ;;  %v206_v12 = vpop.f32.mrb[2].mxu0 }
  0xe8   :  { %v140_v13 = vadd.f32 %v180_v8, %v129_v9  ;;  %v130_v14 = vmul.f32 %v206_v12, %v179_v6  ;;  %v108_v15 = vpop.f32.mrb[3].mxu0 }
  0xe9   :  { %v138_v16 = vadd.f32 %v180_v8, %v127_v11  ;;  %v128_v17 = vmul.f32 %v179_v6, %v108_v15 }
  0xea   :  { %v144_v18 = vmax.f32 %v140_v13, 0.0  ;;  %v141_v19 = vadd.f32 %v180_v8, %v130_v14 }
  0xeb   :  { %v142_v20 = vmax.f32 %v138_v16, 0.0  ;;  %v139_v21 = vadd.f32 %v180_v8, %v128_v17 }
  0xec   :  { %v187_v22 = vpack.c.bf16 %v144_v18, %v144_v18  ;;  %v145_v23 = vmax.f32 %v141_v19, 0.0 }
  0xed   :  { %v185_v24 = vpack.c.bf16 %v142_v20, %v142_v20  ;;  %v143_v25 = vmax.f32 %v139_v21, 0.0 }
  0xee   :  { %165 = vst.msk [vmem:[%s278_s4 + $0x8] sm:$0xf] %vm162_vm1, %v187_v22  ;;  %v188_v26 = vpack.c.bf16 %v145_v23, %v145_v23 }
  0xef   :  { %163 = vst.msk [vmem:[%s278_s4] sm:$0xf] %vm162_vm1, %v185_v24  ;;  %v186_v27 = vpack.c.bf16 %v143_v25, %v143_v25 }
  0xf0   :  { %166 = vst.msk [vmem:[%s278_s4 + $0xc] sm:$0xf] %vm162_vm1, %v188_v26 }
  0xf1   :  { %164 = vst.msk [vmem:[%s278_s4 + $0x4] sm:$0xf] %vm162_vm1, %v186_v27 }

// kernel: fasternet_forward.6
= control target key start
LH: loop header
LB: loop body
LE: loop exit
PB: predicated region body
PF: predicated region fallthrough
CT: control target
= control target key end

     0   :  { %v1914_v0 = vmov 0   ;;  %vm216_vm0 = vcmask 1040384   ;;  %s1915_s27 = smov 4   ;;  %vm217_vm1 = vsmask.f32 256  ;;  %vm235_vm2 = vcmask 1044480   ;;  %s2991_s0 = inlined_call_operand.vmem [shape: bf16[2,8,8,16], index: 0, kind: input, shape index: {}]   ;;  %s2992_s1 = inlined_call_operand.vmem [shape: bf16[36,4], index: 1, kind: input, shape index: {}]   ;;  %s2993_s2 = inlined_call_operand.vmem [shape: bf16[16,32], index: 2, kind: input, shape index: {}]   ;;  %s2994_s5 = inlined_call_operand.vmem [shape: bf16[32,16], index: 5, kind: input, shape index: {}]   ;;  %s2995_s3 = inlined_call_operand.vmem [shape: f32[1,32], index: 3, kind: input, shape index: {}]   ;;  %s2996_s4 = inlined_call_operand.vmem [shape: f32[1,32], index: 4, kind: input, shape index: {}]   ;;  %s2997_s6 = inlined_call_operand.vmem [shape: bf16[2,8,8,16], index: 6, kind: output, shape index: {}]  }
   0x1   :  { %v1959_v1 = vrot.slane %v1914_v0, 1  ;;  %v25_v2 = vld [vmem:[%s2991_s0 + $0x4] sm:$0xf]  ;;  %v24_v4 = vld [vmem:[%s2991_s0] sm:$0xf]  ;;  %s1916_s30 = smov 8   ;;  %vm1979_vm4 = vmand %vm216_vm0, %vm217_vm1 }
   0x2   :  { %v1658_v3 = vcombine.low %v25_v2, %v25_v2  ;;  %v26_v5 = vld [vmem:[%s2991_s0 + $0x8] sm:$0xf]  ;;  %v1657_v6 = vcombine.low %v24_v4, %v24_v4  ;;  %vm236_vm3 = vsmask.f32 4352  ;;  %v27_v10 = vld [vmem:[%s2991_s0 + $0xc] sm:$0xf] }
   0x3   :  { %359 = vrot.lane.b32.xlu0 %v1959_v1, %s1915_s27  ;;  %v1659_v7 = vcombine.low %v26_v5, %v26_v5  ;;  %v1660_v19 = vcombine.low %v27_v10, %v27_v10  ;;  %vm1984_vm5 = vmand %vm235_vm2, %vm236_vm3  ;;  %s1917_s7 = smov 12   ;;  %s1918_s8 = smov 16   ;;  %v28_v52 = vld [vmem:[%s2991_s0 + $0x10] sm:$0xf]  ;;  %v29_v58 = vld [vmem:[%s2991_s0 + $0x14] sm:$0xf] }
   0x4   :  { %v96_v8 = vshrl.u32 %v1658_v3, 16  ;;  %v99_v9 = vshll.u32 %v1658_v3, 16  ;;  %v89_v11 = vshrl.u32 %v1657_v6, 16  ;;  %v92_v12 = vshll.u32 %v1657_v6, 16  ;;  %s1919_s13 = smov 20   ;;  %s1920_s16 = smov 24  }
   0x5   :  { %v103_v13 = vshrl.u32 %v1659_v7, 16  ;;  %v106_v14 = vshll.u32 %v1659_v7, 16  ;;  %v110_v28 = vshrl.u32 %v1660_v19, 16  ;;  %v113_v38 = vshll.u32 %v1660_v19, 16  ;;  %v30_v62 = vld [vmem:[%s2991_s0 + $0x18] sm:$0xf] }
   0x6   :  { %v98_v15 = vrot.slane %v96_v8, 7  ;;  %v91_v17 = vrot.slane %v89_v11, 7  ;;  %v1661_v55 = vcombine.low %v28_v52, %v28_v52  ;;  %v1662_v59 = vcombine.low %v29_v58, %v29_v58  ;;  %s1921_s17 = smov 28   ;;  %v1887_v19 = vld [vmem:[%s2992_s1 + $0x8] sm:$0xff]   ;;  %s1922_s22 = smov 32  }
   0x7   :  { %419 = vrot.lane.b32.xlu0 %v1959_v1, %s1916_s30  ;;  %v105_v18 = vrot.slane %v103_v13, 7  ;;  %v112_v37 = vrot.slane %v110_v28, 7  ;;  %v1663_v4 = vcombine.low %v30_v62, %v30_v62  ;;  %vm995_vm6 = vcmask 1041408   ;;  %v32_v52 = vld [vmem:[%s2991_s0 + $0x20] sm:$0xf] }
   0x8   :  { %v101_v20 = vor.u32 %v99_v9, %v98_v15  ;;  %v94_v22 = vor.u32 %v92_v12, %v91_v17  ;;  %v117_v57 = vshrl.u32 %v1661_v55, 16  ;;  %v120_v61 = vshll.u32 %v1661_v55, 16  ;;  %v2162_v58 = vld [vmem:[%s2991_s0 + $0x28] sm:$0xf]  ;;  %v2170_v62 = vld [vmem:[%s2991_s0 + $0x24] sm:$0xf] }
   0x9   :  { %v108_v23 = vor.u32 %v106_v14, %v105_v18  ;;  %v115_v47 = vor.u32 %v113_v38, %v112_v37  ;;  %v124_v63 = vshrl.u32 %v1662_v59, 16  ;;  %v127_v6 = vshll.u32 %v1662_v59, 16  ;;  %v1886_v14 = vld [vmem:[%s2992_s1] sm:$0xff]  }
   0xa   :  { %v220_v24 = vsel %vm1979_vm4, 0, %v101_v20  ;;  %v219_v26 = vsel %vm1979_vm4, 0, %v94_v22  ;;  %v119_v60 = vrot.slane %v117_v57, 7  ;;  %v131_v8 = vshrl.u32 %v1663_v4, 16  ;;  %1768 = vmatprep.subr.bf16.mxu0 %v1886_v14 }
   0xb   :  { %v1992_v25 = vsel %vm1984_vm5, %v220_v24, 0  ;;  %v221_v27 = vsel %vm1979_vm4, 0, %v108_v23  ;;  %v2002_v29 = vsel %vm1984_vm5, %v219_v26, 0  ;;  %v222_v49 = vsel %vm1979_vm4, 0, %v115_v47  ;;  %1769 = vmatpush3.bf16.msra.mxu0 %v1886_v14 }
   0xc   :  { %453 = vrot.lane.b32.xlu1 %v1992_v25, %s1917_s7  ;;  %v2005_v30 = vrot.slane %v1992_v25, 1  ;;  %451 = vrot.lane.b32.xlu0 %v2002_v29, %s1917_s7  ;;  %v405_v31 = vrot.slane %v2002_v29, 1  ;;  %v2012_v32 = vsel %vm1984_vm5, %v221_v27, 0  ;;  %v262_v33 = vshrl.u32 %v2002_v29, 16 }
   0xd   :  { %v264_v34 = vshll.u32 %v2002_v29, 16  ;;  %v271_v35 = vshll.u32 %v1992_v25, 16  ;;  %v2019_v39 = vrot.slane %v2012_v32, 1  ;;  %v269_v40 = vshrl.u32 %v1992_v25, 16  ;;  %1770 = vmatprep.subr.bf16.mxu0 %v1887_v19 }
   0xe   :  { %v278_v42 = vshll.u32 %v2012_v32, 16  ;;  %v276_v45 = vshrl.u32 %v2012_v32, 16  ;;  %v2036_v50 = vsel %vm1984_vm5, %v222_v49, 0  ;;  %v122_v3 = vor.u32 %v120_v61, %v119_v60  ;;  %v1888_v26 = vld [vmem:[%s2992_s1 + $0x10] ss:$0 sps:$4 sm:$0x33]  }
   0xf   :  { %v266_v36 = vrot.slane %v264_v34, 1  ;;  %v273_v41 = vrot.slane %v271_v35, 1  ;;  %v285_v51 = vshll.u32 %v2036_v50, 16  ;;  %v283_v53 = vshrl.u32 %v2036_v50, 16  ;;  %1771 = vmatpush3.bf16.msra.mxu0 %v1887_v19 }
  0x10   :  { %421 = vrot.lane.b32.xlu1 %v405_v31, %s1916_s30  ;;  %423 = vrot.lane.b32.xlu0 %v2005_v30, %s1916_s30  ;;  %v280_v46 = vrot.slane %v278_v42, 1  ;;  %v408_v2 = vrot.slane %v2036_v50, 1  ;;  %v126_v5 = vrot.slane %v124_v63, 7  ;;  %v223_v7 = vsel %vm1979_vm4, 0, %v122_v3 }
  0x11   :  { %v267_v43 = vor.u32 %v266_v36, %v262_v33  ;;  %v274_v44 = vor.u32 %v273_v41, %v269_v40  ;;  %v287_v54 = vrot.slane %v285_v51, 1  ;;  %v2071_v9 = vsel %vm1984_vm5, %v223_v7, 0  ;;  %1862 = vmatprep.subr.msk.bf16.mxu0 %vm995_vm6, %v1888_v26  ;;  %v31_v36 = vld [vmem:[%s2991_s0 + $0x1c] sm:$0xf] }
  0x12   :  { %v281_v48 = vor.u32 %v280_v46, %v276_v45  ;;  %v129_v10 = vor.u32 %v127_v6, %v126_v5  ;;  %v292_v11 = vshll.u32 %v2071_v9, 16  ;;  %v133_v12 = vrot.slane %v131_v8, 7 }
  0x13   :  { %v288_v56 = vor.u32 %v287_v54, %v283_v53  ;;  %v134_v13 = vshll.u32 %v1663_v4, 16  ;;  %v290_v17 = vshrl.u32 %v2071_v9, 16  ;;  %v997_v28 = vsel %vm995_vm6, %v1888_v26, 0 }
  0x14   :  { %425 = vrot.lane.b32.xlu1 %v2019_v39, %s1916_s30  ;;  %361 = vrot.lane.b32.xlu0 %v267_v43, %s1915_s27  ;;  %v224_v15 = vsel %vm1979_vm4, 0, %v129_v10  ;;  %v294_v18 = vrot.slane %v292_v11, 1  ;;  %v409_v37 = vrot.slane %v2071_v9, 1  ;;  %v1664_v41 = vcombine.low %v31_v36, %v31_v36 }
  0x15   :  { %v2091_v20 = vsel %vm1984_vm5, %v224_v15, 0  ;;  %v136_v22 = vor.u32 %v134_v13, %v133_v12  ;;  %1773 = vmatpush3.bf16.msra.mxu0 %v997_v28  ;;  %v1665_v53 = vcombine.low %v32_v52, %v32_v52  ;;  %v1667_v61 = vcombine.low %v2162_v58, %v2162_v58 }
  0x16   :  { %v295_v23 = vor.u32 %v294_v18, %v290_v17  ;;  %v299_v24 = vshll.u32 %v2091_v20, 16  ;;  %v138_v42 = vshrl.u32 %v1664_v41, 16  ;;  %v141_v45 = vshll.u32 %v1664_v41, 16 }
  0x17   :  { %v225_v27 = vsel %vm1979_vm4, 0, %v136_v22  ;;  %v148_v60 = vshll.u32 %v1665_v53, 16  ;;  %v1666_v63 = vcombine.low %v2170_v62, %v2170_v62  ;;  %v159_v3 = vshrl.u32 %v1667_v61, 16 }
  0x18   :  { %363 = vrot.lane.b32.xlu1 %v274_v44, %s1915_s27  ;;  %455 = vrot.lane.b32.xlu0 %v2012_v32, %s1917_s7  ;;  %v2109_v33 = vsel %vm1984_vm5, %v225_v27, 0  ;;  %v162_v8 = vshll.u32 %v1667_v61, 16  ;;  %vm653_vm7 = vcmask 31744   ;;  %vm684_vm8 = vcmask 64512  }
  0x19   :  { %v306_v34 = vshll.u32 %v2109_v33, 16  ;;  %v304_v38 = vshrl.u32 %v2109_v33, 16  ;;  %v2132_v46 = vrot.slane %v2109_v33, 1  ;;  %v152_v5 = vshrl.u32 %v1666_v63, 16 }
  0x1a   :  { %v161_v7 = vrot.slane %v159_v3, 7  ;;  %v155_v12 = vshll.u32 %v1666_v63, 16  ;;  %vm715_vm9 = vcmask 97280   ;;  %vm748_vm10 = vcmask 130048  }
  0x1b   :  { %v308_v40 = vrot.slane %v306_v34, 1  ;;  %v154_v11 = vrot.slane %v152_v5, 7  ;;  %v2301_v5 = vld [vmem:[%s2991_s0 + $0x30] sm:$0xf]  ;;  %vm781_vm11 = vcmask 162816   ;;  %vm814_vm12 = vcmask 195584  }
  0x1c   :  { %365 = vrot.lane.b32.xlu1 %v281_v48, %s1915_s27  ;;  %497 = vrot.lane.b32.xlu0 %v267_v43, %s1918_s8  ;;  %v410_v43 = vrot.slane %v2091_v20, 1  ;;  %v164_v13 = vor.u32 %v162_v8, %v161_v7  ;;  %vm846_vm13 = vcmask 228352   ;;  %vm878_vm14 = vcmask 261120  }
  0x1d   :  { %v157_v17 = vor.u32 %v155_v12, %v154_v11  ;;  %v1669_v12 = vcombine.low %v2301_v5, %v2301_v5  ;;  %vm970_vm15 = vcmask 293888   ;;  %vm1636_vm0 = vcmask 125952  }
  0x1e   :  { %v229_v18 = vsel %vm1979_vm4, 0, %v164_v13 }
  0x1f   :  { %v228_v26 = vsel %vm1979_vm4, 0, %v157_v17 }
  0x20   :  { %457 = vrot.lane.b32.xlu1 %v2036_v50, %s1917_s7  ;;  %501 = vrot.lane.b32.xlu0 %v281_v48, %s1918_s8  ;;  %v2216_v28 = vsel %vm1984_vm5, %v228_v26, 0 }
  0x21   :  { %v320_v34 = vshll.u32 %v2216_v28, 16  ;;  %v318_v41 = vshrl.u32 %v2216_v28, 16 }
  0x24   :  { %499 = vrot.lane.b32.xlu1 %v274_v44, %s1918_s8  ;;  %531 = vrot.lane.b32.xlu0 %v405_v31, %s1919_s13  ;;  %v301_v31 = vrot.slane %v299_v24, 1  ;;  %v2206_v24 = vsel %vm1984_vm5, %v229_v18, 0 }
  0x25   :  { %v327_v27 = vshll.u32 %v2206_v24, 16 }
  0x27   :  { %v329_v36 = vrot.slane %v327_v27, 1 }
  0x28   :  { %503 = vrot.lane.b32.xlu1 %v288_v56, %s1918_s8  ;;  %535 = vrot.lane.b32.xlu0 %v2019_v39, %s1919_s13 }
  0x2c   :  { %533 = vrot.lane.b32.xlu1 %v2005_v30, %s1919_s13  ;;  %563 = vrot.lane.b32.xlu0 %v1992_v25, %s1920_s16 }
  0x30   :  { %537 = vrot.lane.b32.xlu1 %v408_v2, %s1919_s13  ;;  %567 = vrot.lane.b32.xlu0 %v2036_v50, %s1920_s16 }
  0x34   :  { %565 = vrot.lane.b32.xlu1 %v2012_v32, %s1920_s16  ;;  %593 = vrot.lane.b32.xlu0 %v274_v44, %s1921_s17  ;;  %v140_v44 = vrot.slane %v138_v42, 7 }
  0x36   :  { %v143_v47 = vor.u32 %v141_v45, %v140_v44 }
  0x38   :  { %569 = vrot.lane.b32.xlu1 %v2071_v9, %s1920_s16  ;;  %597 = vrot.lane.b32.xlu0 %v288_v56, %s1921_s17 }
  0x3c   :  { %595 = vrot.lane.b32.xlu1 %v281_v48, %s1921_s17  ;;  %623 = vrot.lane.b32.xlu0 %v2005_v30, %s1922_s22  ;;  %v297_v30 = vshrl.u32 %v2091_v20, 16  ;;  %v226_v48 = vsel %vm1979_vm4, 0, %v143_v47 }
  0x3d   :  { %v2144_v49 = vsel %vm1984_vm5, %v226_v48, 0  ;;  %v2255_v48 = vrot.slane %v2216_v28, 1 }
  0x3e   :  { %v302_v35 = vor.u32 %v301_v31, %v297_v30  ;;  %v486_v51 = vshll.u32 %v2144_v49, 16  ;;  %v484_v54 = vshrl.u32 %v2144_v49, 16  ;;  %v529_v4 = vrot.slane %v2144_v49, 1 }
  0x40   :  { %599 = vrot.lane.b32.xlu1 %v295_v23, %s1921_s17  ;;  %367 = vrot.lane.b32.xlu0 %v288_v56, %s1915_s27  ;;  %v488_v55 = vrot.slane %v486_v51, 1  ;;  %v145_v56 = vshrl.u32 %v1665_v53, 16 }
  0x42   :  { %v489_v57 = vor.u32 %v488_v55, %v484_v54  ;;  %v147_v59 = vrot.slane %v145_v56, 7  ;;  %v2272_v56 = vrot.slane %v2206_v24, 1 }
  0x44   :  { %625 = vrot.lane.b32.xlu1 %v2019_v39, %s1922_s22  ;;  %627 = vrot.lane.b32.xlu0 %v408_v2, %s1922_s22  ;;  %v2123_v39 = vor.u32 %v308_v40, %v304_v38 }
  0x48   :  { %369 = vrot.lane.b32.xlu1 %v295_v23, %s1915_s27  ;;  %371 = vrot.lane.b32.xlu0 %v302_v35, %s1915_s27 }
  0x4c   :  { %629 = vrot.lane.b32.xlu1 %v409_v37, %s1922_s22  ;;  %427 = vrot.lane.b32.xlu0 %v408_v2, %s1916_s30  ;;  %v150_v2 = vor.u32 %v148_v60, %v147_v59 }
  0x4e   :  { %v227_v6 = vsel %vm1979_vm4, 0, %v150_v2 }
  0x4f   :  { %v2188_v10 = vsel %vm1984_vm5, %v227_v6, 0 }
  0x50   :  { %373 = vrot.lane.b32.xlu1 %v2123_v39, %s1915_s27  ;;  %431 = vrot.lane.b32.xlu0 %v410_v43, %s1916_s30  ;;  %v313_v15 = vshll.u32 %v2188_v10, 16  ;;  %v311_v22 = vshrl.u32 %v2188_v10, 16  ;;  %v412_v51 = vrot.slane %v2188_v10, 1 }
  0x54   :  { %429 = vrot.lane.b32.xlu1 %v409_v37, %s1916_s30  ;;  %459 = vrot.lane.b32.xlu0 %v2071_v9, %s1917_s7 }
  0x58   :  { %433 = vrot.lane.b32.xlu1 %v2132_v46, %s1916_s30  ;;  %463 = vrot.lane.b32.xlu0 %v2109_v33, %s1917_s7 }
  0x5c   :  { %461 = vrot.lane.b32.xlu1 %v2091_v20, %s1917_s7  ;;  %505 = vrot.lane.b32.xlu0 %v295_v23, %s1918_s8  ;;  %v315_v23 = vrot.slane %v313_v15, 1  ;;  %v2319_v15 = vld [vmem:[%s2991_s0 + $0x34] sm:$0xf] }
  0x60   :  { %465 = vrot.lane.b32.xlu1 %v2144_v49, %s1917_s7  ;;  %509 = vrot.lane.b32.xlu0 %v2123_v39, %s1918_s8 }
  0x64   :  { %507 = vrot.lane.b32.xlu1 %v302_v35, %s1918_s8  ;;  %539 = vrot.lane.b32.xlu0 %v409_v37, %s1919_s13  ;;  %v2230_v37 = vld [vmem:[%s2991_s0 + $0x2c] sm:$0xf] }
  0x65   :  { %v1668_v42 = vcombine.low %v2230_v37, %v2230_v37 }
  0x67   :  { %v169_v53 = vshll.u32 %v1668_v42, 16 }
  0x68   :  { %511 = vrot.lane.b32.xlu1 %v489_v57, %s1918_s8  ;;  %543 = vrot.lane.b32.xlu0 %v2132_v46, %s1919_s13 }
  0x6c   :  { %541 = vrot.lane.b32.xlu1 %v410_v43, %s1919_s13  ;;  %571 = vrot.lane.b32.xlu0 %v2091_v20, %s1920_s16 }
  0x70   :  { %545 = vrot.lane.b32.xlu1 %v529_v4, %s1919_s13  ;;  %575 = vrot.lane.b32.xlu0 %v2144_v49, %s1920_s16 }
  0x74   :  { %573 = vrot.lane.b32.xlu1 %v2109_v33, %s1920_s16  ;;  %601 = vrot.lane.b32.xlu0 %v302_v35, %s1921_s17  ;;  %v325_v35 = vshrl.u32 %v2206_v24, 16 }
  0x75   :  { %v2193_v14 = vpop.permute.xlu0 %359 }
  0x78   :  { %577 = vrot.lane.b32.xlu1 %v1914_v0, %s1920_s16  ;;  %605 = vrot.lane.b32.xlu0 %v489_v57, %s1921_s17  ;;  %v316_v0 = vor.u32 %v315_v23, %v311_v22  ;;  %v173_v22 = vshrl.u32 %v1669_v12, 16  ;;  %v1670_v23 = vcombine.low %v2319_v15, %v2319_v15 }
  0x79   :  { %v2201_v19 = vpop.permute.xlu0 %419 }
  0x7a   :  { %v175_v27 = vrot.slane %v173_v22, 7 }
  0x7c   :  { %603 = vrot.lane.b32.xlu1 %v2123_v39, %s1921_s17  ;;  %631 = vrot.lane.b32.xlu0 %v410_v43, %s1922_s22  ;;  %v322_v39 = vrot.slane %v320_v34, 1  ;;  %v2243_v43 = vor.u32 %v329_v36, %v325_v35  ;;  %v176_v34 = vshll.u32 %v1669_v12, 16  ;;  %v180_v35 = vshrl.u32 %v1670_v23, 16 }
  0x7e   :  { %v2218_v30 = vpop.permute.xlu1 %453  ;;  %v2220_v31 = vpop.permute.xlu0 %451  ;;  %v2250_v47 = vor.u32 %v322_v39, %v318_v41  ;;  %v2341_v39 = vld [vmem:[%s2991_s0 + $0x38] sm:$0xf] }
  0x80   :  { %607 = vrot.lane.b32.xlu1 %v1959_v1, %s1921_s17  ;;  %375 = vrot.lane.b32.xlu0 %v316_v0, %s1915_s27 }
  0x82   :  { %v2232_v38 = vpop.permute.xlu1 %421  ;;  %v2234_v40 = vpop.permute.xlu0 %423 }
  0x84   :  { %633 = vrot.lane.b32.xlu1 %v2132_v46, %s1922_s22  ;;  %637 = vrot.lane.b32.xlu0 %v1959_v1, %s1922_s22  ;;  %v166_v46 = vshrl.u32 %v1668_v42, 16 }
  0x86   :  { %v2245_v44 = vpop.permute.xlu1 %425  ;;  %v2247_v45 = vpop.permute.xlu0 %361  ;;  %v168_v52 = vrot.slane %v166_v46, 7  ;;  %v178_v46 = vor.u32 %v176_v34, %v175_v27 }
  0x88   :  { %635 = vrot.lane.b32.xlu1 %v529_v4, %s1922_s22  ;;  %379 = vrot.lane.b32.xlu0 %v2243_v43, %s1915_s27  ;;  %v171_v57 = vor.u32 %v169_v53, %v168_v52  ;;  %v183_v52 = vshll.u32 %v1670_v23, 16 }
  0x8a   :  { %v2257_v49 = vpop.permute.xlu1 %363  ;;  %v2259_v1 = vpop.permute.xlu0 %455  ;;  %v230_v61 = vsel %vm1979_vm4, 0, %v171_v57  ;;  %v1671_v57 = vcombine.low %v2341_v39, %v2341_v39 }
  0x8b   :  { %v2292_v3 = vsel %vm1984_vm5, %v230_v61, 0 }
  0x8c   :  { %377 = vrot.lane.b32.xlu1 %v2250_v47, %s1915_s27  ;;  %437 = vrot.lane.b32.xlu0 %v2255_v48, %s1916_s30  ;;  %v334_v4 = vshll.u32 %v2292_v3, 16  ;;  %v332_v8 = vshrl.u32 %v2292_v3, 16  ;;  %v2346_v42 = vrot.slane %v2292_v3, 1  ;;  %v187_v23 = vshrl.u32 %v1671_v57, 16 }
  0x8e   :  { %v2266_v54 = vpop.permute.xlu1 %365  ;;  %v2268_v55 = vpop.permute.xlu0 %497  ;;  %v336_v11 = vrot.slane %v334_v4, 1  ;;  %v655_v4 = vsel %vm653_vm7, 0, %v2193_v14 }
  0x8f   :  { %v2369_v14 = vsel %vm684_vm8, %v655_v4, %v2201_v19 }
  0x90   :  { %435 = vrot.lane.b32.xlu1 %v412_v51, %s1916_s30  ;;  %467 = vrot.lane.b32.xlu0 %v2188_v10, %s1917_s7  ;;  %v2325_v18 = vor.u32 %v336_v11, %v332_v8  ;;  %v657_v8 = vsel %vm653_vm7, %v2002_v29, %v2247_v45  ;;  %v231_v11 = vsel %vm1979_vm4, 0, %v178_v46 }
  0x91   :  { %v688_v29 = vsel %vm684_vm8, %v657_v8, %v2232_v38  ;;  %v2375_v27 = vsel %vm1984_vm5, %v231_v11, 0  ;;  %v717_v38 = vsel %vm715_vm9, %v2369_v14, %v2220_v31  ;;  %v659_v31 = vsel %vm653_vm7, %v1992_v25, %v2257_v49 }
  0x92   :  { %v2276_v59 = vpop.permute.xlu1 %457  ;;  %v2278_v60 = vpop.permute.xlu0 %501  ;;  %v341_v34 = vshll.u32 %v2375_v27, 16  ;;  %v750_v4 = vsel %vm748_vm10, %v717_v38, %v2268_v55  ;;  %v339_v11 = vshrl.u32 %v2375_v27, 16  ;;  %v661_v49 = vsel %vm653_vm7, %v2012_v32, %v2266_v54 }
  0x93   :  { %v692_v54 = vsel %vm684_vm8, %v661_v49, %v2245_v44 }
  0x94   :  { %439 = vrot.lane.b32.xlu1 %v2272_v56, %s1916_s30  ;;  %471 = vrot.lane.b32.xlu0 %v2206_v24, %s1917_s7  ;;  %v343_v55 = vrot.slane %v341_v34, 1 }
  0x96   :  { %v2286_v63 = vpop.permute.xlu1 %499  ;;  %v2288_v2 = vpop.permute.xlu0 %531  ;;  %v2425_v32 = vor.u32 %v343_v55, %v339_v11 }
  0x98   :  { %469 = vrot.lane.b32.xlu1 %v2216_v28, %s1917_s7  ;;  %513 = vrot.lane.b32.xlu0 %v316_v0, %s1918_s8 }
  0x9a   :  { %v2303_v6 = vpop.permute.xlu1 %503  ;;  %v2305_v7 = vpop.permute.xlu0 %535 }
  0x9c   :  { %473 = vrot.lane.b32.xlu1 %v2292_v3, %s1917_s7  ;;  %517 = vrot.lane.b32.xlu0 %v2243_v43, %s1918_s8 }
  0x9e   :  { %v2314_v13 = vpop.permute.xlu1 %533  ;;  %v2321_v17 = vpop.permute.xlu0 %563 }
  0xa0   :  { %515 = vrot.lane.b32.xlu1 %v2250_v47, %s1918_s8  ;;  %547 = vrot.lane.b32.xlu0 %v412_v51, %s1919_s13  ;;  %v182_v51 = vrot.slane %v180_v35, 7  ;;  %v719_v35 = vsel %vm715_vm9, %v688_v29, %v2218_v30  ;;  %v783_v30 = vsel %vm781_vm11, %v750_v4, %v2288_v2 }
  0xa1   :  { %v752_v8 = vsel %vm748_vm10, %v719_v35, %v2286_v63  ;;  %v816_v63 = vsel %vm814_vm12, %v783_v30, %v2321_v17  ;;  %v690_v17 = vsel %vm684_vm8, %v659_v31, %v2234_v40 }
  0xa2   :  { %v2330_v26 = vpop.permute.xlu1 %537  ;;  %v2332_v0 = vpop.permute.xlu0 %567  ;;  %v185_v12 = vor.u32 %v183_v52, %v182_v51  ;;  %v189_v51 = vrot.slane %v187_v23, 7  ;;  %v190_v52 = vshll.u32 %v1671_v57, 16  ;;  %v785_v57 = vsel %vm781_vm11, %v752_v8, %v2314_v13 }
  0xa4   :  { %519 = vrot.lane.b32.xlu1 %v2325_v18, %s1918_s8  ;;  %551 = vrot.lane.b32.xlu0 %v2272_v56, %s1919_s13  ;;  %v232_v19 = vsel %vm1979_vm4, 0, %v185_v12  ;;  %v192_v29 = vor.u32 %v190_v52, %v189_v51 }
  0xa5   :  { %v2412_v25 = vsel %vm1984_vm5, %v232_v19, 0 }
  0xa6   :  { %v566_v36 = vpop.permute.xlu1 %565  ;;  %v594_v41 = vpop.permute.xlu0 %593  ;;  %v348_v40 = vshll.u32 %v2412_v25, 16  ;;  %v346_v51 = vshrl.u32 %v2412_v25, 16 }
  0xa7   :  { %v818_v12 = vsel %vm814_vm12, %v785_v57, %v566_v36  ;;  %v848_v2 = vsel %vm846_vm13, %v816_v63, %v594_v41  ;;  %v721_v41 = vsel %vm715_vm9, %v690_v17, %v2259_v1 }
  0xa8   :  { %549 = vrot.lane.b32.xlu1 %v2255_v48, %s1919_s13  ;;  %579 = vrot.lane.b32.xlu0 %v2216_v28, %s1920_s16  ;;  %v754_v44 = vsel %vm748_vm10, %v721_v41, %v2278_v60 }
  0xa9   :  { %v787_v1 = vsel %vm781_vm11, %v754_v44, %v2305_v7 }
  0xaa   :  { %v2350_v53 = vpop.permute.xlu1 %569  ;;  %v2354_v61 = vpop.permute.xlu0 %597  ;;  %v820_v52 = vsel %vm814_vm12, %v787_v1, %v2332_v0 }
  0xac   :  { %553 = vrot.lane.b32.xlu1 %v2346_v42, %s1919_s13  ;;  %583 = vrot.lane.b32.xlu0 %v2292_v3, %s1920_s16 }
  0xae   :  { %v596_v22 = vpop.permute.xlu1 %595  ;;  %v624_v45 = vpop.permute.xlu0 %623 }
  0xaf   :  { %v850_v13 = vsel %vm846_vm13, %v818_v12, %v596_v22  ;;  %v880_v36 = vsel %vm878_vm14, %v848_v2, %v624_v45  ;;  %v723_v22 = vsel %vm715_vm9, %v692_v54, %v2276_v59 }
  0xb0   :  { %581 = vrot.lane.b32.xlu1 %v2206_v24, %s1920_s16  ;;  %609 = vrot.lane.b32.xlu0 %v2250_v47, %s1921_s17 }
  0xb2   :  { %v600_v46 = vpop.permute.xlu1 %599  ;;  %v2393_v47 = vpop.permute.xlu0 %367 }
  0xb4   :  { %585 = vrot.lane.b32.xlu1 %v2375_v27, %s1920_s16  ;;  %613 = vrot.lane.b32.xlu0 %v2325_v18, %s1921_s17 }
  0xb6   :  { %v626_v23 = vpop.permute.xlu1 %625  ;;  %v628_v38 = vpop.permute.xlu0 %627 }
  0xb7   :  { %v882_v34 = vsel %vm878_vm14, %v850_v13, %v626_v23 }
  0xb8   :  { %611 = vrot.lane.b32.xlu1 %v2243_v43, %s1921_s17  ;;  %v1673_v19 = vcombine.low %v880_v36, %v882_v34  ;;  %639 = vrot.lane.b32.xlu0 %v2255_v48, %s1922_s22  ;;  %v233_v43 = vsel %vm1979_vm4, 0, %v192_v29  ;;  %v756_v48 = vsel %vm748_vm10, %v723_v22, %v2303_v6  ;;  %v350_v6 = vrot.slane %v348_v40, 1 }
  0xb9   :  { %v789_v59 = vsel %vm781_vm11, %v756_v48, %v2330_v26  ;;  %v2462_v7 = vsel %vm1984_vm5, %v233_v43, 0  ;;  %v852_v26 = vsel %vm846_vm13, %v820_v52, %v2354_v61  ;;  %v2481_v61 = vld [vmem:[%s2991_s0 + $0x3c] sm:$0xf]  ;;  %v2500_v29 = vrot.slane %v2412_v25, 1 }
  0xba   :  { %v2436_v45 = vpop.permute.xlu1 %369  ;;  %1774 = vmatprep.mubr.msk.bf16.mxu0 %vm970_vm15, %v1673_v19  ;;  %v2445_v35 = vpop.permute.xlu0 %371  ;;  %v822_v60 = vsel %vm814_vm12, %v789_v59, %v2350_v53  ;;  %v884_v11 = vsel %vm878_vm14, %v852_v26, %v628_v38  ;;  %v2476_v30 = vor.u32 %v350_v6, %v346_v51  ;;  %v353_v55 = vshrl.u32 %v2462_v7, 16 }
  0xbb   :  { %v854_v4 = vsel %vm846_vm13, %v822_v60, %v600_v46  ;;  %v1672_v12 = vcombine.low %v2481_v61, %v2481_v61 }
  0xbc   :  { %615 = vrot.lane.b32.xlu1 %v2425_v32, %s1921_s17  ;;  %381 = vrot.lane.b32.xlu0 %v2325_v18, %s1915_s27  ;;  %v355_v18 = vshll.u32 %v2462_v7, 16 }
  0xbd   :  { %v194_v23 = vshrl.u32 %v1672_v12, 16  ;;  %v197_v38 = vshll.u32 %v1672_v12, 16  ;;  %v665_v12 = vsel %vm653_vm7, %v2071_v9, %v2436_v45  ;;  %v667_v45 = vsel %vm653_vm7, %v2091_v20, %v2445_v35 }
  0xbe   :  { %v630_v8 = vpop.permute.xlu1 %629  ;;  %v2469_v31 = vpop.permute.xlu0 %427  ;;  %v357_v63 = vrot.slane %v355_v18, 1 }
  0xbf   :  { %v886_v0 = vsel %vm878_vm14, %v854_v4, %v630_v8  ;;  %v196_v34 = vrot.slane %v194_v23, 7 }
  0xc0   :  { %v1674_v53 = vcombine.low %v884_v11, %v886_v0  ;;  %641 = vrot.lane.b32.xlu1 %v2272_v56, %s1922_s22  ;;  %643 = vrot.lane.b32.xlu0 %v2346_v42, %s1922_s22  ;;  %v416_v56 = vrot.slane %v2375_v27, 1  ;;  %v358_v13 = vor.u32 %v357_v63, %v353_v55  ;;  %v663_v63 = vsel %vm653_vm7, %v2036_v50, %v2393_v47 }
  0xc1   :  { %v199_v40 = vor.u32 %v197_v38, %v196_v34  ;;  %v694_v23 = vsel %vm684_vm8, %v663_v63, %v2469_v31 }
  0xc2   :  { %v2483_v46 = vpop.permute.xlu1 %373  ;;  %1775 = vmatmul.mubr.msk.bf16.vlgmr.msra.gmra.mrb[0].mxu0 %vm970_vm15, %v1674_v53  ;;  %v2486_v57 = vpop.permute.xlu0 %431 }
  0xc3   :  { %v234_v43 = vsel %vm1979_vm4, 0, %v199_v40  ;;  %v669_v31 = vsel %vm653_vm7, %v2109_v33, %v2483_v46 }
  0xc4   :  { %383 = vrot.lane.b32.xlu1 %v2425_v32, %s1915_s27  ;;  %385 = vrot.lane.b32.xlu0 %v2476_v30, %s1915_s27  ;;  %v2525_v1 = vsel %vm1984_vm5, %v234_v43, 0 }
  0xc5   :  { %v493_v59 = vshll.u32 %v2525_v1, 16  ;;  %v491_v52 = vshrl.u32 %v2525_v1, 16  ;;  %v530_v0 = vrot.slane %v2525_v1, 1 }
  0xc6   :  { %v430_v49 = vpop.permute.xlu1 %429  ;;  %v460_v2 = vpop.permute.xlu0 %459 }
  0xc7   :  { %v495_v60 = vrot.slane %v493_v59, 1  ;;  %v696_v34 = vsel %vm684_vm8, %v665_v12, %v430_v49  ;;  %v725_v38 = vsel %vm715_vm9, %v694_v23, %v460_v2 }
  0xc8   :  { %645 = vrot.lane.b32.xlu1 %v416_v56, %s1922_s22  ;;  %441 = vrot.lane.b32.xlu0 %v2346_v42, %s1916_s30  ;;  %v2511_v42 = vrot.slane %v2462_v7, 1 }
  0xc9   :  { %v496_v26 = vor.u32 %v495_v60, %v491_v52 }
  0xca   :  { %v2502_v17 = vpop.permute.xlu1 %433  ;;  %v2504_v36 = vpop.permute.xlu0 %463 }
  0xcc   :  { %387 = vrot.lane.b32.xlu1 %v358_v13, %s1915_s27  ;;  %445 = vrot.lane.b32.xlu0 %v2500_v29, %s1916_s30 }
  0xce   :  { %v462_v19 = vpop.permute.xlu1 %461  ;;  %v506_v54 = vpop.permute.xlu0 %505 }
  0xcf   :  { %v727_v40 = vsel %vm715_vm9, %v696_v34, %v462_v19  ;;  %v758_v50 = vsel %vm748_vm10, %v725_v38, %v506_v54  ;;  %v700_v19 = vsel %vm684_vm8, %v669_v31, %v2502_v17 }
  0xd0   :  { %443 = vrot.lane.b32.xlu1 %v416_v56, %s1916_s30  ;;  %475 = vrot.lane.b32.xlu0 %v2375_v27, %s1917_s7 }
  0xd2   :  { %v466_v41 = vpop.permute.xlu1 %465  ;;  %v2515_v22 = vpop.permute.xlu0 %509 }
  0xd3   :  { %v731_v35 = vsel %vm715_vm9, %v700_v19, %v466_v41 }
  0xd4   :  { %447 = vrot.lane.b32.xlu1 %v2511_v42, %s1916_s30  ;;  %479 = vrot.lane.b32.xlu0 %v2462_v7, %s1917_s7 }
  0xd6   :  { %v508_v44 = vpop.permute.xlu1 %507  ;;  %v540_v48 = vpop.permute.xlu0 %539 }
  0xd7   :  { %v760_v9 = vsel %vm748_vm10, %v727_v40, %v508_v44  ;;  %v791_v49 = vsel %vm781_vm11, %v758_v50, %v540_v48 }
  0xd8   :  { %477 = vrot.lane.b32.xlu1 %v2412_v25, %s1917_s7  ;;  %521 = vrot.lane.b32.xlu0 %v2425_v32, %s1918_s8 }
  0xda   :  { %v512_v51 = vpop.permute.xlu1 %511  ;;  %v544_v16 = vpop.permute.xlu0 %543 }
  0xdb   :  { %v764_v44 = vsel %vm748_vm10, %v731_v35, %v512_v51 }
  0xdc   :  { %481 = vrot.lane.b32.xlu1 %v2525_v1, %s1917_s7  ;;  %525 = vrot.lane.b32.xlu0 %v358_v13, %s1918_s8 }
  0xde   :  { %v542_v21 = vpop.permute.xlu1 %541  ;;  %v572_v6 = vpop.permute.xlu0 %571 }
  0xdf   :  { %v793_v2 = vsel %vm781_vm11, %v760_v9, %v542_v21  ;;  %v824_v54 = vsel %vm814_vm12, %v791_v49, %v572_v6 }
  0xe0   :  { %523 = vrot.lane.b32.xlu1 %v2476_v30, %s1918_s8  ;;  %555 = vrot.lane.b32.xlu0 %v416_v56, %s1919_s13 }
  0xe2   :  { %v546_v4 = vpop.permute.xlu1 %545  ;;  %v576_v32 = vpop.permute.xlu0 %575 }
  0xe3   :  { %v797_v41 = vsel %vm781_vm11, %v764_v44, %v546_v4 }
  0xe4   :  { %527 = vrot.lane.b32.xlu1 %v496_v26, %s1918_s8  ;;  %559 = vrot.lane.b32.xlu0 %v2511_v42, %s1919_s13 }
  0xe6   :  { %v574_v8 = vpop.permute.xlu1 %573  ;;  %v602_v11 = vpop.permute.xlu0 %601 }
  0xe7   :  { %v826_v20 = vsel %vm814_vm12, %v793_v2, %v574_v8 }
  0xe8   :  { %557 = vrot.lane.b32.xlu1 %v2500_v29, %s1919_s13  ;;  %587 = vrot.lane.b32.xlu0 %v2412_v25, %s1920_s16 }
  0xea   :  { %v2547_v53 = vpop.permute.xlu1 %577  ;;  %v606_v18 = vpop.permute.xlu0 %605 }
  0xec   :  { %561 = vrot.lane.b32.xlu1 %v530_v0, %s1919_s13  ;;  %591 = vrot.lane.b32.xlu0 %v2525_v1, %s1920_s16 }
  0xee   :  { %v604_v56 = vpop.permute.xlu1 %603  ;;  %v632_v55 = vpop.permute.xlu0 %631 }
  0xef   :  { %v858_v46 = vsel %vm846_vm13, %v826_v20, %v604_v56 }
  0xf0   :  { %589 = vrot.lane.b32.xlu1 %v2462_v7, %s1920_s16  ;;  %619 = vrot.lane.b32.xlu0 %v358_v13, %s1921_s17  ;;  %v698_v13 = vsel %vm684_vm8, %v667_v45, %v2486_v57 }
  0xf1   :  { %v729_v33 = vsel %vm715_vm9, %v698_v13, %v2504_v36 }
  0xf2   :  { %v2566_v43 = vpop.permute.xlu1 %607  ;;  %v2570_v47 = vpop.permute.xlu0 %375  ;;  %v762_v17 = vsel %vm748_vm10, %v729_v33, %v2515_v22  ;;  %v830_v22 = vsel %vm814_vm12, %v797_v41, %v2547_v53 }
  0xf3   :  { %v795_v36 = vsel %vm781_vm11, %v762_v17, %v544_v16  ;;  %v862_v60 = vsel %vm846_vm13, %v830_v22, %v2566_v43 }
  0xf4   :  { %617 = vrot.lane.b32.xlu1 %v2476_v30, %s1921_s17  ;;  %647 = vrot.lane.b32.xlu0 %v2500_v29, %s1922_s22  ;;  %v856_v30 = vsel %vm846_vm13, %v824_v54, %v602_v11  ;;  %v828_v52 = vsel %vm814_vm12, %v795_v36, %v576_v32 }
  0xf5   :  { %v888_v48 = vsel %vm878_vm14, %v856_v30, %v632_v55  ;;  %v860_v51 = vsel %vm846_vm13, %v828_v52, %v606_v18  ;;  %v671_v30 = vsel %vm653_vm7, %v2188_v10, %v2570_v47 }
  0xf6   :  { %v634_v57 = vpop.permute.xlu1 %633  ;;  %v2600_v29 = vpop.permute.xlu0 %637 }
  0xf7   :  { %v890_v1 = vsel %vm878_vm14, %v858_v46, %v634_v57  ;;  %v894_v16 = vsel %vm878_vm14, %v862_v60, %v2600_v29 }
  0xf8   :  { %v1675_v59 = vcombine.low %v888_v48, %v890_v1  ;;  %621 = vrot.lane.b32.xlu1 %v496_v26, %s1921_s17  ;;  %651 = vrot.lane.b32.xlu0 %v530_v0, %s1922_s22 }
  0xfa   :  { %v636_v21 = vpop.permute.xlu1 %635  ;;  %1778 = vmatprep.mubr.msk.bf16.mxu0 %vm970_vm15, %v1675_v59  ;;  %v380_v26 = vpop.permute.xlu0 %379 }
  0xfb   :  { %v892_v6 = vsel %vm878_vm14, %v860_v51, %v636_v21 }
  0xfc   :  { %v1676_v4 = vcombine.low %v892_v6, %v894_v16  ;;  %649 = vrot.lane.b32.xlu1 %v2511_v42, %s1922_s22  ;;  %v2622_v42 = vld [vmem:[%s2993_s2] sm:$0xf]  ;;  %v675_v6 = vsel %vm653_vm7, %v2206_v24, %v380_v26 }
  0xfd   :  { %1863 = vmatprep.subr.msk.bf16.mxu1 %vm995_vm6, %v2622_v42  ;;  %v1163_v31 = vsel %vm995_vm6, %v2622_v42, 0 }
  0xfe   :  { %v378_v32 = vpop.permute.xlu1 %377  ;;  %1779 = vmatmul.mubr.msk.bf16.gmra.mrb[4].mxu0 %vm970_vm15, %v1676_v4  ;;  %v438_v8 = vpop.permute.xlu0 %437  ;;  %1791 = vmatpush3.bf16.msra.mxu1 %v1163_v31 }
  0xff   :  { %v673_v47 = vsel %vm653_vm7, %v2216_v28, %v378_v32 }
 0x102   :  { %v436_v11 = vpop.permute.xlu1 %435  ;;  %v468_v0 = vpop.permute.xlu0 %467 }
 0x103   :  { %v702_v46 = vsel %vm684_vm8, %v671_v30, %v436_v11  ;;  %v733_v57 = vsel %vm715_vm9, %v2369_v14, %v468_v0  ;;  %v704_v11 = vsel %vm684_vm8, %v673_v47, %v438_v8 }
 0x106   :  { %v440_v18 = vpop.permute.xlu1 %439  ;;  %v472_v56 = vpop.permute.xlu0 %471 }
 0x107   :  { %v706_v0 = vsel %vm684_vm8, %v675_v6, %v440_v18  ;;  %v737_v28 = vsel %vm715_vm9, %v704_v11, %v472_v56 }
 0x10a   :  { %v470_v55 = vpop.permute.xlu1 %469  ;;  %v514_v63 = vpop.permute.xlu0 %513 }
 0x10b   :  { %v735_v17 = vsel %vm715_vm9, %v702_v46, %v470_v55  ;;  %v766_v48 = vsel %vm748_vm10, %v733_v57, %v514_v63 }
 0x10e   :  { %v474_v12 = vpop.permute.xlu1 %473  ;;  %v518_v23 = vpop.permute.xlu0 %517 }
 0x10f   :  { %v739_v32 = vsel %vm715_vm9, %v706_v0, %v474_v12  ;;  %v770_v63 = vsel %vm748_vm10, %v737_v28, %v518_v23 }
 0x112   :  { %v516_v34 = vpop.permute.xlu1 %515  ;;  %v548_v38 = vpop.permute.xlu0 %547 }
 0x113   :  { %v768_v1 = vsel %vm748_vm10, %v735_v17, %v516_v34  ;;  %v799_v41 = vsel %vm781_vm11, %v766_v48, %v548_v38 }
 0x116   :  { %v520_v40 = vpop.permute.xlu1 %519  ;;  %v552_v50 = vpop.permute.xlu0 %551 }
 0x117   :  { %v772_v34 = vsel %vm748_vm10, %v739_v32, %v520_v40 }
 0x11a   :  { %v550_v9 = vpop.permute.xlu1 %549  ;;  %v580_v45 = vpop.permute.xlu0 %579 }
 0x11b   :  { %v801_v59 = vsel %vm781_vm11, %v768_v1, %v550_v9  ;;  %v832_v52 = vsel %vm814_vm12, %v799_v41, %v580_v45  ;;  %v803_v9 = vsel %vm781_vm11, %v770_v63, %v552_v50 }
 0x11e   :  { %v554_v49 = vpop.permute.xlu1 %553  ;;  %v584_v2 = vpop.permute.xlu0 %583 }
 0x11f   :  { %v805_v24 = vsel %vm781_vm11, %v772_v34, %v554_v49  ;;  %v836_v26 = vsel %vm814_vm12, %v803_v9, %v584_v2 }
 0x122   :  { %v582_v13 = vpop.permute.xlu1 %581  ;;  %v610_v19 = vpop.permute.xlu0 %609 }
 0x123   :  { %v834_v10 = vsel %vm814_vm12, %v801_v59, %v582_v13  ;;  %v864_v14 = vsel %vm846_vm13, %v832_v52, %v610_v19 }
 0x126   :  { %v586_v54 = vpop.permute.xlu1 %585  ;;  %v614_v20 = vpop.permute.xlu0 %613 }
 0x127   :  { %v838_v8 = vsel %vm814_vm12, %v805_v24, %v586_v54  ;;  %v868_v18 = vsel %vm846_vm13, %v836_v26, %v614_v20 }
 0x12a   :  { %v612_v33 = vpop.permute.xlu1 %611  ;;  %v640_v35 = vpop.permute.xlu0 %639 }
 0x12b   :  { %v866_v22 = vsel %vm846_vm13, %v834_v10, %v612_v33  ;;  %v896_v60 = vsel %vm878_vm14, %v864_v14, %v640_v35 }
 0x12e   :  { %v616_v44 = vpop.permute.xlu1 %615  ;;  %v382_v36 = vpop.permute.xlu0 %381 }
 0x12f   :  { %v870_v56 = vsel %vm846_vm13, %v838_v8, %v616_v44 }
 0x132   :  { %v642_v51 = vpop.permute.xlu1 %641  ;;  %v644_v16 = vpop.permute.xlu0 %643 }
 0x133   :  { %v898_v21 = vsel %vm878_vm14, %v866_v22, %v642_v51  ;;  %v900_v45 = vsel %vm878_vm14, %v868_v18, %v644_v16 }
 0x134   :  { %v1677_v4 = vcombine.low %v896_v60, %v898_v21  ;;  %v677_v60 = vsel %vm653_vm7, %v2292_v3, %v382_v36 }
 0x136   :  { %v384_v55 = vpop.permute.xlu1 %383  ;;  %1782 = vmatprep.mubr.msk.bf16.mxu0 %vm970_vm15, %v1677_v4  ;;  %v386_v38 = vpop.permute.xlu0 %385 }
 0x137   :  { %v681_v22 = vsel %vm653_vm7, %v2412_v25, %v386_v38  ;;  %v679_v21 = vsel %vm653_vm7, %v2375_v27, %v384_v55 }
 0x13a   :  { %v646_v12 = vpop.permute.xlu1 %645  ;;  %v442_v31 = vpop.permute.xlu0 %441 }
 0x13b   :  { %v902_v23 = vsel %vm878_vm14, %v870_v56, %v646_v12 }
 0x13c   :  { %v1678_v40 = vcombine.low %v900_v45, %v902_v23 }
 0x13e   :  { %v388_v13 = vpop.permute.xlu1 %387  ;;  %1783 = vmatmul.mubr.msk.bf16.gmra.mrb[8].mxu0 %vm970_vm15, %v1678_v40  ;;  %v446_v50 = vpop.permute.xlu0 %445 }
 0x13f   :  { %v683_v10 = vsel %vm653_vm7, %v2462_v7, %v388_v13  ;;  %v712_v16 = vsel %vm684_vm8, %v681_v22, %v446_v50  ;;  %v708_v7 = vsel %vm684_vm8, %v677_v60, %v442_v31 }
 0x142   :  { %v444_v49 = vpop.permute.xlu1 %443  ;;  %v476_v19 = vpop.permute.xlu0 %475 }
 0x143   :  { %v710_v11 = vsel %vm684_vm8, %v679_v21, %v444_v49  ;;  %v741_v32 = vsel %vm715_vm9, %v708_v7, %v476_v19  ;;  %v2753_v21 = vld [vmem:[%s2991_s0 + $0x1c] sm:$0xf]  ;;  %v2765_v7 = vld [vmem:[%s2991_s0 + $0x14] sm:$0xf] }
 0x146   :  { %v448_v2 = vpop.permute.xlu1 %447  ;;  %v480_v33 = vpop.permute.xlu0 %479 }
 0x147   :  { %v714_v14 = vsel %vm684_vm8, %v683_v10, %v448_v2  ;;  %v745_v0 = vsel %vm715_vm9, %v712_v16, %v480_v33 }
 0x14a   :  { %v478_v54 = vpop.permute.xlu1 %477  ;;  %v522_v35 = vpop.permute.xlu0 %521 }
 0x14b   :  { %v743_v3 = vsel %vm715_vm9, %v710_v11, %v478_v54  ;;  %v774_v36 = vsel %vm748_vm10, %v741_v32, %v522_v35  ;;  %v2715_v54 = vld [vmem:[%s2991_s0 + $0xc] sm:$0xf]  ;;  %v1103_v11 = vunpack.c.l.bf16 %v2765_v7 }
 0x14e   :  { %v482_v20 = vpop.permute.xlu1 %481  ;;  %v526_v30 = vpop.permute.xlu0 %525 }
 0x14f   :  { %v747_v51 = vsel %vm715_vm9, %v714_v14, %v482_v20  ;;  %v778_v27 = vsel %vm748_vm10, %v745_v0, %v526_v30  ;;  %v2721_v20 = vld [vmem:[%s2991_s0] sm:$0xf] }
 0x150   :  { %v1098_v30 = vunpack.c.l.bf16 %v2721_v20 }
 0x152   :  { %v524_v46 = vpop.permute.xlu1 %523  ;;  %v556_v57 = vpop.permute.xlu0 %555 }
 0x153   :  { %v776_v55 = vsel %vm748_vm10, %v743_v3, %v524_v46  ;;  %v807_v34 = vsel %vm781_vm11, %v774_v36, %v556_v57  ;;  %v2727_v46 = vld [vmem:[%s2991_s0 + $0x4] sm:$0xf] }
 0x154   :  { %v1099_v57 = vunpack.c.l.bf16 %v2727_v46 }
 0x156   :  { %v528_v17 = vpop.permute.xlu1 %527  ;;  %v560_v44 = vpop.permute.xlu0 %559 }
 0x157   :  { %v780_v6 = vsel %vm748_vm10, %v747_v51, %v528_v17  ;;  %v811_v63 = vsel %vm781_vm11, %v778_v27, %v560_v44  ;;  %v2747_v51 = vld [vmem:[%s2991_s0 + $0x18] sm:$0xf] }
 0x158   :  { %v1104_v60 = vunpack.c.l.bf16 %v2747_v51 }
 0x15a   :  { %v558_v48 = vpop.permute.xlu1 %557  ;;  %v588_v1 = vpop.permute.xlu0 %587 }
 0x15b   :  { %v809_v38 = vsel %vm781_vm11, %v776_v55, %v558_v48  ;;  %v840_v8 = vsel %vm814_vm12, %v807_v34, %v588_v1  ;;  %v1097_v48 = vld [vmem:[%s2993_s2 + $0x4] sm:$0xf] }
 0x15c   :  { %v1708_v14 = vcombine.low %v2622_v42, %v1097_v48  ;;  %v1105_v42 = vunpack.c.l.bf16 %v2753_v21  ;;  %v1901_v34 = vld [vmem:[%s2994_s5] sm:$0xff]  }
 0x15d   :  { %1826 = vmatprep.subr.bf16.mxu0 %v1901_v34 }
 0x15e   :  { %v562_v41 = vpop.permute.xlu1 %561  ;;  %v592_v59 = vpop.permute.xlu0 %591  ;;  %1808 = vmatprep.subr.bf16.mxu1 %v1708_v14  ;;  %1827 = vmatpush3.bf16.msra.mxu0 %v1901_v34  ;;  %v2848_v34 = vld [vmem:[%s2995_s3] ss:$0 sm:$0xff] }
 0x15f   :  { %v813_v25 = vsel %vm781_vm11, %v780_v6, %v562_v41  ;;  %v844_v24 = vsel %vm814_vm12, %v811_v63, %v592_v59  ;;  %v2759_v6 = vld [vmem:[%s2991_s0 + $0x10] sm:$0xf] }
 0x160   :  { %v845_v9 = vsel %vm814_vm12, %v813_v25, %v2547_v53 }
 0x161   :  { %v877_v23 = vsel %vm846_vm13, %v845_v9, %v2566_v43  ;;  %v2709_v43 = vld [vmem:[%s2991_s0 + $0x8] sm:$0xf]  ;;  %v1108_v9 = vunpack.c.l.bf16 %v2162_v58 }
 0x162   :  { %v590_v52 = vpop.permute.xlu1 %589  ;;  %v620_v47 = vpop.permute.xlu0 %619  ;;  %v909_v49 = vsel %vm878_vm14, %v877_v23, %v2600_v29  ;;  %v1100_v33 = vunpack.c.l.bf16 %v2709_v43  ;;  %v1101_v29 = vunpack.c.l.bf16 %v2715_v54 }
 0x163   :  { %v842_v18 = vsel %vm814_vm12, %v809_v38, %v590_v52  ;;  %v1902_v38 = vld [vmem:[%s2994_s5 + $0x8] sm:$0xff]  }
 0x164   :  { %v874_v31 = vsel %vm846_vm13, %v842_v18, %v620_v47  ;;  %1828 = vmatprep.subr.bf16.mxu0 %v1902_v38 }
 0x165   :  { %1829 = vmatpush3.bf16.msra.mxu0 %v1902_v38 }
 0x166   :  { %v618_v4 = vpop.permute.xlu1 %617  ;;  %v648_v28 = vpop.permute.xlu0 %647 }
 0x167   :  { %v872_v45 = vsel %vm846_vm13, %v840_v8, %v618_v4  ;;  %v1102_v4 = vunpack.c.l.bf16 %v2759_v6  ;;  %v2789_v8 = vld [vmem:[%s2991_s0 + $0x20] sm:$0xf] }
 0x168   :  { %v904_v13 = vsel %vm878_vm14, %v872_v45, %v648_v28  ;;  %v1106_v18 = vunpack.c.l.bf16 %v2789_v8 }
 0x16a   :  { %v622_v26 = vpop.permute.xlu1 %621  ;;  %v652_v12 = vpop.permute.xlu0 %651 }
 0x16b   :  { %v876_v56 = vsel %vm846_vm13, %v844_v24, %v622_v26  ;;  %v1109_v24 = vunpack.c.l.bf16 %v2230_v37 }
 0x16c   :  { %v908_v40 = vsel %vm878_vm14, %v876_v56, %v652_v12  ;;  %v1107_v56 = vunpack.c.l.bf16 %v2170_v62 }
 0x16d   :  { %v1680_v2 = vcombine.low %v908_v40, %v909_v49 }
 0x16e   :  { %v650_v53 = vpop.permute.xlu1 %649 }
 0x16f   :  { %v906_v50 = vsel %vm878_vm14, %v874_v31, %v650_v53 }
 0x170   :  { %v1679_v19 = vcombine.low %v904_v13, %v906_v50 }
 0x172   :  { %1786 = vmatprep.mubr.msk.bf16.mxu0 %vm970_vm15, %v1679_v19  ;;  %v1112_v19 = vunpack.c.l.bf16 %v2341_v39 }
 0x173   :  { %1787 = vmatmul.mubr.msk.bf16.gmra.mrb[12].mxu0 %vm970_vm15, %v1680_v2  ;;  %v1113_v2 = vunpack.c.l.bf16 %v2481_v61 }
 0x195   :  { %v1776_v35 = vpop.f32.mrb[0].mxu0 }
 0x196   :  { %v1033_v17 = vpop.f32.mrb[1].mxu0  ;;  %v1116_v1 = vsub.f32 %v1776_v35, %v1100_v33 }
 0x197   :  { %v1777_v44 = vpop.f32.mrb[2].mxu0  ;;  %v1114_v52 = vsub.f32 %v1033_v17, %v1098_v30  ;;  %v1110_v17 = vunpack.c.l.bf16 %v2301_v5 }
 0x198   :  { %v1117_v41 = vsub.f32 %v1777_v44, %v1101_v29  ;;  %v1036_v59 = vpop.f32.mrb[3].mxu0  ;;  %v1111_v44 = vunpack.c.l.bf16 %v2319_v15 }
 0x199   :  { %v1115_v10 = vsub.f32 %v1036_v59, %v1099_v57 }
 0x19a   :  { %v1131_v47 = vpack.c.bf16 %v1117_v41, %v1116_v1 }
 0x19b   :  { %v1130_v22 = vpack.c.bf16 %v1115_v10, %v1114_v52 }
 0x19d   :  { %1792 = vmatprep.mubr.msk.bf16.mxu1 %vm653_vm7, %v1130_v22 }
 0x19e   :  { %1793 = vmatmul.mubr.msk.bf16.vlgmr.msra.gmra.mrb[0].mxu1 %vm653_vm7, %v1131_v47 }
 0x19f   :  { %1809 = vmatpush3.bf16.msra.mxu1 %v1708_v14 }
 0x1d1   :  { %v1780_v16 = vpop.f32.mrb[4].mxu0 }
 0x1d2   :  { %v1049_v0 = vpop.f32.mrb[5].mxu0  ;;  %v1120_v28 = vsub.f32 %v1780_v16, %v1104_v60  ;;  %v1700_v16 = vcombine.low %v2721_v20, %v2727_v46 }
 0x1d3   :  { %v1781_v25 = vpop.f32.mrb[6].mxu0  ;;  %v1118_v27 = vsub.f32 %v1049_v0, %v1102_v4  ;;  %v1701_v0 = vcombine.low %v2709_v43, %v2715_v54 }
 0x1d4   :  { %v1121_v32 = vsub.f32 %v1781_v25, %v1105_v42  ;;  %v1052_v3 = vpop.f32.mrb[7].mxu0  ;;  %v1702_v25 = vcombine.low %v2759_v6, %v2765_v7 }
 0x1d5   :  { %v1119_v36 = vsub.f32 %v1052_v3, %v1103_v11 }
 0x1d6   :  { %v1133_v55 = vpack.c.bf16 %v1121_v32, %v1120_v28  ;;  %v1703_v28 = vcombine.low %v2747_v51, %v2753_v21  ;;  %v1912_v32 = vld [vmem:[%s2991_s0 + $0x24] sm:$0xf] }
 0x1d7   :  { %v1132_v63 = vpack.c.bf16 %v1119_v36, %v1118_v27  ;;  %v1704_v3 = vcombine.low %v2789_v8, %v1912_v32  ;;  %v1913_v27 = vld [vmem:[%s2991_s0 + $0x28] sm:$0xf] }
 0x1d8   :  { %v1705_v36 = vcombine.low %v1913_v27, %v2230_v37 }
 0x1d9   :  { %1796 = vmatprep.mubr.msk.bf16.mxu1 %vm653_vm7, %v1132_v63  ;;  %v1707_v63 = vcombine.low %v2341_v39, %v2481_v61 }
 0x1da   :  { %1797 = vmatmul.mubr.msk.bf16.gmra.mrb[4].mxu1 %vm653_vm7, %v1133_v55  ;;  %v1706_v55 = vcombine.low %v2301_v5, %v2319_v15 }
 0x211   :  { %v1784_v26 = vpop.f32.mrb[8].mxu0 }
 0x212   :  { %v1065_v12 = vpop.f32.mrb[9].mxu0  ;;  %v1124_v23 = vsub.f32 %v1784_v26, %v1108_v9  ;;  %v2853_v26 = vld [vmem:[%s2996_s4] ss:$0 sm:$0xff] }
 0x213   :  { %v1785_v45 = vpop.f32.mrb[10].mxu0  ;;  %v1122_v53 = vsub.f32 %v1065_v12, %v1106_v18 }
 0x214   :  { %v1125_v31 = vsub.f32 %v1785_v45, %v1109_v24  ;;  %v1068_v40 = vpop.f32.mrb[11].mxu0 }
 0x215   :  { %v1123_v13 = vsub.f32 %v1068_v40, %v1107_v56 }
 0x216   :  { %v1135_v50 = vpack.c.bf16 %v1125_v31, %v1124_v23 }
 0x217   :  { %v1134_v49 = vpack.c.bf16 %v1123_v13, %v1122_v53 }
 0x219   :  { %1800 = vmatprep.mubr.msk.bf16.mxu1 %vm653_vm7, %v1134_v49 }
 0x21a   :  { %1801 = vmatmul.mubr.msk.bf16.gmra.mrb[8].mxu1 %vm653_vm7, %v1135_v50 }
 0x246   :  { %v1788_v35 = vpop.f32.mrb[12].mxu0 }
 0x247   :  { %v1081_v48 = vpop.f32.mrb[13].mxu0  ;;  %v1128_v41 = vsub.f32 %v1788_v35, %v1112_v19 }
 0x248   :  { %v1789_v1 = vpop.f32.mrb[14].mxu0  ;;  %v1126_v10 = vsub.f32 %v1081_v48, %v1110_v17 }
 0x249   :  { %v1129_v59 = vsub.f32 %v1789_v1, %v1113_v2  ;;  %v1084_v52 = vpop.f32.mrb[15].mxu0 }
 0x24a   :  { %v1127_v47 = vsub.f32 %v1084_v52, %v1111_v44 }
 0x24b   :  { %v1137_v14 = vpack.c.bf16 %v1129_v59, %v1128_v41 }
 0x24c   :  { %v1136_v22 = vpack.c.bf16 %v1127_v47, %v1126_v10 }
 0x24e   :  { %1804 = vmatprep.mubr.msk.bf16.mxu1 %vm653_vm7, %v1136_v22 }
 0x24f   :  { %1805 = vmatmul.mubr.msk.bf16.gmra.mrb[12].mxu1 %vm653_vm7, %v1137_v14 }
 0x250   :  { %1810 = vmatprep.mubr.msk.bf16.mxu1 %vm748_vm10, %v1700_v16 }
 0x257   :  { %1811 = vmatmul.mubr.msk.bf16.vlgmr.msra.gmra.mrb[0].mxu1 %vm748_vm10, %v1701_v0 }
 0x258   :  { %1814 = vmatprep.mubr.msk.bf16.mxu1 %vm748_vm10, %v1702_v25 }
 0x25f   :  { %1815 = vmatmul.mubr.msk.bf16.gmra.mrb[4].mxu1 %vm748_vm10, %v1703_v28 }
 0x260   :  { %1818 = vmatprep.mubr.msk.bf16.mxu1 %vm748_vm10, %v1704_v3 }
 0x267   :  { %1819 = vmatmul.mubr.msk.bf16.gmra.mrb[8].mxu1 %vm748_vm10, %v1705_v36 }
 0x268   :  { %1822 = vmatprep.mubr.msk.bf16.mxu1 %vm748_vm10, %v1706_v55 }
 0x26f   :  { %1823 = vmatmul.mubr.msk.bf16.gmra.mrb[12].mxu1 %vm748_vm10, %v1707_v63 }
 0x32a   :  { %v1812_v38 = vpop.f32.mrb[0].mxu1 }
 0x32b   :  { %v1406_v12 = vmul.f32 %v1812_v38, %v2848_v34  ;;  %v1334_v45 = vpop.f32.mrb[1].mxu1 }
 0x32c   :  { %v1404_v23 = vmul.f32 %v2848_v34, %v1334_v45  ;;  %v1813_v31 = vpop.f32.mrb[2].mxu1 }
 0x32d   :  { %v1429_v40 = vadd.f32 %v2853_v26, %v1406_v12  ;;  %v1407_v53 = vmul.f32 %v1813_v31, %v2848_v34  ;;  %v1337_v13 = vpop.f32.mrb[3].mxu1 }
 0x32e   :  { %v1427_v50 = vadd.f32 %v2853_v26, %v1404_v23  ;;  %v1405_v49 = vmul.f32 %v2848_v34, %v1337_v13 }
 0x32f   :  { %v1430_v35 = vadd.f32 %v2853_v26, %v1407_v53  ;;  %v1445_v1 = vmax.f32 %v1429_v40, 0.0 }
 0x330   :  { %v1428_v48 = vadd.f32 %v2853_v26, %v1405_v49  ;;  %v1443_v59 = vmax.f32 %v1427_v50, 0.0 }
 0x331   :  { %v1446_v41 = vmax.f32 %v1430_v35, 0.0 }
 0x332   :  { %v1444_v52 = vmax.f32 %v1428_v48, 0.0  ;;  %v1816_v10 = vpop.f32.mrb[4].mxu1 }
 0x333   :  { %v1460_v47 = vpack.c.bf16 %v1446_v41, %v1445_v1  ;;  %v1410_v14 = vmul.f32 %v1816_v10, %v2848_v34  ;;  %v1350_v22 = vpop.f32.mrb[5].mxu1 }
 0x334   :  { %v1459_v16 = vpack.c.bf16 %v1444_v52, %v1443_v59  ;;  %v1408_v0 = vmul.f32 %v2848_v34, %v1350_v22  ;;  %v1817_v25 = vpop.f32.mrb[6].mxu1 }
 0x335   :  { %v1433_v28 = vadd.f32 %v2853_v26, %v1410_v14  ;;  %v1411_v32 = vmul.f32 %v1817_v25, %v2848_v34  ;;  %v1353_v3 = vpop.f32.mrb[7].mxu1 }
 0x336   :  { %v1431_v27 = vadd.f32 %v2853_v26, %v1408_v0  ;;  %v1409_v36 = vmul.f32 %v2848_v34, %v1353_v3  ;;  %1830 = vmatprep.mubr.msk.bf16.mxu0 %vm878_vm14, %v1459_v16 }
 0x337   :  { %v1434_v55 = vadd.f32 %v2853_v26, %v1411_v32  ;;  %1831 = vmatmul.mubr.msk.bf16.vlgmr.msra.gmra.mrb[16].mxu0 %vm878_vm14, %v1460_v47  ;;  %v1449_v38 = vmax.f32 %v1433_v28, 0.0 }
 0x338   :  { %v1432_v63 = vadd.f32 %v2853_v26, %v1409_v36  ;;  %v1447_v45 = vmax.f32 %v1431_v27, 0.0 }
 0x339   :  { %v1450_v12 = vmax.f32 %v1434_v55, 0.0 }
 0x33a   :  { %v1448_v23 = vmax.f32 %v1432_v63, 0.0  ;;  %v1820_v31 = vpop.f32.mrb[8].mxu1 }
 0x33b   :  { %v1462_v40 = vpack.c.bf16 %v1450_v12, %v1449_v38  ;;  %v1414_v53 = vmul.f32 %v1820_v31, %v2848_v34  ;;  %v1366_v13 = vpop.f32.mrb[9].mxu1 }
 0x33c   :  { %v1461_v50 = vpack.c.bf16 %v1448_v23, %v1447_v45  ;;  %v1412_v49 = vmul.f32 %v2848_v34, %v1366_v13  ;;  %v1821_v35 = vpop.f32.mrb[10].mxu1 }
 0x33d   :  { %v1437_v48 = vadd.f32 %v2853_v26, %v1414_v53  ;;  %v1415_v1 = vmul.f32 %v1821_v35, %v2848_v34  ;;  %v1369_v41 = vpop.f32.mrb[11].mxu1 }
 0x33e   :  { %v1435_v59 = vadd.f32 %v2853_v26, %v1412_v49  ;;  %v1413_v52 = vmul.f32 %v2848_v34, %v1369_v41  ;;  %1834 = vmatprep.mubr.msk.bf16.mxu0 %vm878_vm14, %v1461_v50 }
 0x33f   :  { %v1438_v10 = vadd.f32 %v2853_v26, %v1415_v1  ;;  %1835 = vmatmul.mubr.msk.bf16.gmra.mrb[20].mxu0 %vm878_vm14, %v1462_v40  ;;  %v1453_v14 = vmax.f32 %v1437_v48, 0.0 }
 0x340   :  { %v1436_v47 = vadd.f32 %v2853_v26, %v1413_v52  ;;  %v1451_v16 = vmax.f32 %v1435_v59, 0.0 }
 0x341   :  { %v1454_v22 = vmax.f32 %v1438_v10, 0.0 }
 0x342   :  { %v1452_v0 = vmax.f32 %v1436_v47, 0.0  ;;  %v1824_v25 = vpop.f32.mrb[12].mxu1 }
 0x343   :  { %v1464_v28 = vpack.c.bf16 %v1454_v22, %v1453_v14  ;;  %v1418_v32 = vmul.f32 %v1824_v25, %v2848_v34  ;;  %v1382_v3 = vpop.f32.mrb[13].mxu1 }
 0x344   :  { %v1463_v27 = vpack.c.bf16 %v1452_v0, %v1451_v16  ;;  %v1416_v36 = vmul.f32 %v2848_v34, %v1382_v3  ;;  %v1825_v55 = vpop.f32.mrb[14].mxu1 }
 0x345   :  { %v1441_v63 = vadd.f32 %v2853_v26, %v1418_v32  ;;  %v1419_v38 = vmul.f32 %v1825_v55, %v2848_v34  ;;  %v1385_v12 = vpop.f32.mrb[15].mxu1 }
 0x346   :  { %v1439_v45 = vadd.f32 %v2853_v26, %v1416_v36  ;;  %v1417_v23 = vmul.f32 %v2848_v34, %v1385_v12  ;;  %1838 = vmatprep.mubr.msk.bf16.mxu0 %vm878_vm14, %v1463_v27 }
 0x347   :  { %v1442_v31 = vadd.f32 %v2853_v26, %v1419_v38  ;;  %1839 = vmatmul.mubr.msk.bf16.gmra.mrb[24].mxu0 %vm878_vm14, %v1464_v28  ;;  %v1457_v53 = vmax.f32 %v1441_v63, 0.0 }
 0x348   :  { %v1440_v40 = vadd.f32 %v2853_v26, %v1417_v23  ;;  %v1455_v50 = vmax.f32 %v1439_v45, 0.0 }
 0x349   :  { %v1458_v13 = vmax.f32 %v1442_v31, 0.0 }
 0x34a   :  { %v1456_v49 = vmax.f32 %v1440_v40, 0.0 }
 0x34b   :  { %v1466_v35 = vpack.c.bf16 %v1458_v13, %v1457_v53 }
 0x34c   :  { %v1465_v48 = vpack.c.bf16 %v1456_v49, %v1455_v50 }
 0x34e   :  { %1842 = vmatprep.mubr.msk.bf16.mxu0 %vm878_vm14, %v1465_v48 }
 0x34f   :  { %1843 = vmatmul.mubr.msk.bf16.gmra.mrb[28].mxu0 %vm878_vm14, %v1466_v35 }
 0x40a   :  { %v1832_v1 = vpop.f32.mrb[16].mxu0 }
 0x40b   :  { %v1606_v34 = vadd.f32 %v1832_v1, %v1100_v33  ;;  %v1541_v41 = vpop.f32.mrb[17].mxu0 }
 0x40c   :  { %v1604_v59 = vadd.f32 %v1541_v41, %v1098_v30  ;;  %v1833_v26 = vpop.f32.mrb[18].mxu0 }
 0x40d   :  { %v1622_v52 = vpack.c.bf16 %v1606_v34, %v1606_v34  ;;  %v1607_v10 = vadd.f32 %v1833_v26, %v1101_v29  ;;  %v1544_v47 = vpop.f32.mrb[19].mxu0 }
 0x40e   :  { %v1620_v14 = vpack.c.bf16 %v1604_v59, %v1604_v59  ;;  %v1605_v22 = vadd.f32 %v1544_v47, %v1099_v57 }
 0x40f   :  { %1639 = vst.msk [vmem:[%s2997_s6 + $0x8] sm:$0xf] %vm1636_vm0, %v1622_v52  ;;  %v1623_v43 = vpack.c.bf16 %v1607_v10, %v1607_v10 }
 0x410   :  { %1637 = vst.msk [vmem:[%s2997_s6] sm:$0xf] %vm1636_vm0, %v1620_v14  ;;  %v1621_v33 = vpack.c.bf16 %v1605_v22, %v1605_v22 }
 0x411   :  { %1640 = vst.msk [vmem:[%s2997_s6 + $0xc] sm:$0xf] %vm1636_vm0, %v1623_v43 }
 0x412   :  { %1638 = vst.msk [vmem:[%s2997_s6 + $0x4] sm:$0xf] %vm1636_vm0, %v1621_v33  ;;  %v1836_v54 = vpop.f32.mrb[20].mxu0 }
 0x413   :  { %v1610_v29 = vadd.f32 %v1836_v54, %v1104_v60  ;;  %v1557_v20 = vpop.f32.mrb[21].mxu0 }
 0x414   :  { %v1608_v30 = vadd.f32 %v1557_v20, %v1102_v4  ;;  %v1837_v46 = vpop.f32.mrb[22].mxu0 }
 0x415   :  { %v1626_v57 = vpack.c.bf16 %v1610_v29, %v1610_v29  ;;  %v1611_v16 = vadd.f32 %v1837_v46, %v1105_v42  ;;  %v1560_v0 = vpop.f32.mrb[23].mxu0 }
 0x416   :  { %v1624_v25 = vpack.c.bf16 %v1608_v30, %v1608_v30  ;;  %v1609_v28 = vadd.f32 %v1560_v0, %v1103_v11 }
 0x417   :  { %1643 = vst.msk [vmem:[%s2997_s6 + $0x18] sm:$0xf] %vm1636_vm0, %v1626_v57  ;;  %v1627_v51 = vpack.c.bf16 %v1611_v16, %v1611_v16 }
 0x418   :  { %1641 = vst.msk [vmem:[%s2997_s6 + $0x10] sm:$0xf] %vm1636_vm0, %v1624_v25  ;;  %v1625_v60 = vpack.c.bf16 %v1609_v28, %v1609_v28 }
 0x419   :  { %1644 = vst.msk [vmem:[%s2997_s6 + $0x1c] sm:$0xf] %vm1636_vm0, %v1627_v51 }
 0x41a   :  { %1642 = vst.msk [vmem:[%s2997_s6 + $0x14] sm:$0xf] %vm1636_vm0, %v1625_v60  ;;  %v1840_v21 = vpop.f32.mrb[24].mxu0 }
 0x41b   :  { %v1614_v42 = vadd.f32 %v1840_v21, %v1108_v9  ;;  %v1573_v6 = vpop.f32.mrb[25].mxu0 }
 0x41c   :  { %v1612_v4 = vadd.f32 %v1573_v6, %v1106_v18  ;;  %v1841_v7 = vpop.f32.mrb[26].mxu0 }
 0x41d   :  { %v1630_v11 = vpack.c.bf16 %v1614_v42, %v1614_v42  ;;  %v1615_v32 = vadd.f32 %v1841_v7, %v1109_v24  ;;  %v1576_v3 = vpop.f32.mrb[27].mxu0 }
 0x41e   :  { %v1628_v27 = vpack.c.bf16 %v1612_v4, %v1612_v4  ;;  %v1613_v36 = vadd.f32 %v1576_v3, %v1107_v56 }
 0x41f   :  { %1647 = vst.msk [vmem:[%s2997_s6 + $0x28] sm:$0xf] %vm1636_vm0, %v1630_v11  ;;  %v1631_v58 = vpack.c.bf16 %v1615_v32, %v1615_v32 }
 0x420   :  { %1645 = vst.msk [vmem:[%s2997_s6 + $0x20] sm:$0xf] %vm1636_vm0, %v1628_v27  ;;  %v1629_v9 = vpack.c.bf16 %v1613_v36, %v1613_v36 }
 0x421   :  { %1648 = vst.msk [vmem:[%s2997_s6 + $0x2c] sm:$0xf] %vm1636_vm0, %v1631_v58 }
 0x422   :  { %1646 = vst.msk [vmem:[%s2997_s6 + $0x24] sm:$0xf] %vm1636_vm0, %v1629_v9  ;;  %v1844_v62 = vpop.f32.mrb[28].mxu0 }
 0x423   :  { %v1618_v37 = vadd.f32 %v1844_v62, %v1112_v19  ;;  %v1589_v24 = vpop.f32.mrb[29].mxu0 }
 0x424   :  { %v1616_v8 = vadd.f32 %v1589_v24, %v1110_v17  ;;  %v1845_v18 = vpop.f32.mrb[30].mxu0 }
 0x425   :  { %v1634_v56 = vpack.c.bf16 %v1618_v37, %v1618_v37  ;;  %v1619_v55 = vadd.f32 %v1845_v18, %v1113_v2  ;;  %v1592_v63 = vpop.f32.mrb[31].mxu0 }
 0x426   :  { %v1632_v38 = vpack.c.bf16 %v1616_v8, %v1616_v8  ;;  %v1617_v12 = vadd.f32 %v1592_v63, %v1111_v44 }
 0x427   :  { %1651 = vst.msk [vmem:[%s2997_s6 + $0x38] sm:$0xf] %vm1636_vm0, %v1634_v56  ;;  %v1635_v39 = vpack.c.bf16 %v1619_v55, %v1619_v55 }
 0x428   :  { %1649 = vst.msk [vmem:[%s2997_s6 + $0x30] sm:$0xf] %vm1636_vm0, %v1632_v38  ;;  %v1633_v5 = vpack.c.bf16 %v1617_v12, %v1617_v12 }
 0x429   :  { %1652 = vst.msk [vmem:[%s2997_s6 + $0x3c] sm:$0xf] %vm1636_vm0, %v1635_v39 }
 0x42a   :  { %1650 = vst.msk [vmem:[%s2997_s6 + $0x34] sm:$0xf] %vm1636_vm0, %v1633_v5 }

// kernel: fasternet_forward.8
= control target key start
LH: loop header
LB: loop body
LE: loop exit
PB: predicated region body
PF: predicated region fallthrough
CT: control target
= control target key end

     0   :  { %v43_v0 = vlaneseq  ;;  %v1105_v1 = vmov 0   ;;  %v1106_v3 = vmov 1983009808   ;;  %s1107_s21 = smov 16   ;;  %s1108_s22 = smov 8   ;;  %vm160_vm0 = vcmask 1040384   ;;  %s1614_s0 = inlined_call_operand.vmem [shape: bf16[2,4,4,32], index: 0, kind: input, shape index: {}]   ;;  %s1615_s1 = inlined_call_operand.vmem [shape: bf16[72,8], index: 1, kind: input, shape index: {}]   ;;  %s1616_s2 = inlined_call_operand.vmem [shape: bf16[32,64], index: 2, kind: input, shape index: {}]   ;;  %s1617_s5 = inlined_call_operand.vmem [shape: bf16[64,32], index: 5, kind: input, shape index: {}]   ;;  %s1618_s3 = inlined_call_operand.vmem [shape: f32[1,64], index: 3, kind: input, shape index: {}]   ;;  %s1619_s4 = inlined_call_operand.vmem [shape: f32[1,64], index: 4, kind: input, shape index: {}]   ;;  %s1620_s6 = inlined_call_operand.vmem [shape: bf16[2,4,4,32], index: 6, kind: output, shape index: {}]  }
   0x1   :  { %v1151_v2 = vrot.slane %v1105_v1, 1  ;;  %v41_v4 = vunpack.c.l.s4 %v1106_v3  ;;  %v1160_v6 = vld [vmem:[%s1614_s0 + $0x2] sm:$0x3]  ;;  %v1165_v8 = vld [vmem:[%s1614_s0] sm:$0x3]  ;;  %vm171_vm2 = vcmask 1042432  }
   0x2   :  { %v44_v5 = vshrl.u32 %v43_v0, 7  ;;  %v1170_v9 = vld [vmem:[%s1614_s0 + $0x8] sm:$0x3]  ;;  %v1175_v10 = vld [vmem:[%s1614_s0 + $0x4] sm:$0x3]  ;;  %s1110_s15 = smov 32  }
   0x3   :  { %259 = vrot.lane.b32.xlu1 %v1151_v2, %s1107_s21  ;;  %231 = vrot.lane.b32.xlu0 %v1151_v2, %s1108_s22  ;;  %v42_v7 = vunpack.c.0.s8 %v41_v4  ;;  %v1182_v12 = vld [vmem:[%s1614_s0 + $0xa] sm:$0x3]  ;;  %v1187_v13 = vld [vmem:[%s1614_s0 + $0xc] sm:$0x3]  ;;  %vm161_vm1 = vsmask.f32 256 }
   0x4   :  { %vm172_vm3 = vsmask.f32 2304  ;;  %vm1203_vm4 = vmand %vm160_vm0, %vm161_vm1  ;;  %s1111_s16 = smov 40   ;;  %s1112_s17 = smov 48   ;;  %vm381_vm6 = vcmask 64512   ;;  %vm396_vm7 = vcmask 130048  }
   0x5   :  { %v1177_v11 = vsub.s32 %v42_v7, %v44_v5  ;;  %vm1209_vm5 = vmand %vm171_vm2, %vm172_vm3  ;;  %s1113_s18 = smov 56   ;;  %s1114_s27 = smov 64   ;;  %vm595_vm8 = vcmask 1043456   ;;  %vm411_vm9 = vcmask 195584   ;;  %vm428_vm10 = vcmask 261120  }
   0x6   :  { %vm445_vm11 = vcmask 326656   ;;  %vm462_vm12 = vcmask 392192   ;;  %vm478_vm13 = vcmask 457728   ;;  %vm494_vm14 = vcmask 523264  }
   0x7   :  { %v53_v14 = vrot.slane %v1160_v6, %v1177_v11  ;;  %v46_v15 = vrot.slane %v1165_v8, %v1177_v11  ;;  %v74_v16 = vrot.slane %v1170_v9, %v1177_v11  ;;  %v60_v17 = vrot.slane %v1175_v10, %v1177_v11 }
   0x8   :  { %v81_v18 = vrot.slane %v1182_v12, %v1177_v11  ;;  %v88_v19 = vrot.slane %v1187_v13, %v1177_v11  ;;  %vm588_vm15 = vcmask 588800   ;;  %vm984_vm0 = vcmask 254976  }
   0x9   :  { %v104_v20 = vshrl.u32 %v53_v14, 16  ;;  %v107_v21 = vshll.u32 %v53_v14, 16  ;;  %v97_v22 = vshrl.u32 %v46_v15, 16  ;;  %v100_v23 = vshll.u32 %v46_v15, 16 }
   0xa   :  { %v125_v24 = vshrl.u32 %v74_v16, 16  ;;  %v128_v25 = vshll.u32 %v74_v16, 16  ;;  %v111_v26 = vshrl.u32 %v60_v17, 16  ;;  %v114_v27 = vshll.u32 %v60_v17, 16  ;;  %v1269_v17 = vld [vmem:[%s1614_s0 + $0x6] sm:$0x3] }
   0xb   :  { %v106_v28 = vrot.slane %v104_v20, 7  ;;  %v99_v29 = vrot.slane %v97_v22, 7  ;;  %v132_v30 = vshrl.u32 %v81_v18, 16  ;;  %v135_v31 = vshll.u32 %v81_v18, 16 }
   0xc   :  { %v127_v33 = vrot.slane %v125_v24, 7  ;;  %v113_v34 = vrot.slane %v111_v26, 7  ;;  %v139_v35 = vshrl.u32 %v88_v19, 16  ;;  %v142_v42 = vshll.u32 %v88_v19, 16 }
   0xd   :  { %v109_v36 = vor.u32 %v107_v21, %v106_v28  ;;  %v102_v38 = vor.u32 %v100_v23, %v99_v29  ;;  %v134_v39 = vrot.slane %v132_v30, 7  ;;  %v67_v24 = vrot.slane %v1269_v17, %v1177_v11 }
   0xe   :  { %v130_v40 = vor.u32 %v128_v25, %v127_v33  ;;  %v116_v41 = vor.u32 %v114_v27, %v113_v34  ;;  %v141_v46 = vrot.slane %v139_v35, 7  ;;  %v1296_v33 = vld [vmem:[%s1614_s0 + $0xe] sm:$0x3]  ;;  %s1109_s0 = smov 24  }
   0xf   :  { %v164_v43 = vsel %vm1203_vm4, 0, %v109_v36  ;;  %v163_v44 = vsel %vm1203_vm4, 0, %v102_v38  ;;  %v137_v45 = vor.u32 %v135_v31, %v134_v39  ;;  %v118_v31 = vshrl.u32 %v67_v24, 16 }
  0x10   :  { %v1219_v47 = vsel %vm1209_vm5, %v164_v43, 0  ;;  %v1223_v48 = vsel %vm1209_vm5, %v163_v44, 0  ;;  %v167_v49 = vsel %vm1203_vm4, 0, %v130_v40  ;;  %v165_v50 = vsel %vm1203_vm4, 0, %v116_v41 }
  0x11   :  { %v1230_v51 = vrot.slane %v1219_v47, 1  ;;  %v253_v52 = vrot.slane %v1223_v48, 1  ;;  %v1235_v53 = vsel %vm1209_vm5, %v167_v49, 0  ;;  %v1239_v54 = vsel %vm1209_vm5, %v165_v50, 0 }
  0x12   :  { %v256_v55 = vrot.slane %v1235_v53, 1  ;;  %v197_v56 = vshrl.u32 %v1219_v47, 16  ;;  %v199_v57 = vshll.u32 %v1219_v47, 16  ;;  %v1250_v58 = vrot.slane %v1239_v54, 1 }
  0x13   :  { %263 = vrot.lane.b32.xlu1 %v1230_v51, %s1107_s21  ;;  %261 = vrot.lane.b32.xlu0 %v253_v52, %s1107_s21  ;;  %v190_v59 = vshrl.u32 %v1223_v48, 16  ;;  %v192_v60 = vshll.u32 %v1223_v48, 16  ;;  %v206_v61 = vshll.u32 %v1239_v54, 16  ;;  %v213_v63 = vshll.u32 %v1235_v53, 16 }
  0x14   :  { %v201_v62 = vrot.slane %v199_v57, 1  ;;  %v168_v0 = vsel %vm1203_vm4, 0, %v137_v45  ;;  %v144_v5 = vor.u32 %v142_v42, %v141_v46  ;;  %v204_v14 = vshrl.u32 %v1239_v54, 16 }
  0x15   :  { %v194_v3 = vrot.slane %v192_v60, 1  ;;  %v1260_v4 = vsel %vm1209_vm5, %v168_v0, 0  ;;  %v208_v15 = vrot.slane %v206_v61, 1  ;;  %v211_v16 = vshrl.u32 %v1235_v53, 16 }
  0x16   :  { %v1262_v7 = vor.u32 %v201_v62, %v197_v56  ;;  %v215_v19 = vrot.slane %v213_v63, 1  ;;  %v220_v20 = vshll.u32 %v1260_v4, 16  ;;  %v169_v21 = vsel %vm1203_vm4, 0, %v144_v5 }
  0x17   :  { %267 = vrot.lane.b32.xlu1 %v256_v55, %s1107_s21  ;;  %265 = vrot.lane.b32.xlu0 %v1250_v58, %s1107_s21  ;;  %v195_v18 = vor.u32 %v194_v3, %v190_v59  ;;  %v1281_v22 = vsel %vm1209_vm5, %v169_v21, 0  ;;  %v1286_v25 = vor.u32 %v208_v15, %v204_v14  ;;  %v218_v26 = vshrl.u32 %v1260_v4, 16 }
  0x18   :  { %v227_v23 = vshll.u32 %v1281_v22, 16  ;;  %v216_v27 = vor.u32 %v215_v19, %v211_v16  ;;  %v222_v28 = vrot.slane %v220_v20, 1  ;;  %v225_v29 = vshrl.u32 %v1281_v22, 16  ;;  %v1098_v19 = vld [vmem:[%s1615_s1 + $0x20] ss:$0 sps:$4 sm:$0xff]  }
  0x19   :  { %v120_v36 = vrot.slane %v118_v31, 7  ;;  %v121_v38 = vshll.u32 %v67_v24, 16  ;;  %v95_v39 = vrot.slane %v1296_v33, %v1177_v11  ;;  %v1312_v40 = vrot.slane %v1281_v22, 1 }
  0x1a   :  { %v229_v30 = vrot.slane %v227_v23, 1  ;;  %v1301_v34 = vor.u32 %v222_v28, %v218_v26  ;;  %v1315_v41 = vrot.slane %v1260_v4, 1  ;;  %v597_v20 = vsel %vm595_vm8, %v1098_v19, 0 }
  0x1b   :  { %235 = vrot.lane.b32.xlu1 %v1262_v7, %s1108_s22  ;;  %233 = vrot.lane.b32.xlu0 %v195_v18, %s1108_s22  ;;  %v123_v42 = vor.u32 %v121_v38, %v120_v36  ;;  %v146_v43 = vshrl.u32 %v95_v39, 16  ;;  %v149_v46 = vshll.u32 %v95_v39, 16 }
  0x1c   :  { %v1303_v35 = vor.u32 %v229_v30, %v225_v29 }
  0x1d   :  { %v166_v44 = vsel %vm1203_vm4, 0, %v123_v42  ;;  %v148_v45 = vrot.slane %v146_v43, 7 }
  0x1e   :  { %v1327_v49 = vsel %vm1209_vm5, %v166_v44, 0 }
  0x1f   :  { %237 = vrot.lane.b32.xlu1 %v1286_v25, %s1108_s22  ;;  %239 = vrot.lane.b32.xlu0 %v216_v27, %s1108_s22  ;;  %v151_v50 = vor.u32 %v149_v46, %v148_v45  ;;  %v294_v57 = vshll.u32 %v1327_v49, 16  ;;  %v292_v60 = vshrl.u32 %v1327_v49, 16  ;;  %v321_v3 = vrot.slane %v1327_v49, 1 }
  0x21   :  { %v170_v56 = vsel %vm1203_vm4, 0, %v151_v50  ;;  %v296_v61 = vrot.slane %v294_v57, 1 }
  0x22   :  { %v1338_v59 = vsel %vm1209_vm5, %v170_v56, 0 }
  0x23   :  { %241 = vrot.lane.b32.xlu1 %v1301_v34, %s1108_s22  ;;  %243 = vrot.lane.b32.xlu0 %v1303_v35, %s1108_s22  ;;  %v297_v32 = vor.u32 %v296_v61, %v292_v60  ;;  %v301_v62 = vshll.u32 %v1338_v59, 16  ;;  %v299_v37 = vshrl.u32 %v1338_v59, 16  ;;  %v322_v5 = vrot.slane %v1338_v59, 1 }
  0x25   :  { %v303_v63 = vrot.slane %v301_v62, 1 }
  0x27   :  { %271 = vrot.lane.b32.xlu1 %v1312_v40, %s1107_s21  ;;  %269 = vrot.lane.b32.xlu0 %v1315_v41, %s1107_s21  ;;  %v304_v0 = vor.u32 %v303_v63, %v299_v37 }
  0x2b   :  { %277 = vrot.lane.b32.xlu1 %v1219_v47, %s1109_s0  ;;  %275 = vrot.lane.b32.xlu0 %v1223_v48, %s1109_s0 }
  0x2f   :  { %281 = vrot.lane.b32.xlu1 %v1327_v49, %s1109_s0  ;;  %279 = vrot.lane.b32.xlu0 %v1239_v54, %s1109_s0 }
  0x33   :  { %285 = vrot.lane.b32.xlu1 %v1260_v4, %s1109_s0  ;;  %283 = vrot.lane.b32.xlu0 %v1235_v53, %s1109_s0 }
  0x37   :  { %289 = vrot.lane.b32.xlu1 %v1338_v59, %s1109_s0  ;;  %287 = vrot.lane.b32.xlu0 %v1281_v22, %s1109_s0 }
  0x3b   :  { %307 = vrot.lane.b32.xlu1 %v1262_v7, %s1110_s15  ;;  %305 = vrot.lane.b32.xlu0 %v195_v18, %s1110_s15 }
  0x3f   :  { %311 = vrot.lane.b32.xlu1 %v297_v32, %s1110_s15  ;;  %309 = vrot.lane.b32.xlu0 %v1286_v25, %s1110_s15 }
  0x43   :  { %315 = vrot.lane.b32.xlu1 %v1301_v34, %s1110_s15  ;;  %313 = vrot.lane.b32.xlu0 %v216_v27, %s1110_s15 }
  0x47   :  { %319 = vrot.lane.b32.xlu1 %v304_v0, %s1110_s15  ;;  %317 = vrot.lane.b32.xlu0 %v1303_v35, %s1110_s15 }
  0x4b   :  { %325 = vrot.lane.b32.xlu1 %v1230_v51, %s1111_s16  ;;  %323 = vrot.lane.b32.xlu0 %v253_v52, %s1111_s16  ;;  %v1094_v52 = vld [vmem:[%s1615_s1] sm:$0xff]  }
  0x4c   :  { %1038 = vmatprep.subr.bf16.mxu0 %v1094_v52 }
  0x4d   :  { %1039 = vmatpush3.bf16.msra.mxu0 %v1094_v52 }
  0x4f   :  { %329 = vrot.lane.b32.xlu1 %v321_v3, %s1111_s16  ;;  %327 = vrot.lane.b32.xlu0 %v1250_v58, %s1111_s16 }
  0x53   :  { %333 = vrot.lane.b32.xlu1 %v1315_v41, %s1111_s16  ;;  %331 = vrot.lane.b32.xlu0 %v256_v55, %s1111_s16  ;;  %v1096_v55 = vld [vmem:[%s1615_s1 + $0x10] sm:$0xff]  }
  0x57   :  { %337 = vrot.lane.b32.xlu1 %v322_v5, %s1111_s16  ;;  %335 = vrot.lane.b32.xlu0 %v1312_v40, %s1111_s16 }
  0x5b   :  { %341 = vrot.lane.b32.xlu1 %v1239_v54, %s1112_s17  ;;  %339 = vrot.lane.b32.xlu0 %v1219_v47, %s1112_s17 }
  0x5f   :  { %345 = vrot.lane.b32.xlu1 %v1105_v1, %s1112_s17  ;;  %343 = vrot.lane.b32.xlu0 %v1327_v49, %s1112_s17  ;;  %v1095_v1 = vld [vmem:[%s1615_s1 + $0x8] sm:$0xff]  }
  0x60   :  { %1040 = vmatprep.subr.bf16.mxu0 %v1095_v1 }
  0x61   :  { %1041 = vmatpush3.bf16.msra.mxu0 %v1095_v1 }
  0x62   :  { %1042 = vmatprep.subr.bf16.mxu0 %v1096_v55 }
  0x63   :  { %349 = vrot.lane.b32.xlu1 %v1281_v22, %s1112_s17  ;;  %347 = vrot.lane.b32.xlu0 %v1260_v4, %s1112_s17 }
  0x65   :  { %1043 = vmatpush3.bf16.msra.mxu0 %v1096_v55 }
  0x67   :  { %353 = vrot.lane.b32.xlu1 %v1262_v7, %s1113_s18  ;;  %351 = vrot.lane.b32.xlu0 %v1338_v59, %s1112_s17  ;;  %v1097_v7 = vld [vmem:[%s1615_s1 + $0x18] sm:$0xff]  }
  0x68   :  { %1044 = vmatprep.subr.bf16.mxu0 %v1097_v7 }
  0x69   :  { %1045 = vmatpush3.bf16.msra.mxu0 %v1097_v7 }
  0x6a   :  { %1082 = vmatprep.subr.msk.bf16.mxu0 %vm595_vm8, %v1098_v19 }
  0x6b   :  { %357 = vrot.lane.b32.xlu1 %v297_v32, %s1113_s18  ;;  %355 = vrot.lane.b32.xlu0 %v1286_v25, %s1113_s18 }
  0x6d   :  { %1047 = vmatpush3.bf16.msra.mxu0 %v597_v20 }
  0x6f   :  { %361 = vrot.lane.b32.xlu1 %v1301_v34, %s1113_s18  ;;  %359 = vrot.lane.b32.xlu0 %v1151_v2, %s1113_s18 }
  0x73   :  { %365 = vrot.lane.b32.xlu1 %v304_v0, %s1113_s18  ;;  %363 = vrot.lane.b32.xlu0 %v1303_v35, %s1113_s18 }
  0x75   :  { %v260_v14 = vpop.permute.xlu1 %259  ;;  %v232_v15 = vpop.permute.xlu0 %231 }
  0x76   :  { %v383_v16 = vsel %vm381_vm6, 0, %v232_v15 }
  0x77   :  { %369 = vrot.lane.b32.xlu1 %v1250_v58, %s1114_s27  ;;  %367 = vrot.lane.b32.xlu0 %v1230_v51, %s1114_s27  ;;  %v398_v18 = vsel %vm396_vm7, %v383_v16, %v260_v14 }
  0x7b   :  { %373 = vrot.lane.b32.xlu1 %v1151_v2, %s1114_s27  ;;  %371 = vrot.lane.b32.xlu0 %v321_v3, %s1114_s27 }
  0x7f   :  { %377 = vrot.lane.b32.xlu1 %v1312_v40, %s1114_s27  ;;  %375 = vrot.lane.b32.xlu0 %v1315_v41, %s1114_s27 }
  0x83   :  { %379 = vrot.lane.b32.xlu0 %v322_v5, %s1114_s27 }
  0x85   :  { %v264_v51 = vpop.permute.xlu1 %263  ;;  %v262_v58 = vpop.permute.xlu0 %261 }
  0x89   :  { %v268_v21 = vpop.permute.xlu1 %267  ;;  %v266_v23 = vpop.permute.xlu0 %265 }
  0x8d   :  { %v236_v24 = vpop.permute.xlu1 %235  ;;  %v234_v25 = vpop.permute.xlu0 %233 }
  0x8e   :  { %v387_v26 = vsel %vm381_vm6, %v1219_v47, %v236_v24  ;;  %v385_v27 = vsel %vm381_vm6, %v1223_v48, %v234_v25 }
  0x8f   :  { %v400_v2 = vsel %vm396_vm7, %v385_v27, %v262_v58  ;;  %v402_v28 = vsel %vm396_vm7, %v387_v26, %v264_v51 }
  0x91   :  { %v238_v29 = vpop.permute.xlu1 %237  ;;  %v240_v30 = vpop.permute.xlu0 %239 }
  0x92   :  { %v389_v31 = vsel %vm381_vm6, %v1239_v54, %v238_v29  ;;  %v391_v34 = vsel %vm381_vm6, %v1235_v53, %v240_v30 }
  0x93   :  { %v404_v35 = vsel %vm396_vm7, %v389_v31, %v266_v23  ;;  %v406_v36 = vsel %vm396_vm7, %v391_v34, %v268_v21 }
  0x95   :  { %v242_v47 = vpop.permute.xlu1 %241  ;;  %v244_v38 = vpop.permute.xlu0 %243 }
  0x96   :  { %v393_v48 = vsel %vm381_vm6, %v1260_v4, %v242_v47  ;;  %v395_v39 = vsel %vm381_vm6, %v1281_v22, %v244_v38 }
  0x99   :  { %v272_v40 = vpop.permute.xlu1 %271  ;;  %v270_v41 = vpop.permute.xlu0 %269 }
  0x9a   :  { %v410_v42 = vsel %vm396_vm7, %v395_v39, %v272_v40  ;;  %v408_v54 = vsel %vm396_vm7, %v393_v48, %v270_v41 }
  0x9d   :  { %v278_v53 = vpop.permute.xlu1 %277  ;;  %v276_v43 = vpop.permute.xlu0 %275 }
  0x9e   :  { %v415_v44 = vsel %vm411_vm9, %v400_v2, %v278_v53  ;;  %v413_v45 = vsel %vm411_vm9, %v398_v18, %v276_v43 }
  0xa1   :  { %v282_v46 = vpop.permute.xlu1 %281  ;;  %v280_v49 = vpop.permute.xlu0 %279 }
  0xa2   :  { %v419_v4 = vsel %vm411_vm9, %v404_v35, %v282_v46  ;;  %v417_v50 = vsel %vm411_vm9, %v402_v28, %v280_v49 }
  0xa5   :  { %v286_v22 = vpop.permute.xlu1 %285  ;;  %v284_v56 = vpop.permute.xlu0 %283 }
  0xa6   :  { %v1418_v57 = vsel %vm411_vm9, %v406_v36, %v286_v22  ;;  %v1421_v59 = vsel %vm411_vm9, %v398_v18, %v284_v56 }
  0xa9   :  { %v290_v60 = vpop.permute.xlu1 %289  ;;  %v288_v61 = vpop.permute.xlu0 %287 }
  0xaa   :  { %v1424_v32 = vsel %vm411_vm9, %v410_v42, %v290_v60  ;;  %v1427_v62 = vsel %vm411_vm9, %v408_v54, %v288_v61 }
  0xad   :  { %v308_v37 = vpop.permute.xlu1 %307  ;;  %v306_v63 = vpop.permute.xlu0 %305 }
  0xae   :  { %v432_v36 = vsel %vm428_vm10, %v415_v44, %v308_v37  ;;  %v430_v47 = vsel %vm428_vm10, %v413_v45, %v306_v63 }
  0xb1   :  { %v312_v0 = vpop.permute.xlu1 %311  ;;  %v310_v3 = vpop.permute.xlu0 %309 }
  0xb2   :  { %v436_v43 = vsel %vm428_vm10, %v419_v4, %v312_v0  ;;  %v434_v44 = vsel %vm428_vm10, %v417_v50, %v310_v3 }
  0xb5   :  { %v316_v5 = vpop.permute.xlu1 %315  ;;  %v314_v52 = vpop.permute.xlu0 %313 }
  0xb6   :  { %v440_v0 = vsel %vm428_vm10, %v1418_v57, %v316_v5  ;;  %v438_v3 = vsel %vm428_vm10, %v1421_v59, %v314_v52 }
  0xb9   :  { %v1429_v1 = vpop.permute.xlu1 %319  ;;  %v1431_v55 = vpop.permute.xlu0 %317 }
  0xbd   :  { %v326_v7 = vpop.permute.xlu1 %325  ;;  %v324_v14 = vpop.permute.xlu0 %323 }
  0xbe   :  { %v449_v38 = vsel %vm445_vm11, %v432_v36, %v326_v7  ;;  %v447_v48 = vsel %vm445_vm11, %v430_v47, %v324_v14 }
  0xc1   :  { %v330_v15 = vpop.permute.xlu1 %329  ;;  %v328_v16 = vpop.permute.xlu0 %327 }
  0xc2   :  { %v453_v49 = vsel %vm445_vm11, %v436_v43, %v330_v15  ;;  %v451_v22 = vsel %vm445_vm11, %v434_v44, %v328_v16  ;;  %v652_v43 = vunpack.c.l.bf16 %v1165_v8  ;;  %v653_v44 = vunpack.c.l.bf16 %v1160_v6 }
  0xc5   :  { %v334_v18 = vpop.permute.xlu1 %333  ;;  %v332_v19 = vpop.permute.xlu0 %331 }
  0xc6   :  { %v457_v15 = vsel %vm445_vm11, %v440_v0, %v334_v18  ;;  %v455_v16 = vsel %vm445_vm11, %v438_v3, %v332_v19  ;;  %v444_v18 = vsel %vm428_vm10, %v1424_v32, %v1429_v1  ;;  %v442_v19 = vsel %vm428_vm10, %v1427_v62, %v1431_v55 }
  0xc9   :  { %v1433_v20 = vpop.permute.xlu1 %337  ;;  %v1435_v51 = vpop.permute.xlu0 %335 }
  0xcd   :  { %v342_v58 = vpop.permute.xlu1 %341  ;;  %v340_v21 = vpop.permute.xlu0 %339 }
  0xce   :  { %v466_v39 = vsel %vm462_vm12, %v449_v38, %v342_v58  ;;  %v464_v40 = vsel %vm462_vm12, %v447_v48, %v340_v21 }
  0xd1   :  { %v1437_v23 = vpop.permute.xlu1 %345  ;;  %v344_v24 = vpop.permute.xlu0 %343 }
  0xd2   :  { %v470_v60 = vsel %vm462_vm12, %v453_v49, %v1437_v23  ;;  %v468_v61 = vsel %vm462_vm12, %v451_v22, %v344_v24  ;;  %v740_v49 = vcombine.low %v1165_v8, %v1160_v6  ;;  %v741_v22 = vcombine.low %v1175_v10, %v1269_v17 }
  0xd4   :  { %v748_v0 = vrot.slane %v740_v49, %v1177_v11  ;;  %v755_v3 = vrot.slane %v741_v22, %v1177_v11 }
  0xd5   :  { %v350_v25 = vpop.permute.xlu1 %349  ;;  %v348_v26 = vpop.permute.xlu0 %347 }
  0xd6   :  { %v474_v21 = vsel %vm462_vm12, %v457_v15, %v350_v25  ;;  %v472_v24 = vsel %vm462_vm12, %v455_v16, %v348_v26 }
  0xd9   :  { %v354_v27 = vpop.permute.xlu1 %353  ;;  %v352_v2 = vpop.permute.xlu0 %351 }
  0xda   :  { %v480_v41 = vsel %vm478_vm13, %v464_v40, %v354_v27 }
  0xdd   :  { %v358_v28 = vpop.permute.xlu1 %357  ;;  %v356_v29 = vpop.permute.xlu0 %355 }
  0xde   :  { %v482_v42 = vsel %vm478_vm13, %v466_v39, %v356_v29  ;;  %v484_v37 = vsel %vm478_vm13, %v468_v61, %v358_v28  ;;  %v461_v29 = vsel %vm445_vm11, %v444_v18, %v1433_v20 }
  0xdf   :  { %v477_v47 = vsel %vm462_vm12, %v461_v29, %v1437_v23  ;;  %v648_v23 = vld [vmem:[%s1616_s2] sm:$0xf] }
  0xe0   :  { %1083 = vmatprep.subr.msk.bf16.mxu1 %vm595_vm8, %v648_v23  ;;  %v1010_v29 = vld [vmem:[%s1618_s3] ss:$0 sm:$0xff] }
  0xe1   :  { %v362_v30 = vpop.permute.xlu1 %361  ;;  %v360_v31 = vpop.permute.xlu0 %359 }
  0xe2   :  { %v486_v4 = vsel %vm478_vm13, %v470_v60, %v360_v31  ;;  %v488_v27 = vsel %vm478_vm13, %v472_v24, %v362_v30  ;;  %v459_v30 = vsel %vm445_vm11, %v442_v19, %v1435_v51  ;;  %v493_v1 = vsel %vm478_vm13, %v477_v47, %v360_v31  ;;  %v649_v31 = vld [vmem:[%s1616_s2 + $0x4] sm:$0xf] }
  0xe3   :  { %v476_v32 = vsel %vm462_vm12, %v459_v30, %v352_v2  ;;  %v689_v2 = vsel %vm595_vm8, %v648_v23, 0 }
  0xe4   :  { %1053 = vmatpush3.bf16.msra.mxu1 %v689_v2 }
  0xe5   :  { %v366_v34 = vpop.permute.xlu1 %365  ;;  %v364_v35 = vpop.permute.xlu0 %363 }
  0xe6   :  { %v490_v57 = vsel %vm478_vm13, %v474_v21, %v364_v35  ;;  %v492_v62 = vsel %vm478_vm13, %v476_v32, %v366_v34  ;;  %v1006_v34 = vcombine.low %v648_v23, %v649_v31 }
  0xe8   :  { %1058 = vmatprep.subr.bf16.mxu1 %v1006_v34 }
  0xe9   :  { %v370_v54 = vpop.permute.xlu1 %369  ;;  %v368_v53 = vpop.permute.xlu0 %367 }
  0xea   :  { %v498_v45 = vsel %vm494_vm14, %v482_v42, %v370_v54  ;;  %v496_v46 = vsel %vm494_vm14, %v480_v41, %v368_v53  ;;  %v656_v41 = vunpack.c.l.bf16 %v1170_v9  ;;  %v657_v42 = vunpack.c.l.bf16 %v1182_v12 }
  0xeb   :  { %v527_v56 = vcombine.low %v496_v46, %v498_v45  ;;  %v658_v54 = vunpack.c.l.bf16 %v1187_v13  ;;  %v659_v53 = vunpack.c.l.bf16 %v1296_v33  ;;  %v654_v45 = vunpack.c.l.bf16 %v1175_v10 }
  0xec   :  { %v655_v46 = vunpack.c.l.bf16 %v1269_v17 }
  0xed   :  { %v374_v63 = vpop.permute.xlu1 %373  ;;  %v372_v50 = vpop.permute.xlu0 %371  ;;  %v535_v52 = vrot.slane %v527_v56, %v1177_v11  ;;  %v670_v56 = vcombine.low %v656_v41, %v657_v42  ;;  %v671_v60 = vcombine.low %v658_v54, %v659_v53 }
  0xee   :  { %v502_v7 = vsel %vm494_vm14, %v486_v4, %v374_v63  ;;  %v500_v14 = vsel %vm494_vm14, %v484_v37, %v372_v50  ;;  %v509_v38 = vsel %vm494_vm14, %v493_v1, %v374_v63  ;;  %v668_v37 = vcombine.low %v652_v43, %v653_v44 }
  0xef   :  { %v528_v58 = vcombine.low %v500_v14, %v502_v7  ;;  %v669_v4 = vcombine.low %v654_v45, %v655_v46 }
  0xf1   :  { %v378_v5 = vpop.permute.xlu1 %377  ;;  %v376_v59 = vpop.permute.xlu0 %375  ;;  %v542_v28 = vrot.slane %v528_v58, %v1177_v11 }
  0xf2   :  { %v506_v25 = vsel %vm494_vm14, %v490_v57, %v378_v5  ;;  %v504_v26 = vsel %vm494_vm14, %v488_v27, %v376_v59  ;;  %v756_v27 = vcombine.low %v748_v0, %v755_v3  ;;  %v1100_v57 = vld [vmem:[%s1616_s2 + $0x8] sm:$0xff]   ;;  %v757_v5 = vcombine.low %v1170_v9, %v1182_v12 }
  0xf3   :  { %v544_v35 = vcombine.low %v504_v26, %v506_v25  ;;  %v543_v36 = vcombine.low %v535_v52, %v542_v28  ;;  %v758_v59 = vcombine.low %v1187_v13, %v1296_v33  ;;  %v1101_v52 = vld [vmem:[%s1617_s5] sm:$0xff]   ;;  %v1102_v25 = vld [vmem:[%s1617_s5 + $0x8] sm:$0xff]   ;;  %v1103_v26 = vld [vmem:[%s1617_s5 + $0x10] sm:$0xff]  }
  0xf4   :  { %v765_v28 = vrot.slane %v757_v5, %v1177_v11 }
  0xf5   :  { %1048 = vmatprep.mubr.msk.bf16.mxu0 %vm588_vm15, %v543_v36  ;;  %v380_v55 = vpop.permute.xlu0 %379  ;;  %v552_v51 = vrot.slane %v544_v35, %v1177_v11  ;;  %v772_v18 = vrot.slane %v758_v59, %v1177_v11  ;;  %v1011_v35 = vld [vmem:[%s1619_s4] ss:$0 sm:$0xff] }
  0xf6   :  { %v508_v20 = vsel %vm494_vm14, %v492_v62, %v380_v55 }
  0xf7   :  { %v545_v48 = vcombine.low %v508_v20, %v509_v38  ;;  %v773_v19 = vcombine.low %v765_v28, %v772_v18 }
  0xf9   :  { %v559_v39 = vrot.slane %v545_v48, %v1177_v11  ;;  %v1104_v11 = vld [vmem:[%s1617_s5 + $0x18] sm:$0xff]  }
  0xfb   :  { %v560_v40 = vcombine.low %v552_v51, %v559_v39 }
  0xfd   :  { %1049 = vmatmul.mubr.msk.bf16.vlgmr.msra.gmra.mrb[0].mxu0 %vm588_vm15, %v560_v40 }
 0x1d0   :  { %v1050_v61 = vpop.f32.mrb[0].mxu0 }
 0x1d1   :  { %v633_v63 = vpop.f32.mrb[1].mxu0  ;;  %v678_v7 = vsub.f32 %v1050_v61, %v670_v56 }
 0x1d2   :  { %v1051_v50 = vpop.f32.mrb[2].mxu0  ;;  %v676_v16 = vsub.f32 %v633_v63, %v668_v37 }
 0x1d3   :  { %v679_v14 = vsub.f32 %v1051_v50, %v671_v60  ;;  %v636_v15 = vpop.f32.mrb[3].mxu0 }
 0x1d4   :  { %v677_v58 = vsub.f32 %v636_v15, %v669_v4 }
 0x1d5   :  { %v681_v21 = vpack.c.bf16 %v679_v14, %v678_v7 }
 0x1d6   :  { %v680_v24 = vpack.c.bf16 %v677_v58, %v676_v16 }
 0x1d8   :  { %1054 = vmatprep.mubr.msk.bf16.mxu1 %vm381_vm6, %v680_v24 }
 0x1d9   :  { %1055 = vmatmul.mubr.msk.bf16.vlgmr.msra.gmra.mrb[0].mxu1 %vm381_vm6, %v681_v21 }
 0x1da   :  { %1059 = vmatpush3.bf16.msra.mxu1 %v1006_v34  ;;  %1062 = vmatprep.mubr.msk.bf16.mxu1 %vm428_vm10, %v756_v27 }
 0x1db   :  { %1060 = vmatprep.subr.bf16.mxu1 %v1100_v57 }
 0x1de   :  { %1061 = vmatpush3.bf16.msra.mxu1 %v1100_v57 }
 0x1df   :  { %1066 = vmatprep.subr.bf16.mxu1 %v1101_v52 }
 0x1e5   :  { %1063 = vmatmul.mubr.msk.bf16.vlgmr.msra.gmra.mrb[0].mxu1 %vm428_vm10, %v773_v19 }
 0x1e6   :  { %1067 = vmatpush3.bf16.msra.mxu1 %v1101_v52 }
 0x1e7   :  { %1068 = vmatprep.subr.bf16.mxu1 %v1102_v25 }
 0x1ea   :  { %1069 = vmatpush3.bf16.msra.mxu1 %v1102_v25 }
 0x1eb   :  { %1070 = vmatprep.subr.bf16.mxu1 %v1103_v26 }
 0x1ee   :  { %1071 = vmatpush3.bf16.msra.mxu1 %v1103_v26 }
 0x1ef   :  { %1072 = vmatprep.subr.bf16.mxu1 %v1104_v11 }
 0x1f2   :  { %1073 = vmatpush3.bf16.msra.mxu1 %v1104_v11 }
 0x2b8   :  { %v1064_v30 = vpop.f32.mrb[0].mxu1 }
 0x2b9   :  { %v850_v36 = vmul.f32 %v1064_v30, %v1010_v29  ;;  %v826_v47 = vpop.f32.mrb[1].mxu1 }
 0x2ba   :  { %v848_v32 = vmul.f32 %v1010_v29, %v826_v47  ;;  %v1065_v1 = vpop.f32.mrb[2].mxu1 }
 0x2bb   :  { %v861_v62 = vadd.f32 %v1011_v35, %v850_v36  ;;  %v851_v55 = vmul.f32 %v1065_v1, %v1010_v29  ;;  %v829_v38 = vpop.f32.mrb[3].mxu1 }
 0x2bc   :  { %v859_v20 = vadd.f32 %v1011_v35, %v848_v32  ;;  %v849_v48 = vmul.f32 %v1010_v29, %v829_v38 }
 0x2bd   :  { %v862_v51 = vadd.f32 %v1011_v35, %v851_v55  ;;  %v865_v40 = vmax.f32 %v861_v62, 0.0 }
 0x2be   :  { %v860_v39 = vadd.f32 %v1011_v35, %v849_v48  ;;  %v863_v2 = vmax.f32 %v859_v20, 0.0 }
 0x2bf   :  { %v866_v23 = vmax.f32 %v862_v51, 0.0 }
 0x2c0   :  { %v864_v31 = vmax.f32 %v860_v39, 0.0 }
 0x2c1   :  { %v868_v34 = vpack.c.bf16 %v866_v23, %v865_v40 }
 0x2c2   :  { %v867_v49 = vpack.c.bf16 %v864_v31, %v863_v2 }
 0x2c4   :  { %1074 = vmatprep.mubr.msk.bf16.mxu1 %vm494_vm14, %v867_v49 }
 0x2c5   :  { %1075 = vmatmul.mubr.msk.bf16.vlgmr.msra.gmra.mrb[4].mxu1 %vm494_vm14, %v868_v34 }
 0x398   :  { %v1076_v22 = vpop.f32.mrb[4].mxu1 }
 0x399   :  { %v962_v56 = vcombine.high %v1076_v22, %v1076_v22  ;;  %v972_v60 = vadd.f32 %v1076_v22, %v656_v41  ;;  %v941_v61 = vpop.f32.mrb[5].mxu1 }
 0x39a   :  { %v960_v37 = vcombine.high %v941_v61, %v941_v61  ;;  %v968_v4 = vadd.f32 %v941_v61, %v652_v43  ;;  %v1077_v63 = vpop.f32.mrb[6].mxu1 }
 0x39b   :  { %v973_v50 = vadd.f32 %v962_v56, %v657_v42  ;;  %v980_v0 = vpack.c.bf16 %v972_v60, %v972_v60  ;;  %v963_v3 = vcombine.high %v1077_v63, %v1077_v63  ;;  %v974_v7 = vadd.f32 %v1077_v63, %v658_v54  ;;  %v944_v14 = vpop.f32.mrb[7].mxu1 }
 0x39c   :  { %v969_v9 = vadd.f32 %v960_v37, %v653_v44  ;;  %v976_v41 = vpack.c.bf16 %v968_v4, %v968_v4  ;;  %v961_v15 = vcombine.high %v944_v14, %v944_v14  ;;  %v970_v16 = vadd.f32 %v944_v14, %v654_v45 }
 0x39d   :  { %v981_v8 = vpack.c.bf16 %v973_v50, %v973_v50  ;;  %989 = vst.msk [vmem:[%s1620_s6 + $0x8] sm:$0x3] %vm984_vm0, %v980_v0  ;;  %v975_v12 = vadd.f32 %v963_v3, %v659_v53  ;;  %v982_v13 = vpack.c.bf16 %v974_v7, %v974_v7 }
 0x39e   :  { %v977_v42 = vpack.c.bf16 %v969_v9, %v969_v9  ;;  %985 = vst.msk [vmem:[%s1620_s6] sm:$0x3] %vm984_vm0, %v976_v41  ;;  %v971_v6 = vadd.f32 %v961_v15, %v655_v46  ;;  %v978_v10 = vpack.c.bf16 %v970_v16, %v970_v16 }
 0x39f   :  { %990 = vst.msk [vmem:[%s1620_s6 + $0xa] sm:$0x3] %vm984_vm0, %v981_v8  ;;  %v983_v54 = vpack.c.bf16 %v975_v12, %v975_v12  ;;  %991 = vst.msk [vmem:[%s1620_s6 + $0xc] sm:$0x3] %vm984_vm0, %v982_v13 }
 0x3a0   :  { %986 = vst.msk [vmem:[%s1620_s6 + $0x2] sm:$0x3] %vm984_vm0, %v977_v42  ;;  %v979_v33 = vpack.c.bf16 %v971_v6, %v971_v6  ;;  %987 = vst.msk [vmem:[%s1620_s6 + $0x4] sm:$0x3] %vm984_vm0, %v978_v10 }
 0x3a1   :  { %992 = vst.msk [vmem:[%s1620_s6 + $0xe] sm:$0x3] %vm984_vm0, %v983_v54 }
 0x3a2   :  { %988 = vst.msk [vmem:[%s1620_s6 + $0x6] sm:$0x3] %vm984_vm0, %v979_v33 }

// kernel: fasternet_forward.9
= control target key start
LH: loop header
LB: loop body
LE: loop exit
PB: predicated region body
PF: predicated region fallthrough
CT: control target
= control target key end

     0   :  { %vm23_vm0 = vcmask 254976   ;;  %v1640_v2 = vmov 0   ;;  %v1641_v5 = vmov 0.0   ;;  %vm34_vm1 = vcmask 261120   ;;  %s2011_s0 = inlined_call_operand.vmem [shape: bf16[2,16,32], index: 0, kind: input, shape index: {}]   ;;  %s2012_s1 = inlined_call_operand.vmem [shape: bf16[32,1280], index: 1, kind: input, shape index: {}]   ;;  %s2013_s2 = inlined_call_operand.vmem [shape: bf16[1280,8], index: 2, kind: input, shape index: {}]   ;;  %s2014_s3 = inlined_call_operand.vmem [shape: f32[1,8], index: 3, kind: input, shape index: {}]   ;;  %s2015_s4 = inlined_call_operand.hbm [shape: f32[2,8], index: 4, kind: output, shape index: {}]  }
   0x1   :  { %v1506_v0 = vld [vmem:[%s2012_s1 + $0x4] ss:$40 sps:$4 sm:$0xff]   ;;  %v1508_v1 = vld [vmem:[%s2012_s1] ss:$40 sps:$4 sm:$0xff]   ;;  %222 = vmatprep.mubr.bf16.mxu0 %v1640_v2  ;;  %345 = vmatprep.mubr.bf16.mxu1 %v1640_v2  ;;  %v1509_v3 = vld [vmem:[%s2012_s1 + $0x54] ss:$40 sps:$4 sm:$0xff]  }
   0x2   :  { %190 = vmatprep.subr.bf16.mxu0 %v1506_v0  ;;  %v1511_v4 = vld [vmem:[%s2012_s1 + $0x50] ss:$40 sps:$4 sm:$0xff]   ;;  %24 = vst.msk [vmem:[#allocation2] sm:$0x3] %vm23_vm0, %v1641_v5  ;;  %v1385_v6 = vld [vmem:[%s2011_s0] sm:$0xff]   ;;  %v1392_v9 = vld [vmem:[%s2011_s0 + $0x8] sm:$0xff]  }
   0x3   :  { %191 = vmatpush1.bf16.msra.mxu0 %v1508_v1  ;;  %v1386_v7 = vunpack.c.l.bf16 %v1385_v6  ;;  %v1387_v8 = vunpack.c.h.bf16 %v1385_v6  ;;  %v1390_v10 = vunpack.c.l.bf16 %v1392_v9  ;;  %v1391_v11 = vunpack.c.h.bf16 %v1392_v9  ;;  %v1514_v12 = vld [vmem:[%s2012_s1 + $0xc] ss:$40 sps:$4 sm:$0xff]   ;;  %v1524_v21 = vld [vmem:[%s2012_s1 + $0x1c] ss:$40 sps:$4 sm:$0xff]   ;;  %v1526_v23 = vld [vmem:[%s2012_s1 + $0x18] ss:$40 sps:$4 sm:$0xff]  }
   0x4   :  { %192 = vmatprep.subr.bf16.mxu0 %v1509_v3  ;;  %313 = vmatprep.subr.bf16.mxu1 %v1524_v21  ;;  %v1527_v25 = vld [vmem:[%s2012_s1 + $0x6c] ss:$40 sps:$4 sm:$0xff]   ;;  %v1529_v27 = vld [vmem:[%s2012_s1 + $0x68] ss:$40 sps:$4 sm:$0xff]   ;;  %v1536_v31 = vld [vmem:[%s2013_s2 + $0x40] sm:$0xff]   ;;  %vm55_vm2 = vcmask 1041409  }
   0x5   :  { %v35_v13 = vsel %vm34_vm1, %v1386_v7, 0.0  ;;  %v36_v14 = vsel %vm34_vm1, %v1387_v8, 0.0  ;;  %v44_v16 = vsel %vm34_vm1, %v1390_v10, 0.0  ;;  %v45_v17 = vsel %vm34_vm1, %v1391_v11, 0.0  ;;  %314 = vmatpush1.bf16.msra.mxu1 %v1526_v23  ;;  %v1512_v40 = vld [vmem:[%s2012_s1 + $0x8] ss:$40 sps:$4 sm:$0xff]  }
   0x6   :  { %v37_v15 = vadd.f32 %v36_v14, %v35_v13  ;;  %v46_v18 = vadd.f32 %v45_v17, %v44_v16  ;;  %315 = vmatprep.subr.bf16.mxu1 %v1527_v25  ;;  %v1517_v42 = vld [vmem:[%s2012_s1 + $0x5c] ss:$40 sps:$4 sm:$0xff]   ;;  %v1515_v45 = vld [vmem:[%s2012_s1 + $0x58] ss:$40 sps:$4 sm:$0xff]   ;;  %v1538_v46 = vld [vmem:[%s2013_s2 + $0x48] sm:$0xff]  }
   0x7   :  { %193 = vmatpush1.bf16.msra.mxu0 %v1511_v4  ;;  %v1537_v44 = vld [vmem:[%s2013_s2] sm:$0xff]   ;;  %v1520_v47 = vld [vmem:[%s2012_s1 + $0x14] ss:$40 sps:$4 sm:$0xff]   ;;  %v1539_v48 = vld [vmem:[%s2013_s2 + $0x8] sm:$0xff]  }
   0x8   :  { %v38_v19 = vrot.slane %v37_v15, 4  ;;  %231 = vmatprep.subr.bf16.mxu0 %v1514_v12  ;;  %v47_v20 = vrot.slane %v46_v18, 4  ;;  %v1540_v49 = vld [vmem:[%s2013_s2 + $0x50] sm:$0xff]   ;;  %v1523_v51 = vld [vmem:[%s2012_s1 + $0x64] ss:$40 sps:$4 sm:$0xff]   ;;  %v1544_v53 = vld [vmem:[%s2013_s2 + $0x58] sm:$0xff]  }
   0x9   :  { %316 = vmatpush1.bf16.msra.mxu1 %v1529_v27  ;;  %v25_v35 = vld [vmem:[#allocation2] sm:$0x3]  ;;  %v1518_v50 = vld [vmem:[%s2012_s1 + $0x10] ss:$40 sps:$4 sm:$0xff]   ;;  %v1532_v55 = vld [vmem:[%s2012_s1 + $0x24] ss:$40 sps:$4 sm:$0xff]  }
   0xa   :  { %v39_v22 = vadd.f32 %v38_v19, %v37_v15  ;;  %v48_v24 = vadd.f32 %v47_v20, %v46_v18  ;;  %1393 = vmatprep.subr.bf16.mxu1 %v1536_v31  ;;  %v1542_v52 = vld [vmem:[%s2013_s2 + $0x10] sm:$0xff]   ;;  %v1521_v54 = vld [vmem:[%s2012_s1 + $0x60] ss:$40 sps:$4 sm:$0xff]   ;;  %v1546_v56 = vld [vmem:[%s2013_s2 + $0x18] sm:$0xff]  }
   0xb   :  { %v1548_v57 = vld [vmem:[%s2013_s2 + $0x60] sm:$0xff]   ;;  %v1535_v59 = vld [vmem:[%s2012_s1 + $0x74] ss:$40 sps:$4 sm:$0xff]   ;;  %v1552_v61 = vld [vmem:[%s2013_s2 + $0x68] sm:$0xff]  }
   0xc   :  { %v40_v26 = vrot.slane %v39_v22, 2  ;;  %v49_v28 = vrot.slane %v48_v24, 2  ;;  %v1530_v58 = vld [vmem:[%s2012_s1 + $0x20] ss:$40 sps:$4 sm:$0xff]   ;;  %v1533_v62 = vld [vmem:[%s2012_s1 + $0x70] ss:$40 sps:$4 sm:$0xff]  }
   0xd   :  { %v1550_v60 = vld [vmem:[%s2013_s2 + $0x20] sm:$0xff]   ;;  %v1554_v0 = vld [vmem:[%s2013_s2 + $0x28] sm:$0xff]   ;;  %v1556_v1 = vld [vmem:[%s2013_s2 + $0x70] sm:$0xff]  }
   0xe   :  { %v41_v29 = vadd.f32 %v40_v26, %v39_v22  ;;  %v50_v30 = vadd.f32 %v49_v28, %v48_v24  ;;  %v1541_v63 = vld [vmem:[%s2013_s2 + $0xc0] sm:$0xff]   ;;  %v1545_v4 = vld [vmem:[%s2013_s2 + $0xc8] sm:$0xff]   ;;  %v1558_v5 = vld [vmem:[%s2013_s2 + $0x30] sm:$0xff]  }
   0xf   :  { %v1543_v3 = vld [vmem:[%s2013_s2 + $0x80] sm:$0xff]   ;;  %v1549_v6 = vld [vmem:[%s2013_s2 + $0xd0] sm:$0xff]   ;;  %v1553_v8 = vld [vmem:[%s2013_s2 + $0xd8] sm:$0xff]  }
  0x10   :  { %v42_v32 = vrot.slane %v41_v29, 1  ;;  %v51_v33 = vrot.slane %v50_v30, 1  ;;  %v1551_v7 = vld [vmem:[%s2013_s2 + $0x90] sm:$0xff]   ;;  %v1555_v9 = vld [vmem:[%s2013_s2 + $0x98] sm:$0xff]   ;;  %v1557_v10 = vld [vmem:[%s2013_s2 + $0xe0] sm:$0xff]  }
  0x11   :  { %v1559_v11 = vld [vmem:[%s2013_s2 + $0xa0] sm:$0xff]  }
  0x12   :  { %v43_v34 = vadd.f32 %v42_v32, %v41_v29  ;;  %v52_v36 = vadd.f32 %v51_v33, %v50_v30 }
  0x14   :  { %v56_v37 = vsel %vm55_vm2, %v52_v36, %v43_v34 }
  0x15   :  { %v58_v38 = vadd.f32 %v56_v37, %v25_v35 }
  0x17   :  { %60 = vst.msk [vmem:[#allocation2] sm:$0x3] %vm23_vm0, %v58_v38 }
  0x1e   :  { %v64_v39 = vld [vmem:[#allocation2] sm:$0x3] }
  0x1f   :  { %v65_v41 = vmul.f32 0.0625, %v64_v39 }
  0x21   :  { %v66_v43 = vpack.c.bf16 %v65_v41, %v65_v41 }
  0x23   :  { %1298 = vmatmul.mubr.msk.bf16.vlgmr.msra.gmra.mrb[0].mxu0 %vm34_vm1, %v66_v43  ;;  %1301 = vmatmul.mubr.msk.bf16.vlgmr.msra.gmra.mrb[0].mxu1 %vm34_vm1, %v66_v43 }
  0x24   :  { %232 = vmatpush1.bf16.msra.mxu0 %v1512_v40  ;;  %263 = vmatprep.mubr.bf16.mxu0 %v1640_v2 }
  0x25   :  { %233 = vmatprep.subr.bf16.mxu0 %v1517_v42  ;;  %1394 = vmatpush3.bf16.msra.mxu1 %v1537_v44 }
  0x26   :  { %1395 = vmatprep.subr.bf16.mxu1 %v1538_v46 }
  0x28   :  { %234 = vmatpush1.bf16.msra.mxu0 %v1515_v45 }
  0x29   :  { %272 = vmatprep.subr.bf16.mxu0 %v1520_v47  ;;  %1396 = vmatpush3.bf16.msra.mxu1 %v1539_v48 }
  0x2a   :  { %1397 = vmatprep.subr.bf16.mxu1 %v1540_v49 }
  0x2b   :  { %1299 = vmatmul.mubr.msk.bf16.vlgmr.msra.gmra.mrb[4].mxu0 %vm34_vm1, %v66_v43 }
  0x2c   :  { %273 = vmatpush1.bf16.msra.mxu0 %v1518_v50  ;;  %304 = vmatprep.mubr.bf16.mxu0 %v1640_v2 }
  0x2d   :  { %274 = vmatprep.subr.bf16.mxu0 %v1523_v51  ;;  %1398 = vmatpush3.bf16.msra.mxu1 %v1542_v52 }
  0x2e   :  { %1399 = vmatprep.subr.bf16.mxu1 %v1544_v53 }
  0x30   :  { %275 = vmatpush1.bf16.msra.mxu0 %v1521_v54 }
  0x31   :  { %354 = vmatprep.subr.bf16.mxu0 %v1532_v55  ;;  %1400 = vmatpush3.bf16.msra.mxu1 %v1546_v56 }
  0x32   :  { %1401 = vmatprep.subr.bf16.mxu1 %v1548_v57 }
  0x33   :  { %1300 = vmatmul.mubr.msk.bf16.vlgmr.msra.gmra.mrb[8].mxu0 %vm34_vm1, %v66_v43 }
  0x34   :  { %355 = vmatpush1.bf16.msra.mxu0 %v1530_v58  ;;  %386 = vmatprep.mubr.bf16.mxu0 %v1640_v2  ;;  %v1547_v2 = vld [vmem:[%s2013_s2 + $0x88] sm:$0xff]  }
  0x35   :  { %356 = vmatprep.subr.bf16.mxu0 %v1535_v59  ;;  %1402 = vmatpush3.bf16.msra.mxu1 %v1550_v60 }
  0x36   :  { %1403 = vmatprep.subr.bf16.mxu1 %v1552_v61 }
  0x38   :  { %357 = vmatpush1.bf16.msra.mxu0 %v1533_v62 }
  0x39   :  { %1415 = vmatprep.subr.bf16.mxu0 %v1541_v63  ;;  %1404 = vmatpush3.bf16.msra.mxu1 %v1554_v0 }
  0x3a   :  { %1405 = vmatprep.subr.bf16.mxu1 %v1556_v1 }
  0x3b   :  { %1302 = vmatmul.mubr.msk.bf16.vlgmr.msra.gmra.mrb[12].mxu0 %vm34_vm1, %v66_v43 }
  0x3c   :  { %1416 = vmatpush3.bf16.msra.mxu0 %v1543_v3 }
  0x3d   :  { %1417 = vmatprep.subr.bf16.mxu0 %v1545_v4  ;;  %1406 = vmatpush3.bf16.msra.mxu1 %v1558_v5 }
  0x40   :  { %1418 = vmatpush3.bf16.msra.mxu0 %v1547_v2 }
  0x41   :  { %1419 = vmatprep.subr.bf16.mxu0 %v1549_v6 }
  0x44   :  { %1420 = vmatpush3.bf16.msra.mxu0 %v1551_v7 }
  0x45   :  { %1421 = vmatprep.subr.bf16.mxu0 %v1553_v8 }
  0x48   :  { %1422 = vmatpush3.bf16.msra.mxu0 %v1555_v9 }
  0x49   :  { %1423 = vmatprep.subr.bf16.mxu0 %v1557_v10 }
  0x4a   :  { %9 = vsyncpa [#allocation4], 0  ;;  %v1560_v12 = vld [vmem:[%s2013_s2 + $0x78] sm:$0xff]   ;;  %v1561_v13 = vld [vmem:[%s2013_s2 + $0xe8] sm:$0xff]   ;;  %vm1262_vm3 = vcmask 58368  }
  0x4b   :  { %v1562_v14 = vld [vmem:[%s2013_s2 + $0x38] sm:$0xff]   ;;  %v1563_v15 = vld [vmem:[%s2013_s2 + $0xa8] sm:$0xff]   ;;  %1407 = vmatprep.subr.bf16.mxu1 %v1560_v12  ;;  %v1564_v16 = vld [vmem:[%s2013_s2 + $0xf0] sm:$0xff]  }
  0x4c   :  { %1424 = vmatpush3.bf16.msra.mxu0 %v1559_v11  ;;  %1408 = vmatpush3.bf16.msra.mxu1 %v1562_v14  ;;  %v1565_v17 = vld [vmem:[%s2013_s2 + $0x140] sm:$0xff]   ;;  %v1566_v18 = vld [vmem:[%s2013_s2 + $0xb0] sm:$0xff]   ;;  %v1568_v19 = vld [vmem:[%s2013_s2 + $0xf8] sm:$0xff]  }
  0x4d   :  { %1425 = vmatprep.subr.bf16.mxu0 %v1561_v13  ;;  %1437 = vmatprep.subr.bf16.mxu1 %v1565_v17  ;;  %v1570_v20 = vld [vmem:[%s2013_s2 + $0xb8] sm:$0xff]   ;;  %v1573_v21 = vld [vmem:[%s2013_s2 + $0x1c0] sm:$0xff]   ;;  %v1569_v35 = vld [vmem:[%s2013_s2 + $0x148] sm:$0xff]  }
  0x4e   :  { %v1567_v33 = vld [vmem:[%s2013_s2 + $0x100] sm:$0xff]   ;;  %v1571_v37 = vld [vmem:[%s2013_s2 + $0x108] sm:$0xff]   ;;  %v1572_v40 = vld [vmem:[%s2013_s2 + $0x150] sm:$0xff]  }
  0x4f   :  { %v1574_v47 = vld [vmem:[%s2013_s2 + $0x110] sm:$0xff]   ;;  %v1575_v48 = vld [vmem:[%s2013_s2 + $0x180] sm:$0xff]   ;;  %v1576_v49 = vld [vmem:[%s2013_s2 + $0x158] sm:$0xff]  }
  0x50   :  { %1426 = vmatpush3.bf16.msra.mxu0 %v1563_v15  ;;  %v1577_v50 = vld [vmem:[%s2013_s2 + $0x1c8] sm:$0xff]   ;;  %v1578_v52 = vld [vmem:[%s2013_s2 + $0x118] sm:$0xff]   ;;  %v1580_v55 = vld [vmem:[%s2013_s2 + $0x160] sm:$0xff]  }
  0x51   :  { %1427 = vmatprep.subr.bf16.mxu0 %v1564_v16  ;;  %v1579_v53 = vld [vmem:[%s2013_s2 + $0x188] sm:$0xff]   ;;  %v1581_v56 = vld [vmem:[%s2013_s2 + $0x1d0] sm:$0xff]   ;;  %v1582_v61 = vld [vmem:[%s2013_s2 + $0x120] sm:$0xff]  }
  0x52   :  { %v1583_v62 = vld [vmem:[%s2013_s2 + $0x190] sm:$0xff]   ;;  %v1584_v0 = vld [vmem:[%s2013_s2 + $0x168] sm:$0xff]   ;;  %v1585_v1 = vld [vmem:[%s2013_s2 + $0x1d8] sm:$0xff]  }
  0x53   :  { %v1586_v3 = vld [vmem:[%s2013_s2 + $0x128] sm:$0xff]   ;;  %v1587_v4 = vld [vmem:[%s2013_s2 + $0x198] sm:$0xff]   ;;  %v1588_v2 = vld [vmem:[%s2013_s2 + $0x170] sm:$0xff]  }
  0x54   :  { %1428 = vmatpush3.bf16.msra.mxu0 %v1566_v18  ;;  %v1589_v6 = vld [vmem:[%s2013_s2 + $0x1e0] sm:$0xff]   ;;  %v1590_v10 = vld [vmem:[%s2013_s2 + $0x130] sm:$0xff]   ;;  %v1592_v12 = vld [vmem:[%s2013_s2 + $0x178] sm:$0xff]  }
  0x55   :  { %1429 = vmatprep.subr.bf16.mxu0 %v1568_v19  ;;  %v1591_v11 = vld [vmem:[%s2013_s2 + $0x1a0] sm:$0xff]   ;;  %v1593_v13 = vld [vmem:[%s2013_s2 + $0x1e8] sm:$0xff]   ;;  %v1594_v15 = vld [vmem:[%s2013_s2 + $0x138] sm:$0xff]  }
  0x56   :  { %v1595_v16 = vld [vmem:[%s2013_s2 + $0x1a8] sm:$0xff]   ;;  %v1596_v17 = vld [vmem:[%s2013_s2 + $0x1f0] sm:$0xff]   ;;  %v1597_v18 = vld [vmem:[%s2013_s2 + $0x240] sm:$0xff]  }
  0x58   :  { %1430 = vmatpush3.bf16.msra.mxu0 %v1570_v20 }
  0x59   :  { %1459 = vmatprep.subr.bf16.mxu0 %v1573_v21  ;;  %v1598_v21 = vld [vmem:[%s2013_s2 + $0x1b0] sm:$0xff]  }
  0xf6   :  { %v224_v22 = vpop.f32.mrb[0].mxu0  ;;  %v1852_v23 = vpop.f32.mrb[0].mxu1 }
  0xf7   :  { %v395_v24 = vmax.f32 %v224_v22, 0.0  ;;  %v226_v25 = vpop.f32.mrb[1].mxu0  ;;  %v349_v26 = vpop.f32.mrb[1].mxu1  ;;  %v1599_v22 = vld [vmem:[%s2013_s2 + $0x200] sm:$0xff]  }
  0xf8   :  { %v396_v27 = vmax.f32 %v226_v25, 0.0  ;;  %v228_v28 = vpop.f32.mrb[2].mxu0  ;;  %v351_v29 = vpop.f32.mrb[2].mxu1  ;;  %v402_v43 = vmax.f32 %v349_v26, 0.0  ;;  %v1601_v25 = vld [vmem:[%s2013_s2 + $0x248] sm:$0xff]  }
  0xf9   :  { %v229_v30 = vpop.f32.mrb[3].mxu0  ;;  %v352_v31 = vpop.f32.mrb[3].mxu1  ;;  %v405_v34 = vpack.c.bf16 %v395_v24, %v395_v24  ;;  %v1600_v24 = vld [vmem:[%s2013_s2 + $0x1f8] sm:$0xff]   ;;  %v1603_v29 = vld [vmem:[%s2013_s2 + $0x208] sm:$0xff]  }
  0xfa   :  { %v406_v32 = vpack.c.bf16 %v396_v27, %v396_v27  ;;  %v412_v51 = vpack.c.bf16 %v402_v43, %v402_v43  ;;  %v401_v27 = vmax.f32 %v1852_v23, 0.0  ;;  %v1602_v28 = vld [vmem:[%s2013_s2 + $0x1b8] sm:$0xff]   ;;  %v1604_v30 = vld [vmem:[%s2013_s2 + $0x250] sm:$0xff]  }
  0xfb   :  { %v1605_v23 = vld [vmem:[%s2013_s2 + $0x210] sm:$0xff]  }
  0xfc   :  { %1094 = vmatprep.mubr.bf16.mxu1 %v406_v32  ;;  %v411_v31 = vpack.c.bf16 %v401_v27, %v401_v27  ;;  %v1606_v32 = vld [vmem:[%s2013_s2 + $0x258] sm:$0xff]  }
  0xfd   :  { %1095 = vmatmul.mubr.bf16.vlgmr.msra.gmra.mrb[4].mxu1 %v405_v34  ;;  %v1608_v34 = vld [vmem:[%s2013_s2 + $0x260] sm:$0xff]  }
  0xfe   :  { %1438 = vmatpush3.bf16.msra.mxu1 %v1567_v33  ;;  %v265_v36 = vpop.f32.mrb[4].mxu0  ;;  %v1607_v33 = vld [vmem:[%s2013_s2 + $0x218] sm:$0xff]  }
  0xff   :  { %v397_v38 = vmax.f32 %v265_v36, 0.0  ;;  %v267_v39 = vpop.f32.mrb[5].mxu0  ;;  %1439 = vmatprep.subr.bf16.mxu1 %v1569_v35  ;;  %v1609_v35 = vld [vmem:[%s2013_s2 + $0x220] sm:$0xff]   ;;  %v1610_v36 = vld [vmem:[%s2013_s2 + $0x268] sm:$0xff]  }
 0x100   :  { %v398_v41 = vmax.f32 %v267_v39, 0.0  ;;  %v269_v42 = vpop.f32.mrb[6].mxu0  ;;  %v1613_v39 = vld [vmem:[%s2013_s2 + $0x230] sm:$0xff]  }
 0x101   :  { %v407_v44 = vpack.c.bf16 %v397_v38, %v397_v38  ;;  %v270_v45 = vpop.f32.mrb[7].mxu0  ;;  %v1612_v38 = vld [vmem:[%s2013_s2 + $0x270] sm:$0xff]  }
 0x102   :  { %v408_v46 = vpack.c.bf16 %v398_v41, %v398_v41  ;;  %1440 = vmatpush3.bf16.msra.mxu1 %v1571_v37  ;;  %v1611_v37 = vld [vmem:[%s2013_s2 + $0x228] sm:$0xff]   ;;  %v1615_v41 = vld [vmem:[%s2013_s2 + $0x238] sm:$0xff]  }
 0x103   :  { %1441 = vmatprep.subr.bf16.mxu1 %v1572_v40  ;;  %v1614_v40 = vld [vmem:[%s2013_s2 + $0x278] sm:$0xff]   ;;  %s1642_s2 = smov [#allocation3]  }
 0x104   :  { %1134 = vmatprep.mubr.bf16.mxu0 %v408_v46 }
 0x105   :  { %1135 = vmatmul.mubr.bf16.vlgmr.msra.gmra.mrb[16].mxu0 %v407_v44 }
 0x106   :  { %1442 = vmatpush3.bf16.msra.mxu1 %v1574_v47  ;;  %1460 = vmatpush3.bf16.msra.mxu0 %v1575_v48  ;;  %v306_v54 = vpop.f32.mrb[8].mxu0 }
 0x107   :  { %1443 = vmatprep.subr.bf16.mxu1 %v1576_v49  ;;  %1461 = vmatprep.subr.bf16.mxu0 %v1577_v50  ;;  %v308_v57 = vpop.f32.mrb[9].mxu0  ;;  %v399_v14 = vmax.f32 %v306_v54, 0.0  ;;  %v1303_v49 = vld [vmem:[%s2014_s3] ss:$0 sm:$0xff]  ;;  %s1270_s3 = sshll.u32 %s1642_s2, 4  ;;  %s1271_s3 = int_to_ptr.vmem [resolvable:$true] %s1270_s3 }
 0x108   :  { %v400_v58 = vmax.f32 %v308_v57, 0.0  ;;  %v310_v59 = vpop.f32.mrb[10].mxu0  ;;  %1214 = vmatprep.mubr.bf16.mxu0 %v412_v51  ;;  %s1616_s27 = scalar_lea.vmem %s1271_s3, 32  ;;  %p1621_p1 = scmp.lt.s32.totalorder %s1271_s3, %s1271_s3 }
 0x109   :  { %v311_v60 = vpop.f32.mrb[11].mxu0  ;;  %v409_v20 = vpack.c.bf16 %v399_v14, %v399_v14  ;;  %p1617_p0 = scmp.ne.s32.totalorder %s1271_s3, %s1616_s27  ;;  %p1622_p2 = scmp.lt.s32.totalorder %s1616_s27, %s1616_s27 }
 0x10a   :  { %1444 = vmatpush3.bf16.msra.mxu1 %v1578_v52  ;;  %1462 = vmatpush3.bf16.msra.mxu0 %v1579_v53  ;;  %v410_v63 = vpack.c.bf16 %v400_v58, %v400_v58 }
 0x10b   :  { %1445 = vmatprep.subr.bf16.mxu1 %v1580_v55  ;;  %1463 = vmatprep.subr.bf16.mxu0 %v1581_v56  ;;  %p1623_p3 = por %p1622_p2, %p1621_p1 }
 0x10c   :  { %1174 = vmatprep.mubr.bf16.mxu1 %v410_v63 }
 0x10d   :  { %p1624_p4 = pnand %p1623_p3, %p1617_p0 }
 0x10e   :  { %1446 = vmatpush3.bf16.msra.mxu1 %v1582_v61  ;;  %1464 = vmatpush3.bf16.msra.mxu0 %v1583_v62  ;;  %v1908_v5 = vpop.f32.mrb[12].mxu0 }
 0x10f   :  { %1447 = vmatprep.subr.bf16.mxu1 %v1584_v0  ;;  %1465 = vmatprep.subr.bf16.mxu0 %v1585_v1  ;;  %v390_v7 = vpop.f32.mrb[13].mxu0  ;;  %v403_v42 = vmax.f32 %v1908_v5, 0.0 }
 0x110   :  { %v392_v8 = vpop.f32.mrb[14].mxu0  ;;  %v404_v19 = vmax.f32 %v390_v7, 0.0 }
 0x111   :  { %v393_v9 = vpop.f32.mrb[15].mxu0  ;;  %v413_v43 = vpack.c.bf16 %v403_v42, %v403_v42 }
 0x112   :  { %1448 = vmatpush3.bf16.msra.mxu1 %v1586_v3  ;;  %1466 = vmatpush3.bf16.msra.mxu0 %v1587_v4  ;;  %v414_v26 = vpack.c.bf16 %v404_v19, %v404_v19 }
 0x113   :  { %1449 = vmatprep.subr.bf16.mxu1 %v1588_v2  ;;  %1467 = vmatprep.subr.bf16.mxu0 %v1589_v6 }
 0x116   :  { %1450 = vmatpush3.bf16.msra.mxu1 %v1590_v10  ;;  %1468 = vmatpush3.bf16.msra.mxu0 %v1591_v11 }
 0x117   :  { %1451 = vmatprep.subr.bf16.mxu1 %v1592_v12  ;;  %1469 = vmatprep.subr.bf16.mxu0 %v1593_v13 }
 0x11a   :  { %1452 = vmatpush3.bf16.msra.mxu1 %v1594_v15  ;;  %1470 = vmatpush3.bf16.msra.mxu0 %v1595_v16 }
 0x11b   :  { %1471 = vmatprep.subr.bf16.mxu0 %v1596_v17  ;;  %1481 = vmatprep.subr.bf16.mxu1 %v1597_v18 }
 0x11d   :  { %1175 = vmatmul.mubr.bf16.vlgmr.msra.gmra.mrb[8].mxu1 %v409_v20 }
 0x11e   :  { %1472 = vmatpush3.bf16.msra.mxu0 %v1598_v21  ;;  %1482 = vmatpush3.bf16.msra.mxu1 %v1599_v22 }
 0x11f   :  { %1473 = vmatprep.subr.bf16.mxu0 %v1600_v24  ;;  %1483 = vmatprep.subr.bf16.mxu1 %v1601_v25 }
 0x120   :  { %1254 = vmatprep.mubr.bf16.mxu1 %v414_v26 }
 0x122   :  { %1474 = vmatpush3.bf16.msra.mxu0 %v1602_v28  ;;  %1484 = vmatpush3.bf16.msra.mxu1 %v1603_v29 }
 0x123   :  { %1485 = vmatprep.subr.bf16.mxu1 %v1604_v30 }
 0x125   :  { %1215 = vmatmul.mubr.bf16.vlgmr.msra.gmra.mrb[20].mxu0 %v411_v31 }
 0x126   :  { %1486 = vmatpush3.bf16.msra.mxu1 %v1605_v23 }
 0x127   :  { %1487 = vmatprep.subr.bf16.mxu1 %v1606_v32 }
 0x12a   :  { %1488 = vmatpush3.bf16.msra.mxu1 %v1607_v33 }
 0x12b   :  { %1489 = vmatprep.subr.bf16.mxu1 %v1608_v34 }
 0x12e   :  { %1490 = vmatpush3.bf16.msra.mxu1 %v1609_v35 }
 0x12f   :  { %1491 = vmatprep.subr.bf16.mxu1 %v1610_v36 }
 0x132   :  { %1492 = vmatpush3.bf16.msra.mxu1 %v1611_v37 }
 0x133   :  { %1493 = vmatprep.subr.bf16.mxu1 %v1612_v38 }
 0x136   :  { %1494 = vmatpush3.bf16.msra.mxu1 %v1613_v39 }
 0x137   :  { %1495 = vmatprep.subr.bf16.mxu1 %v1614_v40 }
 0x13a   :  { %1496 = vmatpush3.bf16.msra.mxu1 %v1615_v41 }
 0x13d   :  { %1255 = vmatmul.mubr.bf16.vlgmr.msra.gmra.mrb[12].mxu1 %v413_v43 }
 0x1d0   :  { %v1409_v44 = vpop.f32.mrb[4].mxu1 }
 0x1d1   :  { %v1410_v45 = vpop.f32.mrb[5].mxu1 }
 0x1d2   :  { %v1411_v46 = vadd.f32 %v1410_v45, %v1409_v44  ;;  %v1412_v47 = vpop.f32.mrb[6].mxu1 }
 0x1d3   :  { %v1413_v48 = vpop.f32.mrb[7].mxu1 }
 0x1d4   :  { %v1097_v52 = vadd.f32 %v1411_v46, %v1303_v49 }
 0x1d8   :  { %v1431_v50 = vpop.f32.mrb[16].mxu0 }
 0x1d9   :  { %v1432_v51 = vpop.f32.mrb[17].mxu0 }
 0x1da   :  { %v1433_v53 = vadd.f32 %v1432_v51, %v1431_v50  ;;  %v1434_v54 = vpop.f32.mrb[18].mxu0 }
 0x1db   :  { %v1435_v55 = vpop.f32.mrb[19].mxu0 }
 0x1dc   :  { %v1137_v56 = vadd.f32 %v1433_v53, %v1097_v52 }
 0x1f0   :  { %v1453_v57 = vpop.f32.mrb[8].mxu1 }
 0x1f1   :  { %v1454_v58 = vpop.f32.mrb[9].mxu1 }
 0x1f2   :  { %v1455_v59 = vadd.f32 %v1454_v58, %v1453_v57  ;;  %v1456_v60 = vpop.f32.mrb[10].mxu1 }
 0x1f3   :  { %v1457_v61 = vpop.f32.mrb[11].mxu1 }
 0x1f4   :  { %v1177_v62 = vadd.f32 %v1455_v59, %v1137_v56 }
 0x1f8   :  { %v1475_v63 = vpop.f32.mrb[20].mxu0 }
 0x1f9   :  { %v1476_v0 = vpop.f32.mrb[21].mxu0 }
 0x1fa   :  { %v1477_v1 = vadd.f32 %v1476_v0, %v1475_v63  ;;  %v1478_v3 = vpop.f32.mrb[22].mxu0 }
 0x1fb   :  { %v1479_v4 = vpop.f32.mrb[23].mxu0 }
 0x1fc   :  { %v1217_v5 = vadd.f32 %v1477_v1, %v1177_v62 }
 0x210   :  { %v1497_v2 = vpop.f32.mrb[12].mxu1 }
 0x211   :  { %v1498_v6 = vpop.f32.mrb[13].mxu1 }
 0x212   :  { %v1499_v7 = vadd.f32 %v1498_v6, %v1497_v2  ;;  %v1500_v8 = vpop.f32.mrb[14].mxu1 }
 0x213   :  { %v1501_v9 = vpop.f32.mrb[15].mxu1 }
 0x214   :  { %v1257_v10 = vadd.f32 %v1499_v7, %v1217_v5 }
 0x216   :  { %1263 = vst.msk [vmem:[#allocation3] sm:$0x3] %vm1262_vm3, %v1257_v10 }
 0x217   :  { %1627 = shalt.err (!%p1624_p4)
}
 0x218   :  { %s1628_s29 = scalar_lea.hbm %s2015_s4, 32 }
 0x219   :  { %p1629_p5 = scmp.ne.s32.totalorder %s2015_s4, %s1628_s29  ;;  %p1632_p6 = scmp.lt.u32.totalorder %s1628_s29, %s2015_s4 }
 0x21b   :  { %p1634_p7 = pnand %p1632_p6, %p1629_p5 }
 0x21d   :  { %1637 = shalt.err (!%p1634_p7)
}
 0x21e   :  { %1273 = dma.vmem_to_hbm [thread:$0]  %s1271_s3, 32, %s2015_s4, [#allocation4]  }
 0x21f   :  { %1638 = dma.done.wait [#allocation4], 32  }
 0x220   :  { %1639 = vsyncadd [#allocation4], 4294967264 }
 0x221   :  { %1277 = vsyncpa [#allocation4], 1 }

</bundles_post_ra>
